<compile_context>
chip_gen: v6e
topology: v6e:2x2x1
jax: 0.10.0
libtpu: 0.0.40
codegen_flags: <defaults>
</compile_context>

<pallas_src>
import functools

import numpy as np
import jax
import jax.numpy as jnp
from jax import lax
from jax.experimental import pallas as pl
from jax.experimental.pallas import tpu as pltpu


def _round_up(x, m):
    return (x + m - 1) // m * m


# ----------------------------------------------------------------------------
# Sliding-window sum helpers (separable k x k box filter, VALID, stride 1)
# ----------------------------------------------------------------------------
def _wsum_slices(a, k, axis):
    """VALID sliding-window sum of length k along `axis` via static slices.

    Binary-doubling formulation (~2*log2(k) slice+add pairs instead of k-1).
    out.shape[axis] == a.shape[axis] - k + 1.
    """
    if k == 1:
        return a
    n = a.shape[axis]
    out_n = n - k + 1

    def sl(x, start, length):
        return lax.slice_in_dim(x, start, start + length, axis=axis)

    sums = {1: a}
    p = 1
    while 2 * p <= k:
        s = sums[p]
        m = s.shape[axis]
        sums[2 * p] = sl(s, 0, m - p) + sl(s, p, m - p)
        p *= 2

    res = None
    off = 0
    rem = k
    for q in sorted(sums, reverse=True):
        if rem >= q:
            piece = sl(sums[q], off, out_n)
            res = piece if res is None else res + piece
            off += q
            rem -= q
    return res


def _wsum_lane_roll(a, k, out_w):
    """VALID sliding-window sum of length k along the last (lane) axis.

    Computed at *full* lane width with pltpu.roll (XLU rotate, separate issue
    slot from the VALU), then cropped once to `out_w`.  Positions >= out_w of
    the intermediate results contain wrap-around garbage and are never read.
    """
    if k == 1:
        return a[..., :out_w]
    axis = a.ndim - 1
    n = a.shape[axis]

    def shifted(x, p):  # shifted(x, p)[..., j] == x[..., j + p]  (mod n)
        return pltpu.roll(x, shift=(n - p) % n, axis=axis)

    sums = {1: a}
    p = 1
    while 2 * p <= k:
        s = sums[p]
        sums[2 * p] = s + shifted(s, p)
        p *= 2

    res = None
    off = 0
    rem = k
    for q in sorted(sums, reverse=True):
        if rem >= q:
            piece = sums[q] if off == 0 else shifted(sums[q], off)
            res = piece if res is None else res + piece
            off += q
            rem -= q
    return res[..., :out_w]


# ----------------------------------------------------------------------------
# Pallas kernel: one (batch, channel-group) slab per grid step
# ----------------------------------------------------------------------------
def _ktv_kernel(l_ref, r_ref, i_ref,
                ax_ref, tx_ref, ay_ref, ty_ref, s_ref,
                *, k, wx, wy, use_roll):
    # Block refs: inputs (cblk, H, W); map outputs (cblk, hx, wxp)/(cblk, hy, wyp)
    # (lane-padded); scalar output (1, 2).
    W = l_ref.shape[-1]
    inv_kk = 1.0 / float(k * k)

    def load(ref):
        return ref[...].astype(jnp.float32)

    def box_mean(a, out_w):
        # Separable k x k sliding-window mean (stride 1, VALID).
        s = _wsum_slices(a, k, axis=a.ndim - 2)        # sublane (H) pass first
        if use_roll:
            s = _wsum_lane_roll(s, k, out_w)           # lane pass via XLU rolls
        else:
            s = _wsum_slices(s, k, axis=a.ndim - 1)    # lane pass via slices
        return s * inv_kk

    def l1_sum(d, valid_w):
        # sum(|d|) over all rows/channels and columns < valid_w  ->  (1, 1)
        d = jnp.abs(d)
        if valid_w != d.shape[-1]:
            col = lax.broadcasted_iota(jnp.int32, d.shape, d.ndim - 1)
            d = jnp.where(col < valid_w, d, 0.0)
        s = jnp.sum(d, axis=0)                         # (rows, width)
        s = jnp.sum(s, axis=1, keepdims=True)          # (rows, 1)
        return jnp.sum(s, axis=0, keepdims=True)       # (1, 1)

    # ---- x direction: gradient along H (sublanes) ---------------------------
    def dh(ref):
        x = load(ref)
        return x[:, 1:, :] - x[:, :-1, :]              # (cblk, H-1, W)

    gl, gr, gi = dh(l_ref), dh(r_ref), dh(i_ref)
    s_ref[:, 0:1] = l1_sum(gl + gr - gi, W)
    # box mean is linear:  boxmean(|gl|) + boxmean(|gr|) == boxmean(|gl|+|gr|)
    ax_ref[:, :, :wx] = box_mean(jnp.abs(gl) + jnp.abs(gr), wx)   # nx_l + nx_r
    tx_ref[:, :, :wx] = box_mean(jnp.abs(gi), wx)                 # nx_i

    # ---- y direction: gradient along W (lanes) -------------------------------
    def dw(ref):
        x = load(ref)
        if use_roll:
            # full-width gradient: col j holds x[j+1]-x[j]; col W-1 is garbage
            # (wrap-around) and is never read by the valid output region.
            return pltpu.roll(x, shift=W - 1, axis=2) - x          # (cblk, H, W)
        return x[:, :, 1:] - x[:, :, :-1]                          # (cblk, H, W-1)

    gl, gr, gi = dw(l_ref), dw(r_ref), dw(i_ref)
    s_ref[:, 1:2] = l1_sum(gl + gr - gi, W - 1)
    ay_ref[:, :, :wy] = box_mean(jnp.abs(gl) + jnp.abs(gr), wy)   # ny_l + ny_r
    ty_ref[:, :, :wy] = box_mean(jnp.abs(gi), wy)                 # ny_i


# ----------------------------------------------------------------------------
# Wrapper
# ----------------------------------------------------------------------------
def _pick_cblk(C, per_channel_bytes, budget_bytes):
    best = 1
    for d in range(1, C + 1):
        if C % d == 0 and d * per_channel_bytes <= budget_bytes:
            best = d
    return best


def ktv_loss(out_l, out_r, input_i, kernel_size=10, eps=1e-6, use_lane_roll=True):
    B, C, H, W = out_l.shape
    k = kernel_size
    if H != W:
        # The PyTorch reference adds the *flattened* x/y norm maps elementwise;
        # their lengths only match for square images.
        raise ValueError("KTVLoss requires square spatial dims (H == W).")
    if H <= k:
        raise ValueError("spatial dims must exceed kernel_size.")

    hx, wx = H - k, W - k + 1        # x-gradient norm-map spatial dims
    hy, wy = H - k + 1, W - k        # y-gradient norm-map spatial dims
    wxp = _round_up(wx, 128)         # lane-dense padded widths
    wyp = _round_up(wy, 128)
    f32 = jnp.float32
    in_bytes = jnp.dtype(out_l.dtype).itemsize   # bf16 inputs also supported

    # --- channel-block size: amortize step/DMA overhead, stay within VMEM ----
    per_ch = (3 * H * W * in_bytes                      # input blocks
              + (2 * hx * wxp + 2 * hy * wyp) * 4) * 2  # output blocks, double-buffered
    per_ch += 8 * H * W * 4                             # live f32 intermediates (est.)
    cblk = _pick_cblk(C, per_ch, budget_bytes=40 << 20)
    n_cgrp = C // cblk

    needed = cblk * per_ch + (1 << 20)
    vmem_limit = int(min(max(needed * 5 // 4, 32 << 20), 100 << 20))

    out_shapes = (
        jax.ShapeDtypeStruct((B, C, hx, wxp), f32),    # A_x = nx_l + nx_r (padded)
        jax.ShapeDtypeStruct((B, C, hx, wxp), f32),    # T_x = nx_i        (padded)
        jax.ShapeDtypeStruct((B, C, hy, wyp), f32),    # A_y = ny_l + ny_r (padded)
        jax.ShapeDtypeStruct((B, C, hy, wyp), f32),    # T_y = ny_i        (padded)
        jax.ShapeDtypeStruct((B, n_cgrp, 1, 2), f32),  # [sum|dx|, sum|dy|] per block
    )

    in_spec = pl.BlockSpec((None, cblk, H, W), lambda b, g: (b, g, 0, 0))
    mx_spec = pl.BlockSpec((None, cblk, hx, wxp), lambda b, g: (b, g, 0, 0))
    my_spec = pl.BlockSpec((None, cblk, hy, wyp), lambda b, g: (b, g, 0, 0))
    s_spec = pl.BlockSpec((None, None, 1, 2), lambda b, g: (b, g, 0, 0))

    kernel = functools.partial(_ktv_kernel, k=k, wx=wx, wy=wy, use_roll=use_lane_roll)

    ax, tx, ay, ty, s = pl.pallas_call(
        kernel,
        out_shape=out_shapes,
        grid_spec=pltpu.PrefetchScalarGridSpec(
            num_scalar_prefetch=0,
            grid=(B, n_cgrp),
            in_specs=[in_spec, in_spec, in_spec],
            out_specs=[mx_spec, mx_spec, my_spec, my_spec, s_spec],
        ),
        compiler_params=pltpu.CompilerParams(
            dimension_semantics=("parallel", "parallel"),
            vmem_limit_bytes=vmem_limit,
        ),
    )(out_l, out_r, input_i)

    # --- tiny epilogue (plain JAX): crop pads, flatten-pair, divide, mean ----
    num = ax[..., :wx].reshape(B, C, -1) + ay[..., :wy].reshape(B, C, -1)
    den = tx[..., :wx].reshape(B, C, -1) + ty[..., :wy].reshape(B, C, -1) + eps
    norm_loss = jnp.mean(num / den)

    gdx = jnp.sum(s[..., 0]) / (B * C * (H - 1) * W)   # nn.L1Loss (mean) over x grads
    gdy = jnp.sum(s[..., 1]) / (B * C * H * (W - 1))   # nn.L1Loss (mean) over y grads
    grad_loss = gdx + gdy

    return norm_loss * 0.0001 + grad_loss


# ----------------------------------------------------------------------------
# Pure-JAX reference (mirrors the PyTorch module) for a correctness check
# ----------------------------------------------------------------------------
def _ref_ktv_loss(out_l, out_r, input_i, kernel_size=10, eps=1e-6):
    k = kernel_size

    def grads(x):
        return x[..., 1:, :] - x[..., :-1, :], x[..., :, 1:] - x[..., :, :-1]

    def norms(x):
        gx, gy = grads(x)
        nx = lax.reduce_window(jnp.abs(gx), 0.0, lax.add,
                               (1, 1, k, k), (1, 1, 1, 1), "VALID") / (k * k)
        ny = lax.reduce_window(jnp.abs(gy), 0.0, lax.add,
                               (1, 1, k, k), (1, 1, 1, 1), "VALID") / (k * k)
        B, C = x.shape[:2]
        return nx.reshape(B, C, -1), ny.reshape(B, C, -1)

    nxl, nyl = norms(out_l)
    nxr, nyr = norms(out_r)
    nxi, nyi = norms(input_i)
    nl, nr = nxl + nyl, nxr + nyr
    nt = nxi + nyi + eps
    norm_loss = jnp.mean(nl / nt + nr / nt)

    glx, gly = grads(out_l)
    grx, gry = grads(out_r)
    gix, giy = grads(input_i)
    gdx = jnp.mean(jnp.abs(glx + grx - gix))
    gdy = jnp.mean(jnp.abs(gly + gry - giy))
    return norm_loss * 0.0001 + gdx + gdy


# ----------------------------------------------------------------------------
if __name__ == "__main__":
    key = jax.random.PRNGKey(0)
    k1, k2, k3 = jax.random.split(key, 3)
    B, C, H, W = 2, 4, 16, 16

    out_l = jax.random.uniform(k1, (B, C, H, W), dtype=jnp.float32)
    out_r = jax.random.uniform(k2, (B, C, H, W), dtype=jnp.float32)
    inp = jax.random.uniform(k3, (B, C, H, W), dtype=jnp.float32)

    try:
        fn = jax.jit(functools.partial(ktv_loss, use_lane_roll=True))
        loss = jax.block_until_ready(fn(out_l, out_r, inp))
    except Exception:
        # Fallback path: slice-based lane window sums (no pltpu.roll), in case
        # the rotate lowering is unavailable for this width on this generation.
        fn = jax.jit(functools.partial(ktv_loss, use_lane_roll=False))
        loss = jax.block_until_ready(fn(out_l, out_r, inp))

    ref = _ref_ktv_loss(out_l, out_r, inp)
    np.testing.assert_allclose(np.asarray(loss), np.asarray(ref),
                               rtol=1e-4, atol=1e-6)
    print("KERNEL_OK")
</pallas_src>

<mosaic_0001>
module attributes {stable_mosaic.version = 11 : i64} {
  func.func @_ktv_kernel(%arg0: i32, %arg1: i32, %arg2: memref<1x4x16x16xf32, #tpu.memory_space<vmem>>, %arg3: memref<1x4x16x16xf32, #tpu.memory_space<vmem>>, %arg4: memref<1x4x16x16xf32, #tpu.memory_space<vmem>>, %arg5: memref<1x4x6x128xf32, #tpu.memory_space<vmem>>, %arg6: memref<1x4x6x128xf32, #tpu.memory_space<vmem>>, %arg7: memref<1x4x7x128xf32, #tpu.memory_space<vmem>>, %arg8: memref<1x4x7x128xf32, #tpu.memory_space<vmem>>, %arg9: memref<1x1x1x2xf32, #tpu.memory_space<vmem>>) attributes {dimension_semantics = [#tpu.dimension_semantics<parallel>, #tpu.dimension_semantics<parallel>], iteration_bounds = array<i64: 2, 1>, scalar_prefetch = 0 : i64, scratch_operands = 0 : i64, tpu.core_type = #tpu.core_type<tc>, window_params = [{transform_indices = @transform_0, window_bounds = array<i64: 1, 4, 16, 16>}, {transform_indices = @transform_1, window_bounds = array<i64: 1, 4, 16, 16>}, {transform_indices = @transform_2, window_bounds = array<i64: 1, 4, 16, 16>}, {transform_indices = @transform_3, window_bounds = array<i64: 1, 4, 6, 128>}, {transform_indices = @transform_4, window_bounds = array<i64: 1, 4, 6, 128>}, {transform_indices = @transform_5, window_bounds = array<i64: 1, 4, 7, 128>}, {transform_indices = @transform_6, window_bounds = array<i64: 1, 4, 7, 128>}, {transform_indices = @transform_7, window_bounds = array<i64: 1, 1, 1, 2>}]} {
    %c0 = arith.constant 0 : index
    %c0_0 = arith.constant 0 : index
    %c0_1 = arith.constant 0 : index
    %c0_2 = arith.constant 0 : index
    %0 = vector.load %arg2[%c0, %c0_0, %c0_1, %c0_2] : memref<1x4x16x16xf32, #tpu.memory_space<vmem>>, vector<1x4x16x16xf32>
    %1 = vector.shape_cast %0 : vector<1x4x16x16xf32> to vector<4x16x16xf32>
    %2 = vector.extract_strided_slice %1 {offsets = [0, 1, 0], sizes = [4, 15, 16], strides = [1, 1, 1]} : vector<4x16x16xf32> to vector<4x15x16xf32>
    %3 = vector.extract_strided_slice %1 {offsets = [0, 0, 0], sizes = [4, 15, 16], strides = [1, 1, 1]} : vector<4x16x16xf32> to vector<4x15x16xf32>
    %4 = arith.subf %2, %3 : vector<4x15x16xf32>
    %c0_3 = arith.constant 0 : index
    %c0_4 = arith.constant 0 : index
    %c0_5 = arith.constant 0 : index
    %c0_6 = arith.constant 0 : index
    %5 = vector.load %arg3[%c0_3, %c0_4, %c0_5, %c0_6] : memref<1x4x16x16xf32, #tpu.memory_space<vmem>>, vector<1x4x16x16xf32>
    %6 = vector.shape_cast %5 : vector<1x4x16x16xf32> to vector<4x16x16xf32>
    %7 = vector.extract_strided_slice %6 {offsets = [0, 1, 0], sizes = [4, 15, 16], strides = [1, 1, 1]} : vector<4x16x16xf32> to vector<4x15x16xf32>
    %8 = vector.extract_strided_slice %6 {offsets = [0, 0, 0], sizes = [4, 15, 16], strides = [1, 1, 1]} : vector<4x16x16xf32> to vector<4x15x16xf32>
    %9 = arith.subf %7, %8 : vector<4x15x16xf32>
    %c0_7 = arith.constant 0 : index
    %c0_8 = arith.constant 0 : index
    %c0_9 = arith.constant 0 : index
    %c0_10 = arith.constant 0 : index
    %10 = vector.load %arg4[%c0_7, %c0_8, %c0_9, %c0_10] : memref<1x4x16x16xf32, #tpu.memory_space<vmem>>, vector<1x4x16x16xf32>
    %11 = vector.shape_cast %10 : vector<1x4x16x16xf32> to vector<4x16x16xf32>
    %12 = vector.extract_strided_slice %11 {offsets = [0, 1, 0], sizes = [4, 15, 16], strides = [1, 1, 1]} : vector<4x16x16xf32> to vector<4x15x16xf32>
    %13 = vector.extract_strided_slice %11 {offsets = [0, 0, 0], sizes = [4, 15, 16], strides = [1, 1, 1]} : vector<4x16x16xf32> to vector<4x15x16xf32>
    %14 = arith.subf %12, %13 : vector<4x15x16xf32>
    %15 = arith.addf %4, %9 : vector<4x15x16xf32>
    %16 = arith.subf %15, %14 : vector<4x15x16xf32>
    %17 = math.absf %16 : vector<4x15x16xf32>
    %cst = arith.constant dense<0.000000e+00> : vector<15x16xf32>
    %18 = vector.multi_reduction <add>, %17, %cst [0] : vector<4x15x16xf32> to vector<15x16xf32>
    %cst_11 = arith.constant dense<0.000000e+00> : vector<15xf32>
    %19 = vector.multi_reduction <add>, %18, %cst_11 [1] : vector<15x16xf32> to vector<15xf32>
    %20 = vector.shape_cast %19 : vector<15xf32> to vector<15x1xf32>
    %cst_12 = arith.constant dense<0.000000e+00> : vector<1xf32>
    %21 = vector.multi_reduction <add>, %20, %cst_12 [0] : vector<15x1xf32> to vector<1xf32>
    %22 = vector.shape_cast %21 : vector<1xf32> to vector<1x1xf32>
    %c0_13 = arith.constant 0 : index
    %c0_14 = arith.constant 0 : index
    %c0_15 = arith.constant 0 : index
    %c0_16 = arith.constant 0 : index
    %23 = vector.load %arg9[%c0_13, %c0_14, %c0_15, %c0_16] : memref<1x1x1x2xf32, #tpu.memory_space<vmem>>, vector<1x1x1x1xf32>
    %24 = vector.shape_cast %23 : vector<1x1x1x1xf32> to vector<1x1xf32>
    %25 = vector.shape_cast %22 : vector<1x1xf32> to vector<1x1x1x1xf32>
    tpu.vector_store %arg9[%c0_13, %c0_14, %c0_15, %c0_16], %25 {strides = array<i32>} : memref<1x1x1x2xf32, #tpu.memory_space<vmem>>, vector<1x1x1x1xf32>,
    %26 = math.absf %4 : vector<4x15x16xf32>
    %27 = math.absf %9 : vector<4x15x16xf32>
    %28 = arith.addf %26, %27 : vector<4x15x16xf32>
    %29 = vector.extract_strided_slice %28 {offsets = [0, 0, 0], sizes = [4, 14, 16], strides = [1, 1, 1]} : vector<4x15x16xf32> to vector<4x14x16xf32>
    %30 = vector.extract_strided_slice %28 {offsets = [0, 1, 0], sizes = [4, 14, 16], strides = [1, 1, 1]} : vector<4x15x16xf32> to vector<4x14x16xf32>
    %31 = arith.addf %29, %30 : vector<4x14x16xf32>
    %32 = vector.extract_strided_slice %31 {offsets = [0, 0, 0], sizes = [4, 12, 16], strides = [1, 1, 1]} : vector<4x14x16xf32> to vector<4x12x16xf32>
    %33 = vector.extract_strided_slice %31 {offsets = [0, 2, 0], sizes = [4, 12, 16], strides = [1, 1, 1]} : vector<4x14x16xf32> to vector<4x12x16xf32>
    %34 = arith.addf %32, %33 : vector<4x12x16xf32>
    %35 = vector.extract_strided_slice %34 {offsets = [0, 0, 0], sizes = [4, 8, 16], strides = [1, 1, 1]} : vector<4x12x16xf32> to vector<4x8x16xf32>
    %36 = vector.extract_strided_slice %34 {offsets = [0, 4, 0], sizes = [4, 8, 16], strides = [1, 1, 1]} : vector<4x12x16xf32> to vector<4x8x16xf32>
    %37 = arith.addf %35, %36 : vector<4x8x16xf32>
    %38 = vector.extract_strided_slice %37 {offsets = [0, 0, 0], sizes = [4, 6, 16], strides = [1, 1, 1]} : vector<4x8x16xf32> to vector<4x6x16xf32>
    %39 = vector.extract_strided_slice %31 {offsets = [0, 8, 0], sizes = [4, 6, 16], strides = [1, 1, 1]} : vector<4x14x16xf32> to vector<4x6x16xf32>
    %40 = arith.addf %38, %39 : vector<4x6x16xf32>
    %c15_i32 = arith.constant 15 : i32
    %41 = tpu.dynamic_rotate %40 by %c15_i32 dim 2 : vector<4x6x16xf32>, i32 -> vector<4x6x16xf32>
    %42 = arith.addf %40, %41 : vector<4x6x16xf32>
    %c14_i32 = arith.constant 14 : i32
    %43 = tpu.dynamic_rotate %42 by %c14_i32 dim 2 : vector<4x6x16xf32>, i32 -> vector<4x6x16xf32>
    %44 = arith.addf %42, %43 : vector<4x6x16xf32>
    %c12_i32 = arith.constant 12 : i32
    %45 = tpu.dynamic_rotate %44 by %c12_i32 dim 2 : vector<4x6x16xf32>, i32 -> vector<4x6x16xf32>
    %46 = arith.addf %44, %45 : vector<4x6x16xf32>
    %c8_i32 = arith.constant 8 : i32
    %47 = tpu.dynamic_rotate %42 by %c8_i32 dim 2 : vector<4x6x16xf32>, i32 -> vector<4x6x16xf32>
    %48 = arith.addf %46, %47 : vector<4x6x16xf32>
    %49 = vector.extract_strided_slice %48 {offsets = [0, 0, 0], sizes = [4, 6, 7], strides = [1, 1, 1]} : vector<4x6x16xf32> to vector<4x6x7xf32>
    %cst_17 = arith.constant 0.00999999977 : f32
    %50 = vector.broadcast %cst_17 : f32 to vector<4x6x7xf32>
    %51 = arith.mulf %49, %50 : vector<4x6x7xf32>
    %c0_18 = arith.constant 0 : index
    %c0_19 = arith.constant 0 : index
    %c0_20 = arith.constant 0 : index
    %c0_21 = arith.constant 0 : index
    %52 = vector.load %arg5[%c0_18, %c0_19, %c0_20, %c0_21] : memref<1x4x6x128xf32, #tpu.memory_space<vmem>>, vector<1x4x6x7xf32>
    %53 = vector.shape_cast %52 : vector<1x4x6x7xf32> to vector<4x6x7xf32>
    %54 = vector.shape_cast %51 : vector<4x6x7xf32> to vector<1x4x6x7xf32>
    tpu.vector_store %arg5[%c0_18, %c0_19, %c0_20, %c0_21], %54 {strides = array<i32>} : memref<1x4x6x128xf32, #tpu.memory_space<vmem>>, vector<1x4x6x7xf32>,
    %55 = math.absf %14 : vector<4x15x16xf32>
    %56 = vector.extract_strided_slice %55 {offsets = [0, 0, 0], sizes = [4, 14, 16], strides = [1, 1, 1]} : vector<4x15x16xf32> to vector<4x14x16xf32>
    %57 = vector.extract_strided_slice %55 {offsets = [0, 1, 0], sizes = [4, 14, 16], strides = [1, 1, 1]} : vector<4x15x16xf32> to vector<4x14x16xf32>
    %58 = arith.addf %56, %57 : vector<4x14x16xf32>
    %59 = vector.extract_strided_slice %58 {offsets = [0, 0, 0], sizes = [4, 12, 16], strides = [1, 1, 1]} : vector<4x14x16xf32> to vector<4x12x16xf32>
    %60 = vector.extract_strided_slice %58 {offsets = [0, 2, 0], sizes = [4, 12, 16], strides = [1, 1, 1]} : vector<4x14x16xf32> to vector<4x12x16xf32>
    %61 = arith.addf %59, %60 : vector<4x12x16xf32>
    %62 = vector.extract_strided_slice %61 {offsets = [0, 0, 0], sizes = [4, 8, 16], strides = [1, 1, 1]} : vector<4x12x16xf32> to vector<4x8x16xf32>
    %63 = vector.extract_strided_slice %61 {offsets = [0, 4, 0], sizes = [4, 8, 16], strides = [1, 1, 1]} : vector<4x12x16xf32> to vector<4x8x16xf32>
    %64 = arith.addf %62, %63 : vector<4x8x16xf32>
    %65 = vector.extract_strided_slice %64 {offsets = [0, 0, 0], sizes = [4, 6, 16], strides = [1, 1, 1]} : vector<4x8x16xf32> to vector<4x6x16xf32>
    %66 = vector.extract_strided_slice %58 {offsets = [0, 8, 0], sizes = [4, 6, 16], strides = [1, 1, 1]} : vector<4x14x16xf32> to vector<4x6x16xf32>
    %67 = arith.addf %65, %66 : vector<4x6x16xf32>
    %c15_i32_22 = arith.constant 15 : i32
    %68 = tpu.dynamic_rotate %67 by %c15_i32_22 dim 2 : vector<4x6x16xf32>, i32 -> vector<4x6x16xf32>
    %69 = arith.addf %67, %68 : vector<4x6x16xf32>
    %c14_i32_23 = arith.constant 14 : i32
    %70 = tpu.dynamic_rotate %69 by %c14_i32_23 dim 2 : vector<4x6x16xf32>, i32 -> vector<4x6x16xf32>
    %71 = arith.addf %69, %70 : vector<4x6x16xf32>
    %c12_i32_24 = arith.constant 12 : i32
    %72 = tpu.dynamic_rotate %71 by %c12_i32_24 dim 2 : vector<4x6x16xf32>, i32 -> vector<4x6x16xf32>
    %73 = arith.addf %71, %72 : vector<4x6x16xf32>
    %c8_i32_25 = arith.constant 8 : i32
    %74 = tpu.dynamic_rotate %69 by %c8_i32_25 dim 2 : vector<4x6x16xf32>, i32 -> vector<4x6x16xf32>
    %75 = arith.addf %73, %74 : vector<4x6x16xf32>
    %76 = vector.extract_strided_slice %75 {offsets = [0, 0, 0], sizes = [4, 6, 7], strides = [1, 1, 1]} : vector<4x6x16xf32> to vector<4x6x7xf32>
    %cst_26 = arith.constant 0.00999999977 : f32
    %77 = vector.broadcast %cst_26 : f32 to vector<4x6x7xf32>
    %78 = arith.mulf %76, %77 : vector<4x6x7xf32>
    %c0_27 = arith.constant 0 : index
    %c0_28 = arith.constant 0 : index
    %c0_29 = arith.constant 0 : index
    %c0_30 = arith.constant 0 : index
    %79 = vector.load %arg6[%c0_27, %c0_28, %c0_29, %c0_30] : memref<1x4x6x128xf32, #tpu.memory_space<vmem>>, vector<1x4x6x7xf32>
    %80 = vector.shape_cast %79 : vector<1x4x6x7xf32> to vector<4x6x7xf32>
    %81 = vector.shape_cast %78 : vector<4x6x7xf32> to vector<1x4x6x7xf32>
    tpu.vector_store %arg6[%c0_27, %c0_28, %c0_29, %c0_30], %81 {strides = array<i32>} : memref<1x4x6x128xf32, #tpu.memory_space<vmem>>, vector<1x4x6x7xf32>,
    %c0_31 = arith.constant 0 : index
    %c0_32 = arith.constant 0 : index
    %c0_33 = arith.constant 0 : index
    %c0_34 = arith.constant 0 : index
    %82 = vector.load %arg2[%c0_31, %c0_32, %c0_33, %c0_34] : memref<1x4x16x16xf32, #tpu.memory_space<vmem>>, vector<1x4x16x16xf32>
    %83 = vector.shape_cast %82 : vector<1x4x16x16xf32> to vector<4x16x16xf32>
    %c15_i32_35 = arith.constant 15 : i32
    %84 = tpu.dynamic_rotate %83 by %c15_i32_35 dim 2 : vector<4x16x16xf32>, i32 -> vector<4x16x16xf32>
    %85 = arith.subf %84, %83 : vector<4x16x16xf32>
    %c0_36 = arith.constant 0 : index
    %c0_37 = arith.constant 0 : index
    %c0_38 = arith.constant 0 : index
    %c0_39 = arith.constant 0 : index
    %86 = vector.load %arg3[%c0_36, %c0_37, %c0_38, %c0_39] : memref<1x4x16x16xf32, #tpu.memory_space<vmem>>, vector<1x4x16x16xf32>
    %87 = vector.shape_cast %86 : vector<1x4x16x16xf32> to vector<4x16x16xf32>
    %c15_i32_40 = arith.constant 15 : i32
    %88 = tpu.dynamic_rotate %87 by %c15_i32_40 dim 2 : vector<4x16x16xf32>, i32 -> vector<4x16x16xf32>
    %89 = arith.subf %88, %87 : vector<4x16x16xf32>
    %c0_41 = arith.constant 0 : index
    %c0_42 = arith.constant 0 : index
    %c0_43 = arith.constant 0 : index
    %c0_44 = arith.constant 0 : index
    %90 = vector.load %arg4[%c0_41, %c0_42, %c0_43, %c0_44] : memref<1x4x16x16xf32, #tpu.memory_space<vmem>>, vector<1x4x16x16xf32>
    %91 = vector.shape_cast %90 : vector<1x4x16x16xf32> to vector<4x16x16xf32>
    %c15_i32_45 = arith.constant 15 : i32
    %92 = tpu.dynamic_rotate %91 by %c15_i32_45 dim 2 : vector<4x16x16xf32>, i32 -> vector<4x16x16xf32>
    %93 = arith.subf %92, %91 : vector<4x16x16xf32>
    %94 = arith.addf %85, %89 : vector<4x16x16xf32>
    %95 = arith.subf %94, %93 : vector<4x16x16xf32>
    %96 = math.absf %95 : vector<4x16x16xf32>
    %97 = tpu.iota {dimensions = array<i32: 2>} : vector<4x16x16xi32>
    %c15_i32_46 = arith.constant 15 : i32
    %98 = vector.broadcast %c15_i32_46 : i32 to vector<4x16x16xi32>
    %99 = arith.cmpi slt, %97, %98 : vector<4x16x16xi32>
    %cst_47 = arith.constant 0.000000e+00 : f32
    %100 = vector.broadcast %cst_47 : f32 to vector<4x16x16xf32>
    %101 = arith.select %99, %96, %100 : vector<4x16x16xi1>, vector<4x16x16xf32>
    %cst_48 = arith.constant dense<0.000000e+00> : vector<16x16xf32>
    %102 = vector.multi_reduction <add>, %101, %cst_48 [0] : vector<4x16x16xf32> to vector<16x16xf32>
    %cst_49 = arith.constant dense<0.000000e+00> : vector<16xf32>
    %103 = vector.multi_reduction <add>, %102, %cst_49 [1] : vector<16x16xf32> to vector<16xf32>
    %104 = vector.shape_cast %103 : vector<16xf32> to vector<16x1xf32>
    %cst_50 = arith.constant dense<0.000000e+00> : vector<1xf32>
    %105 = vector.multi_reduction <add>, %104, %cst_50 [0] : vector<16x1xf32> to vector<1xf32>
    %106 = vector.shape_cast %105 : vector<1xf32> to vector<1x1xf32>
    %c0_51 = arith.constant 0 : index
    %c0_52 = arith.constant 0 : index
    %c0_53 = arith.constant 0 : index
    %c1 = arith.constant 1 : index
    %107 = vector.load %arg9[%c0_51, %c0_52, %c0_53, %c1] : memref<1x1x1x2xf32, #tpu.memory_space<vmem>>, vector<1x1x1x1xf32>
    %108 = vector.shape_cast %107 : vector<1x1x1x1xf32> to vector<1x1xf32>
    %109 = vector.shape_cast %106 : vector<1x1xf32> to vector<1x1x1x1xf32>
    tpu.vector_store %arg9[%c0_51, %c0_52, %c0_53, %c1], %109 {strides = array<i32>} : memref<1x1x1x2xf32, #tpu.memory_space<vmem>>, vector<1x1x1x1xf32>,
    %110 = math.absf %85 : vector<4x16x16xf32>
    %111 = math.absf %89 : vector<4x16x16xf32>
    %112 = arith.addf %110, %111 : vector<4x16x16xf32>
    %113 = vector.extract_strided_slice %112 {offsets = [0, 0, 0], sizes = [4, 15, 16], strides = [1, 1, 1]} : vector<4x16x16xf32> to vector<4x15x16xf32>
    %114 = vector.extract_strided_slice %112 {offsets = [0, 1, 0], sizes = [4, 15, 16], strides = [1, 1, 1]} : vector<4x16x16xf32> to vector<4x15x16xf32>
    %115 = arith.addf %113, %114 : vector<4x15x16xf32>
    %116 = vector.extract_strided_slice %115 {offsets = [0, 0, 0], sizes = [4, 13, 16], strides = [1, 1, 1]} : vector<4x15x16xf32> to vector<4x13x16xf32>
    %117 = vector.extract_strided_slice %115 {offsets = [0, 2, 0], sizes = [4, 13, 16], strides = [1, 1, 1]} : vector<4x15x16xf32> to vector<4x13x16xf32>
    %118 = arith.addf %116, %117 : vector<4x13x16xf32>
    %119 = vector.extract_strided_slice %118 {offsets = [0, 0, 0], sizes = [4, 9, 16], strides = [1, 1, 1]} : vector<4x13x16xf32> to vector<4x9x16xf32>
    %120 = vector.extract_strided_slice %118 {offsets = [0, 4, 0], sizes = [4, 9, 16], strides = [1, 1, 1]} : vector<4x13x16xf32> to vector<4x9x16xf32>
    %121 = arith.addf %119, %120 : vector<4x9x16xf32>
    %122 = vector.extract_strided_slice %121 {offsets = [0, 0, 0], sizes = [4, 7, 16], strides = [1, 1, 1]} : vector<4x9x16xf32> to vector<4x7x16xf32>
    %123 = vector.extract_strided_slice %115 {offsets = [0, 8, 0], sizes = [4, 7, 16], strides = [1, 1, 1]} : vector<4x15x16xf32> to vector<4x7x16xf32>
    %124 = arith.addf %122, %123 : vector<4x7x16xf32>
    %c15_i32_54 = arith.constant 15 : i32
    %125 = tpu.dynamic_rotate %124 by %c15_i32_54 dim 2 : vector<4x7x16xf32>, i32 -> vector<4x7x16xf32>
    %126 = arith.addf %124, %125 : vector<4x7x16xf32>
    %c14_i32_55 = arith.constant 14 : i32
    %127 = tpu.dynamic_rotate %126 by %c14_i32_55 dim 2 : vector<4x7x16xf32>, i32 -> vector<4x7x16xf32>
    %128 = arith.addf %126, %127 : vector<4x7x16xf32>
    %c12_i32_56 = arith.constant 12 : i32
    %129 = tpu.dynamic_rotate %128 by %c12_i32_56 dim 2 : vector<4x7x16xf32>, i32 -> vector<4x7x16xf32>
    %130 = arith.addf %128, %129 : vector<4x7x16xf32>
    %c8_i32_57 = arith.constant 8 : i32
    %131 = tpu.dynamic_rotate %126 by %c8_i32_57 dim 2 : vector<4x7x16xf32>, i32 -> vector<4x7x16xf32>
    %132 = arith.addf %130, %131 : vector<4x7x16xf32>
    %133 = vector.extract_strided_slice %132 {offsets = [0, 0, 0], sizes = [4, 7, 6], strides = [1, 1, 1]} : vector<4x7x16xf32> to vector<4x7x6xf32>
    %cst_58 = arith.constant 0.00999999977 : f32
    %134 = vector.broadcast %cst_58 : f32 to vector<4x7x6xf32>
    %135 = arith.mulf %133, %134 : vector<4x7x6xf32>
    %c0_59 = arith.constant 0 : index
    %c0_60 = arith.constant 0 : index
    %c0_61 = arith.constant 0 : index
    %c0_62 = arith.constant 0 : index
    %136 = vector.load %arg7[%c0_59, %c0_60, %c0_61, %c0_62] : memref<1x4x7x128xf32, #tpu.memory_space<vmem>>, vector<1x4x7x6xf32>
    %137 = vector.shape_cast %136 : vector<1x4x7x6xf32> to vector<4x7x6xf32>
    %138 = vector.shape_cast %135 : vector<4x7x6xf32> to vector<1x4x7x6xf32>
    tpu.vector_store %arg7[%c0_59, %c0_60, %c0_61, %c0_62], %138 {strides = array<i32>} : memref<1x4x7x128xf32, #tpu.memory_space<vmem>>, vector<1x4x7x6xf32>,
    %139 = math.absf %93 : vector<4x16x16xf32>
    %140 = vector.extract_strided_slice %139 {offsets = [0, 0, 0], sizes = [4, 15, 16], strides = [1, 1, 1]} : vector<4x16x16xf32> to vector<4x15x16xf32>
    %141 = vector.extract_strided_slice %139 {offsets = [0, 1, 0], sizes = [4, 15, 16], strides = [1, 1, 1]} : vector<4x16x16xf32> to vector<4x15x16xf32>
    %142 = arith.addf %140, %141 : vector<4x15x16xf32>
    %143 = vector.extract_strided_slice %142 {offsets = [0, 0, 0], sizes = [4, 13, 16], strides = [1, 1, 1]} : vector<4x15x16xf32> to vector<4x13x16xf32>
    %144 = vector.extract_strided_slice %142 {offsets = [0, 2, 0], sizes = [4, 13, 16], strides = [1, 1, 1]} : vector<4x15x16xf32> to vector<4x13x16xf32>
    %145 = arith.addf %143, %144 : vector<4x13x16xf32>
    %146 = vector.extract_strided_slice %145 {offsets = [0, 0, 0], sizes = [4, 9, 16], strides = [1, 1, 1]} : vector<4x13x16xf32> to vector<4x9x16xf32>
    %147 = vector.extract_strided_slice %145 {offsets = [0, 4, 0], sizes = [4, 9, 16], strides = [1, 1, 1]} : vector<4x13x16xf32> to vector<4x9x16xf32>
    %148 = arith.addf %146, %147 : vector<4x9x16xf32>
    %149 = vector.extract_strided_slice %148 {offsets = [0, 0, 0], sizes = [4, 7, 16], strides = [1, 1, 1]} : vector<4x9x16xf32> to vector<4x7x16xf32>
    %150 = vector.extract_strided_slice %142 {offsets = [0, 8, 0], sizes = [4, 7, 16], strides = [1, 1, 1]} : vector<4x15x16xf32> to vector<4x7x16xf32>
    %151 = arith.addf %149, %150 : vector<4x7x16xf32>
    %c15_i32_63 = arith.constant 15 : i32
    %152 = tpu.dynamic_rotate %151 by %c15_i32_63 dim 2 : vector<4x7x16xf32>, i32 -> vector<4x7x16xf32>
    %153 = arith.addf %151, %152 : vector<4x7x16xf32>
    %c14_i32_64 = arith.constant 14 : i32
    %154 = tpu.dynamic_rotate %153 by %c14_i32_64 dim 2 : vector<4x7x16xf32>, i32 -> vector<4x7x16xf32>
    %155 = arith.addf %153, %154 : vector<4x7x16xf32>
    %c12_i32_65 = arith.constant 12 : i32
    %156 = tpu.dynamic_rotate %155 by %c12_i32_65 dim 2 : vector<4x7x16xf32>, i32 -> vector<4x7x16xf32>
    %157 = arith.addf %155, %156 : vector<4x7x16xf32>
    %c8_i32_66 = arith.constant 8 : i32
    %158 = tpu.dynamic_rotate %153 by %c8_i32_66 dim 2 : vector<4x7x16xf32>, i32 -> vector<4x7x16xf32>
    %159 = arith.addf %157, %158 : vector<4x7x16xf32>
    %160 = vector.extract_strided_slice %159 {offsets = [0, 0, 0], sizes = [4, 7, 6], strides = [1, 1, 1]} : vector<4x7x16xf32> to vector<4x7x6xf32>
    %cst_67 = arith.constant 0.00999999977 : f32
    %161 = vector.broadcast %cst_67 : f32 to vector<4x7x6xf32>
    %162 = arith.mulf %160, %161 : vector<4x7x6xf32>
    %c0_68 = arith.constant 0 : index
    %c0_69 = arith.constant 0 : index
    %c0_70 = arith.constant 0 : index
    %c0_71 = arith.constant 0 : index
    %163 = vector.load %arg8[%c0_68, %c0_69, %c0_70, %c0_71] : memref<1x4x7x128xf32, #tpu.memory_space<vmem>>, vector<1x4x7x6xf32>
    %164 = vector.shape_cast %163 : vector<1x4x7x6xf32> to vector<4x7x6xf32>
    %165 = vector.shape_cast %162 : vector<4x7x6xf32> to vector<1x4x7x6xf32>
    tpu.vector_store %arg8[%c0_68, %c0_69, %c0_70, %c0_71], %165 {strides = array<i32>} : memref<1x4x7x128xf32, #tpu.memory_space<vmem>>, vector<1x4x7x6xf32>,
    return
  }
  func.func @transform_0(%arg0: i32, %arg1: i32) -> (i32, i32, i32, i32) {
    %c0_i32 = arith.constant 0 : i32
    %c0_i32_0 = arith.constant 0 : i32
    %c0_i32_1 = arith.constant 0 : i32
    return %arg0, %arg1, %c0_i32, %c0_i32_0 : i32, i32, i32, i32
  }
  func.func @transform_1(%arg0: i32, %arg1: i32) -> (i32, i32, i32, i32) {
    %c0_i32 = arith.constant 0 : i32
    %c0_i32_0 = arith.constant 0 : i32
    %c0_i32_1 = arith.constant 0 : i32
    return %arg0, %arg1, %c0_i32, %c0_i32_0 : i32, i32, i32, i32
  }
  func.func @transform_2(%arg0: i32, %arg1: i32) -> (i32, i32, i32, i32) {
    %c0_i32 = arith.constant 0 : i32
    %c0_i32_0 = arith.constant 0 : i32
    %c0_i32_1 = arith.constant 0 : i32
    return %arg0, %arg1, %c0_i32, %c0_i32_0 : i32, i32, i32, i32
  }
  func.func @transform_3(%arg0: i32, %arg1: i32) -> (i32, i32, i32, i32) {
    %c0_i32 = arith.constant 0 : i32
    %c0_i32_0 = arith.constant 0 : i32
    %c0_i32_1 = arith.constant 0 : i32
    return %arg0, %arg1, %c0_i32, %c0_i32_0 : i32, i32, i32, i32
  }
  func.func @transform_4(%arg0: i32, %arg1: i32) -> (i32, i32, i32, i32) {
    %c0_i32 = arith.constant 0 : i32
    %c0_i32_0 = arith.constant 0 : i32
    %c0_i32_1 = arith.constant 0 : i32
    return %arg0, %arg1, %c0_i32, %c0_i32_0 : i32, i32, i32, i32
  }
  func.func @transform_5(%arg0: i32, %arg1: i32) -> (i32, i32, i32, i32) {
    %c0_i32 = arith.constant 0 : i32
    %c0_i32_0 = arith.constant 0 : i32
    %c0_i32_1 = arith.constant 0 : i32
    return %arg0, %arg1, %c0_i32, %c0_i32_0 : i32, i32, i32, i32
  }
  func.func @transform_6(%arg0: i32, %arg1: i32) -> (i32, i32, i32, i32) {
    %c0_i32 = arith.constant 0 : i32
    %c0_i32_0 = arith.constant 0 : i32
    %c0_i32_1 = arith.constant 0 : i32
    return %arg0, %arg1, %c0_i32, %c0_i32_0 : i32, i32, i32, i32
  }
  func.func @transform_7(%arg0: i32, %arg1: i32) -> (i32, i32, i32, i32) {
    %c0_i32 = arith.constant 0 : i32
    %c0_i32_0 = arith.constant 0 : i32
    %c0_i32_1 = arith.constant 0 : i32
    return %arg0, %arg1, %c0_i32, %c0_i32_0 : i32, i32, i32, i32
  }
}

module attributes {stable_mosaic.version = 11 : i64} {
  func.func @_ktv_kernel(%arg0: i32, %arg1: i32, %arg2: memref<1x4x16x16xf32, #tpu.memory_space<vmem>>, %arg3: memref<1x4x16x16xf32, #tpu.memory_space<vmem>>, %arg4: memref<1x4x16x16xf32, #tpu.memory_space<vmem>>, %arg5: memref<1x4x6x128xf32, #tpu.memory_space<vmem>>, %arg6: memref<1x4x6x128xf32, #tpu.memory_space<vmem>>, %arg7: memref<1x4x7x128xf32, #tpu.memory_space<vmem>>, %arg8: memref<1x4x7x128xf32, #tpu.memory_space<vmem>>, %arg9: memref<1x1x1x2xf32, #tpu.memory_space<vmem>>) attributes {dimension_semantics = [#tpu.dimension_semantics<parallel>, #tpu.dimension_semantics<parallel>], iteration_bounds = array<i64: 2, 1>, scalar_prefetch = 0 : i64, scratch_operands = 0 : i64, tpu.core_type = #tpu.core_type<tc>, window_params = [{transform_indices = @transform_0, window_bounds = array<i64: 1, 4, 16, 16>}, {transform_indices = @transform_1, window_bounds = array<i64: 1, 4, 16, 16>}, {transform_indices = @transform_2, window_bounds = array<i64: 1, 4, 16, 16>}, {transform_indices = @transform_3, window_bounds = array<i64: 1, 4, 6, 128>}, {transform_indices = @transform_4, window_bounds = array<i64: 1, 4, 6, 128>}, {transform_indices = @transform_5, window_bounds = array<i64: 1, 4, 7, 128>}, {transform_indices = @transform_6, window_bounds = array<i64: 1, 4, 7, 128>}, {transform_indices = @transform_7, window_bounds = array<i64: 1, 1, 1, 2>}]} {
    %c0 = arith.constant 0 : index
    %c0_0 = arith.constant 0 : index
    %c0_1 = arith.constant 0 : index
    %c0_2 = arith.constant 0 : index
    %0 = vector.load %arg2[%c0, %c0_0, %c0_1, %c0_2] : memref<1x4x16x16xf32, #tpu.memory_space<vmem>>, vector<1x4x16x16xf32>
    %1 = vector.shape_cast %0 : vector<1x4x16x16xf32> to vector<4x16x16xf32>
    %2 = vector.extract_strided_slice %1 {offsets = [0, 1, 0], sizes = [4, 15, 16], strides = [1, 1, 1]} : vector<4x16x16xf32> to vector<4x15x16xf32>
    %3 = vector.extract_strided_slice %1 {offsets = [0, 0, 0], sizes = [4, 15, 16], strides = [1, 1, 1]} : vector<4x16x16xf32> to vector<4x15x16xf32>
    %4 = arith.subf %2, %3 : vector<4x15x16xf32>
    %c0_3 = arith.constant 0 : index
    %c0_4 = arith.constant 0 : index
    %c0_5 = arith.constant 0 : index
    %c0_6 = arith.constant 0 : index
    %5 = vector.load %arg3[%c0_3, %c0_4, %c0_5, %c0_6] : memref<1x4x16x16xf32, #tpu.memory_space<vmem>>, vector<1x4x16x16xf32>
    %6 = vector.shape_cast %5 : vector<1x4x16x16xf32> to vector<4x16x16xf32>
    %7 = vector.extract_strided_slice %6 {offsets = [0, 1, 0], sizes = [4, 15, 16], strides = [1, 1, 1]} : vector<4x16x16xf32> to vector<4x15x16xf32>
    %8 = vector.extract_strided_slice %6 {offsets = [0, 0, 0], sizes = [4, 15, 16], strides = [1, 1, 1]} : vector<4x16x16xf32> to vector<4x15x16xf32>
    %9 = arith.subf %7, %8 : vector<4x15x16xf32>
    %c0_7 = arith.constant 0 : index
    %c0_8 = arith.constant 0 : index
    %c0_9 = arith.constant 0 : index
    %c0_10 = arith.constant 0 : index
    %10 = vector.load %arg4[%c0_7, %c0_8, %c0_9, %c0_10] : memref<1x4x16x16xf32, #tpu.memory_space<vmem>>, vector<1x4x16x16xf32>
    %11 = vector.shape_cast %10 : vector<1x4x16x16xf32> to vector<4x16x16xf32>
    %12 = vector.extract_strided_slice %11 {offsets = [0, 1, 0], sizes = [4, 15, 16], strides = [1, 1, 1]} : vector<4x16x16xf32> to vector<4x15x16xf32>
    %13 = vector.extract_strided_slice %11 {offsets = [0, 0, 0], sizes = [4, 15, 16], strides = [1, 1, 1]} : vector<4x16x16xf32> to vector<4x15x16xf32>
    %14 = arith.subf %12, %13 : vector<4x15x16xf32>
    %15 = arith.addf %4, %9 : vector<4x15x16xf32>
    %16 = arith.subf %15, %14 : vector<4x15x16xf32>
    %17 = math.absf %16 : vector<4x15x16xf32>
    %cst = arith.constant dense<0.000000e+00> : vector<15x16xf32>
    %18 = vector.multi_reduction <add>, %17, %cst [0] : vector<4x15x16xf32> to vector<15x16xf32>
    %cst_11 = arith.constant dense<0.000000e+00> : vector<15xf32>
    %19 = vector.multi_reduction <add>, %18, %cst_11 [1] : vector<15x16xf32> to vector<15xf32>
    %20 = vector.shape_cast %19 : vector<15xf32> to vector<15x1xf32>
    %cst_12 = arith.constant dense<0.000000e+00> : vector<1xf32>
    %21 = vector.multi_reduction <add>, %20, %cst_12 [0] : vector<15x1xf32> to vector<1xf32>
    %22 = vector.shape_cast %21 : vector<1xf32> to vector<1x1xf32>
    %c0_13 = arith.constant 0 : index
    %c0_14 = arith.constant 0 : index
    %c0_15 = arith.constant 0 : index
    %c0_16 = arith.constant 0 : index
    %23 = vector.load %arg9[%c0_13, %c0_14, %c0_15, %c0_16] : memref<1x1x1x2xf32, #tpu.memory_space<vmem>>, vector<1x1x1x1xf32>
    %24 = vector.shape_cast %23 : vector<1x1x1x1xf32> to vector<1x1xf32>
    %25 = vector.shape_cast %22 : vector<1x1xf32> to vector<1x1x1x1xf32>
    tpu.vector_store %arg9[%c0_13, %c0_14, %c0_15, %c0_16], %25 {strides = array<i32>} : memref<1x1x1x2xf32, #tpu.memory_space<vmem>>, vector<1x1x1x1xf32>,
    %26 = math.absf %4 : vector<4x15x16xf32>
    %27 = math.absf %9 : vector<4x15x16xf32>
    %28 = arith.addf %26, %27 : vector<4x15x16xf32>
    %29 = vector.extract_strided_slice %28 {offsets = [0, 0, 0], sizes = [4, 14, 16], strides = [1, 1, 1]} : vector<4x15x16xf32> to vector<4x14x16xf32>
    %30 = vector.extract_strided_slice %28 {offsets = [0, 1, 0], sizes = [4, 14, 16], strides = [1, 1, 1]} : vector<4x15x16xf32> to vector<4x14x16xf32>
    %31 = arith.addf %29, %30 : vector<4x14x16xf32>
    %32 = vector.extract_strided_slice %31 {offsets = [0, 0, 0], sizes = [4, 12, 16], strides = [1, 1, 1]} : vector<4x14x16xf32> to vector<4x12x16xf32>
    %33 = vector.extract_strided_slice %31 {offsets = [0, 2, 0], sizes = [4, 12, 16], strides = [1, 1, 1]} : vector<4x14x16xf32> to vector<4x12x16xf32>
    %34 = arith.addf %32, %33 : vector<4x12x16xf32>
    %35 = vector.extract_strided_slice %34 {offsets = [0, 0, 0], sizes = [4, 8, 16], strides = [1, 1, 1]} : vector<4x12x16xf32> to vector<4x8x16xf32>
    %36 = vector.extract_strided_slice %34 {offsets = [0, 4, 0], sizes = [4, 8, 16], strides = [1, 1, 1]} : vector<4x12x16xf32> to vector<4x8x16xf32>
    %37 = arith.addf %35, %36 : vector<4x8x16xf32>
    %38 = vector.extract_strided_slice %37 {offsets = [0, 0, 0], sizes = [4, 6, 16], strides = [1, 1, 1]} : vector<4x8x16xf32> to vector<4x6x16xf32>
    %39 = vector.extract_strided_slice %31 {offsets = [0, 8, 0], sizes = [4, 6, 16], strides = [1, 1, 1]} : vector<4x14x16xf32> to vector<4x6x16xf32>
    %40 = arith.addf %38, %39 : vector<4x6x16xf32>
    %41 = vector.extract_strided_slice %40 {offsets = [0, 0, 0], sizes = [4, 6, 15], strides = [1, 1, 1]} : vector<4x6x16xf32> to vector<4x6x15xf32>
    %42 = vector.extract_strided_slice %40 {offsets = [0, 0, 1], sizes = [4, 6, 15], strides = [1, 1, 1]} : vector<4x6x16xf32> to vector<4x6x15xf32>
    %43 = arith.addf %41, %42 : vector<4x6x15xf32>
    %44 = vector.extract_strided_slice %43 {offsets = [0, 0, 0], sizes = [4, 6, 13], strides = [1, 1, 1]} : vector<4x6x15xf32> to vector<4x6x13xf32>
    %45 = vector.extract_strided_slice %43 {offsets = [0, 0, 2], sizes = [4, 6, 13], strides = [1, 1, 1]} : vector<4x6x15xf32> to vector<4x6x13xf32>
    %46 = arith.addf %44, %45 : vector<4x6x13xf32>
    %47 = vector.extract_strided_slice %46 {offsets = [0, 0, 0], sizes = [4, 6, 9], strides = [1, 1, 1]} : vector<4x6x13xf32> to vector<4x6x9xf32>
    %48 = vector.extract_strided_slice %46 {offsets = [0, 0, 4], sizes = [4, 6, 9], strides = [1, 1, 1]} : vector<4x6x13xf32> to vector<4x6x9xf32>
    %49 = arith.addf %47, %48 : vector<4x6x9xf32>
    %50 = vector.extract_strided_slice %49 {offsets = [0, 0, 0], sizes = [4, 6, 7], strides = [1, 1, 1]} : vector<4x6x9xf32> to vector<4x6x7xf32>
    %51 = vector.extract_strided_slice %43 {offsets = [0, 0, 8], sizes = [4, 6, 7], strides = [1, 1, 1]} : vector<4x6x15xf32> to vector<4x6x7xf32>
    %52 = arith.addf %50, %51 : vector<4x6x7xf32>
    %cst_17 = arith.constant 0.00999999977 : f32
    %53 = vector.broadcast %cst_17 : f32 to vector<4x6x7xf32>
    %54 = arith.mulf %52, %53 : vector<4x6x7xf32>
    %c0_18 = arith.constant 0 : index
    %c0_19 = arith.constant 0 : index
    %c0_20 = arith.constant 0 : index
    %c0_21 = arith.constant 0 : index
    %55 = vector.load %arg5[%c0_18, %c0_19, %c0_20, %c0_21] : memref<1x4x6x128xf32, #tpu.memory_space<vmem>>, vector<1x4x6x7xf32>
    %56 = vector.shape_cast %55 : vector<1x4x6x7xf32> to vector<4x6x7xf32>
    %57 = vector.shape_cast %54 : vector<4x6x7xf32> to vector<1x4x6x7xf32>
    tpu.vector_store %arg5[%c0_18, %c0_19, %c0_20, %c0_21], %57 {strides = array<i32>} : memref<1x4x6x128xf32, #tpu.memory_space<vmem>>, vector<1x4x6x7xf32>,
    %58 = math.absf %14 : vector<4x15x16xf32>
    %59 = vector.extract_strided_slice %58 {offsets = [0, 0, 0], sizes = [4, 14, 16], strides = [1, 1, 1]} : vector<4x15x16xf32> to vector<4x14x16xf32>
    %60 = vector.extract_strided_slice %58 {offsets = [0, 1, 0], sizes = [4, 14, 16], strides = [1, 1, 1]} : vector<4x15x16xf32> to vector<4x14x16xf32>
    %61 = arith.addf %59, %60 : vector<4x14x16xf32>
    %62 = vector.extract_strided_slice %61 {offsets = [0, 0, 0], sizes = [4, 12, 16], strides = [1, 1, 1]} : vector<4x14x16xf32> to vector<4x12x16xf32>
    %63 = vector.extract_strided_slice %61 {offsets = [0, 2, 0], sizes = [4, 12, 16], strides = [1, 1, 1]} : vector<4x14x16xf32> to vector<4x12x16xf32>
    %64 = arith.addf %62, %63 : vector<4x12x16xf32>
    %65 = vector.extract_strided_slice %64 {offsets = [0, 0, 0], sizes = [4, 8, 16], strides = [1, 1, 1]} : vector<4x12x16xf32> to vector<4x8x16xf32>
    %66 = vector.extract_strided_slice %64 {offsets = [0, 4, 0], sizes = [4, 8, 16], strides = [1, 1, 1]} : vector<4x12x16xf32> to vector<4x8x16xf32>
    %67 = arith.addf %65, %66 : vector<4x8x16xf32>
    %68 = vector.extract_strided_slice %67 {offsets = [0, 0, 0], sizes = [4, 6, 16], strides = [1, 1, 1]} : vector<4x8x16xf32> to vector<4x6x16xf32>
    %69 = vector.extract_strided_slice %61 {offsets = [0, 8, 0], sizes = [4, 6, 16], strides = [1, 1, 1]} : vector<4x14x16xf32> to vector<4x6x16xf32>
    %70 = arith.addf %68, %69 : vector<4x6x16xf32>
    %71 = vector.extract_strided_slice %70 {offsets = [0, 0, 0], sizes = [4, 6, 15], strides = [1, 1, 1]} : vector<4x6x16xf32> to vector<4x6x15xf32>
    %72 = vector.extract_strided_slice %70 {offsets = [0, 0, 1], sizes = [4, 6, 15], strides = [1, 1, 1]} : vector<4x6x16xf32> to vector<4x6x15xf32>
    %73 = arith.addf %71, %72 : vector<4x6x15xf32>
    %74 = vector.extract_strided_slice %73 {offsets = [0, 0, 0], sizes = [4, 6, 13], strides = [1, 1, 1]} : vector<4x6x15xf32> to vector<4x6x13xf32>
    %75 = vector.extract_strided_slice %73 {offsets = [0, 0, 2], sizes = [4, 6, 13], strides = [1, 1, 1]} : vector<4x6x15xf32> to vector<4x6x13xf32>
    %76 = arith.addf %74, %75 : vector<4x6x13xf32>
    %77 = vector.extract_strided_slice %76 {offsets = [0, 0, 0], sizes = [4, 6, 9], strides = [1, 1, 1]} : vector<4x6x13xf32> to vector<4x6x9xf32>
    %78 = vector.extract_strided_slice %76 {offsets = [0, 0, 4], sizes = [4, 6, 9], strides = [1, 1, 1]} : vector<4x6x13xf32> to vector<4x6x9xf32>
    %79 = arith.addf %77, %78 : vector<4x6x9xf32>
    %80 = vector.extract_strided_slice %79 {offsets = [0, 0, 0], sizes = [4, 6, 7], strides = [1, 1, 1]} : vector<4x6x9xf32> to vector<4x6x7xf32>
    %81 = vector.extract_strided_slice %73 {offsets = [0, 0, 8], sizes = [4, 6, 7], strides = [1, 1, 1]} : vector<4x6x15xf32> to vector<4x6x7xf32>
    %82 = arith.addf %80, %81 : vector<4x6x7xf32>
    %cst_22 = arith.constant 0.00999999977 : f32
    %83 = vector.broadcast %cst_22 : f32 to vector<4x6x7xf32>
    %84 = arith.mulf %82, %83 : vector<4x6x7xf32>
    %c0_23 = arith.constant 0 : index
    %c0_24 = arith.constant 0 : index
    %c0_25 = arith.constant 0 : index
    %c0_26 = arith.constant 0 : index
    %85 = vector.load %arg6[%c0_23, %c0_24, %c0_25, %c0_26] : memref<1x4x6x128xf32, #tpu.memory_space<vmem>>, vector<1x4x6x7xf32>
    %86 = vector.shape_cast %85 : vector<1x4x6x7xf32> to vector<4x6x7xf32>
    %87 = vector.shape_cast %84 : vector<4x6x7xf32> to vector<1x4x6x7xf32>
    tpu.vector_store %arg6[%c0_23, %c0_24, %c0_25, %c0_26], %87 {strides = array<i32>} : memref<1x4x6x128xf32, #tpu.memory_space<vmem>>, vector<1x4x6x7xf32>,
    %c0_27 = arith.constant 0 : index
    %c0_28 = arith.constant 0 : index
    %c0_29 = arith.constant 0 : index
    %c0_30 = arith.constant 0 : index
    %88 = vector.load %arg2[%c0_27, %c0_28, %c0_29, %c0_30] : memref<1x4x16x16xf32, #tpu.memory_space<vmem>>, vector<1x4x16x16xf32>
    %89 = vector.shape_cast %88 : vector<1x4x16x16xf32> to vector<4x16x16xf32>
    %90 = vector.extract_strided_slice %89 {offsets = [0, 0, 1], sizes = [4, 16, 15], strides = [1, 1, 1]} : vector<4x16x16xf32> to vector<4x16x15xf32>
    %91 = vector.extract_strided_slice %89 {offsets = [0, 0, 0], sizes = [4, 16, 15], strides = [1, 1, 1]} : vector<4x16x16xf32> to vector<4x16x15xf32>
    %92 = arith.subf %90, %91 : vector<4x16x15xf32>
    %c0_31 = arith.constant 0 : index
    %c0_32 = arith.constant 0 : index
    %c0_33 = arith.constant 0 : index
    %c0_34 = arith.constant 0 : index
    %93 = vector.load %arg3[%c0_31, %c0_32, %c0_33, %c0_34] : memref<1x4x16x16xf32, #tpu.memory_space<vmem>>, vector<1x4x16x16xf32>
    %94 = vector.shape_cast %93 : vector<1x4x16x16xf32> to vector<4x16x16xf32>
    %95 = vector.extract_strided_slice %94 {offsets = [0, 0, 1], sizes = [4, 16, 15], strides = [1, 1, 1]} : vector<4x16x16xf32> to vector<4x16x15xf32>
    %96 = vector.extract_strided_slice %94 {offsets = [0, 0, 0], sizes = [4, 16, 15], strides = [1, 1, 1]} : vector<4x16x16xf32> to vector<4x16x15xf32>
    %97 = arith.subf %95, %96 : vector<4x16x15xf32>
    %c0_35 = arith.constant 0 : index
    %c0_36 = arith.constant 0 : index
    %c0_37 = arith.constant 0 : index
    %c0_38 = arith.constant 0 : index
    %98 = vector.load %arg4[%c0_35, %c0_36, %c0_37, %c0_38] : memref<1x4x16x16xf32, #tpu.memory_space<vmem>>, vector<1x4x16x16xf32>
    %99 = vector.shape_cast %98 : vector<1x4x16x16xf32> to vector<4x16x16xf32>
    %100 = vector.extract_strided_slice %99 {offsets = [0, 0, 1], sizes = [4, 16, 15], strides = [1, 1, 1]} : vector<4x16x16xf32> to vector<4x16x15xf32>
    %101 = vector.extract_strided_slice %99 {offsets = [0, 0, 0], sizes = [4, 16, 15], strides = [1, 1, 1]} : vector<4x16x16xf32> to vector<4x16x15xf32>
    %102 = arith.subf %100, %101 : vector<4x16x15xf32>
    %103 = arith.addf %92, %97 : vector<4x16x15xf32>
    %104 = arith.subf %103, %102 : vector<4x16x15xf32>
    %105 = math.absf %104 : vector<4x16x15xf32>
    %cst_39 = arith.constant dense<0.000000e+00> : vector<16x15xf32>
    %106 = vector.multi_reduction <add>, %105, %cst_39 [0] : vector<4x16x15xf32> to vector<16x15xf32>
    %cst_40 = arith.constant dense<0.000000e+00> : vector<16xf32>
    %107 = vector.multi_reduction <add>, %106, %cst_40 [1] : vector<16x15xf32> to vector<16xf32>
    %108 = vector.shape_cast %107 : vector<16xf32> to vector<16x1xf32>
    %cst_41 = arith.constant dense<0.000000e+00> : vector<1xf32>
    %109 = vector.multi_reduction <add>, %108, %cst_41 [0] : vector<16x1xf32> to vector<1xf32>
    %110 = vector.shape_cast %109 : vector<1xf32> to vector<1x1xf32>
    %c0_42 = arith.constant 0 : index
    %c0_43 = arith.constant 0 : index
    %c0_44 = arith.constant 0 : index
    %c1 = arith.constant 1 : index
    %111 = vector.load %arg9[%c0_42, %c0_43, %c0_44, %c1] : memref<1x1x1x2xf32, #tpu.memory_space<vmem>>, vector<1x1x1x1xf32>
    %112 = vector.shape_cast %111 : vector<1x1x1x1xf32> to vector<1x1xf32>
    %113 = vector.shape_cast %110 : vector<1x1xf32> to vector<1x1x1x1xf32>
    tpu.vector_store %arg9[%c0_42, %c0_43, %c0_44, %c1], %113 {strides = array<i32>} : memref<1x1x1x2xf32, #tpu.memory_space<vmem>>, vector<1x1x1x1xf32>,
    %114 = math.absf %92 : vector<4x16x15xf32>
    %115 = math.absf %97 : vector<4x16x15xf32>
    %116 = arith.addf %114, %115 : vector<4x16x15xf32>
    %117 = vector.extract_strided_slice %116 {offsets = [0, 0, 0], sizes = [4, 15, 15], strides = [1, 1, 1]} : vector<4x16x15xf32> to vector<4x15x15xf32>
    %118 = vector.extract_strided_slice %116 {offsets = [0, 1, 0], sizes = [4, 15, 15], strides = [1, 1, 1]} : vector<4x16x15xf32> to vector<4x15x15xf32>
    %119 = arith.addf %117, %118 : vector<4x15x15xf32>
    %120 = vector.extract_strided_slice %119 {offsets = [0, 0, 0], sizes = [4, 13, 15], strides = [1, 1, 1]} : vector<4x15x15xf32> to vector<4x13x15xf32>
    %121 = vector.extract_strided_slice %119 {offsets = [0, 2, 0], sizes = [4, 13, 15], strides = [1, 1, 1]} : vector<4x15x15xf32> to vector<4x13x15xf32>
    %122 = arith.addf %120, %121 : vector<4x13x15xf32>
    %123 = vector.extract_strided_slice %122 {offsets = [0, 0, 0], sizes = [4, 9, 15], strides = [1, 1, 1]} : vector<4x13x15xf32> to vector<4x9x15xf32>
    %124 = vector.extract_strided_slice %122 {offsets = [0, 4, 0], sizes = [4, 9, 15], strides = [1, 1, 1]} : vector<4x13x15xf32> to vector<4x9x15xf32>
    %125 = arith.addf %123, %124 : vector<4x9x15xf32>
    %126 = vector.extract_strided_slice %125 {offsets = [0, 0, 0], sizes = [4, 7, 15], strides = [1, 1, 1]} : vector<4x9x15xf32> to vector<4x7x15xf32>
    %127 = vector.extract_strided_slice %119 {offsets = [0, 8, 0], sizes = [4, 7, 15], strides = [1, 1, 1]} : vector<4x15x15xf32> to vector<4x7x15xf32>
    %128 = arith.addf %126, %127 : vector<4x7x15xf32>
    %129 = vector.extract_strided_slice %128 {offsets = [0, 0, 0], sizes = [4, 7, 14], strides = [1, 1, 1]} : vector<4x7x15xf32> to vector<4x7x14xf32>
    %130 = vector.extract_strided_slice %128 {offsets = [0, 0, 1], sizes = [4, 7, 14], strides = [1, 1, 1]} : vector<4x7x15xf32> to vector<4x7x14xf32>
    %131 = arith.addf %129, %130 : vector<4x7x14xf32>
    %132 = vector.extract_strided_slice %131 {offsets = [0, 0, 0], sizes = [4, 7, 12], strides = [1, 1, 1]} : vector<4x7x14xf32> to vector<4x7x12xf32>
    %133 = vector.extract_strided_slice %131 {offsets = [0, 0, 2], sizes = [4, 7, 12], strides = [1, 1, 1]} : vector<4x7x14xf32> to vector<4x7x12xf32>
    %134 = arith.addf %132, %133 : vector<4x7x12xf32>
    %135 = vector.extract_strided_slice %134 {offsets = [0, 0, 0], sizes = [4, 7, 8], strides = [1, 1, 1]} : vector<4x7x12xf32> to vector<4x7x8xf32>
    %136 = vector.extract_strided_slice %134 {offsets = [0, 0, 4], sizes = [4, 7, 8], strides = [1, 1, 1]} : vector<4x7x12xf32> to vector<4x7x8xf32>
    %137 = arith.addf %135, %136 : vector<4x7x8xf32>
    %138 = vector.extract_strided_slice %137 {offsets = [0, 0, 0], sizes = [4, 7, 6], strides = [1, 1, 1]} : vector<4x7x8xf32> to vector<4x7x6xf32>
    %139 = vector.extract_strided_slice %131 {offsets = [0, 0, 8], sizes = [4, 7, 6], strides = [1, 1, 1]} : vector<4x7x14xf32> to vector<4x7x6xf32>
    %140 = arith.addf %138, %139 : vector<4x7x6xf32>
    %cst_45 = arith.constant 0.00999999977 : f32
    %141 = vector.broadcast %cst_45 : f32 to vector<4x7x6xf32>
    %142 = arith.mulf %140, %141 : vector<4x7x6xf32>
    %c0_46 = arith.constant 0 : index
    %c0_47 = arith.constant 0 : index
    %c0_48 = arith.constant 0 : index
    %c0_49 = arith.constant 0 : index
    %143 = vector.load %arg7[%c0_46, %c0_47, %c0_48, %c0_49] : memref<1x4x7x128xf32, #tpu.memory_space<vmem>>, vector<1x4x7x6xf32>
    %144 = vector.shape_cast %143 : vector<1x4x7x6xf32> to vector<4x7x6xf32>
    %145 = vector.shape_cast %142 : vector<4x7x6xf32> to vector<1x4x7x6xf32>
    tpu.vector_store %arg7[%c0_46, %c0_47, %c0_48, %c0_49], %145 {strides = array<i32>} : memref<1x4x7x128xf32, #tpu.memory_space<vmem>>, vector<1x4x7x6xf32>,
    %146 = math.absf %102 : vector<4x16x15xf32>
    %147 = vector.extract_strided_slice %146 {offsets = [0, 0, 0], sizes = [4, 15, 15], strides = [1, 1, 1]} : vector<4x16x15xf32> to vector<4x15x15xf32>
    %148 = vector.extract_strided_slice %146 {offsets = [0, 1, 0], sizes = [4, 15, 15], strides = [1, 1, 1]} : vector<4x16x15xf32> to vector<4x15x15xf32>
    %149 = arith.addf %147, %148 : vector<4x15x15xf32>
    %150 = vector.extract_strided_slice %149 {offsets = [0, 0, 0], sizes = [4, 13, 15], strides = [1, 1, 1]} : vector<4x15x15xf32> to vector<4x13x15xf32>
    %151 = vector.extract_strided_slice %149 {offsets = [0, 2, 0], sizes = [4, 13, 15], strides = [1, 1, 1]} : vector<4x15x15xf32> to vector<4x13x15xf32>
    %152 = arith.addf %150, %151 : vector<4x13x15xf32>
    %153 = vector.extract_strided_slice %152 {offsets = [0, 0, 0], sizes = [4, 9, 15], strides = [1, 1, 1]} : vector<4x13x15xf32> to vector<4x9x15xf32>
    %154 = vector.extract_strided_slice %152 {offsets = [0, 4, 0], sizes = [4, 9, 15], strides = [1, 1, 1]} : vector<4x13x15xf32> to vector<4x9x15xf32>
    %155 = arith.addf %153, %154 : vector<4x9x15xf32>
    %156 = vector.extract_strided_slice %155 {offsets = [0, 0, 0], sizes = [4, 7, 15], strides = [1, 1, 1]} : vector<4x9x15xf32> to vector<4x7x15xf32>
    %157 = vector.extract_strided_slice %149 {offsets = [0, 8, 0], sizes = [4, 7, 15], strides = [1, 1, 1]} : vector<4x15x15xf32> to vector<4x7x15xf32>
    %158 = arith.addf %156, %157 : vector<4x7x15xf32>
    %159 = vector.extract_strided_slice %158 {offsets = [0, 0, 0], sizes = [4, 7, 14], strides = [1, 1, 1]} : vector<4x7x15xf32> to vector<4x7x14xf32>
    %160 = vector.extract_strided_slice %158 {offsets = [0, 0, 1], sizes = [4, 7, 14], strides = [1, 1, 1]} : vector<4x7x15xf32> to vector<4x7x14xf32>
    %161 = arith.addf %159, %160 : vector<4x7x14xf32>
    %162 = vector.extract_strided_slice %161 {offsets = [0, 0, 0], sizes = [4, 7, 12], strides = [1, 1, 1]} : vector<4x7x14xf32> to vector<4x7x12xf32>
    %163 = vector.extract_strided_slice %161 {offsets = [0, 0, 2], sizes = [4, 7, 12], strides = [1, 1, 1]} : vector<4x7x14xf32> to vector<4x7x12xf32>
    %164 = arith.addf %162, %163 : vector<4x7x12xf32>
    %165 = vector.extract_strided_slice %164 {offsets = [0, 0, 0], sizes = [4, 7, 8], strides = [1, 1, 1]} : vector<4x7x12xf32> to vector<4x7x8xf32>
    %166 = vector.extract_strided_slice %164 {offsets = [0, 0, 4], sizes = [4, 7, 8], strides = [1, 1, 1]} : vector<4x7x12xf32> to vector<4x7x8xf32>
    %167 = arith.addf %165, %166 : vector<4x7x8xf32>
    %168 = vector.extract_strided_slice %167 {offsets = [0, 0, 0], sizes = [4, 7, 6], strides = [1, 1, 1]} : vector<4x7x8xf32> to vector<4x7x6xf32>
    %169 = vector.extract_strided_slice %161 {offsets = [0, 0, 8], sizes = [4, 7, 6], strides = [1, 1, 1]} : vector<4x7x14xf32> to vector<4x7x6xf32>
    %170 = arith.addf %168, %169 : vector<4x7x6xf32>
    %cst_50 = arith.constant 0.00999999977 : f32
    %171 = vector.broadcast %cst_50 : f32 to vector<4x7x6xf32>
    %172 = arith.mulf %170, %171 : vector<4x7x6xf32>
    %c0_51 = arith.constant 0 : index
    %c0_52 = arith.constant 0 : index
    %c0_53 = arith.constant 0 : index
    %c0_54 = arith.constant 0 : index
    %173 = vector.load %arg8[%c0_51, %c0_52, %c0_53, %c0_54] : memref<1x4x7x128xf32, #tpu.memory_space<vmem>>, vector<1x4x7x6xf32>
    %174 = vector.shape_cast %173 : vector<1x4x7x6xf32> to vector<4x7x6xf32>
    %175 = vector.shape_cast %172 : vector<4x7x6xf32> to vector<1x4x7x6xf32>
    tpu.vector_store %arg8[%c0_51, %c0_52, %c0_53, %c0_54], %175 {strides = array<i32>} : memref<1x4x7x128xf32, #tpu.memory_space<vmem>>, vector<1x4x7x6xf32>,
    return
  }
  func.func @transform_0(%arg0: i32, %arg1: i32) -> (i32, i32, i32, i32) {
    %c0_i32 = arith.constant 0 : i32
    %c0_i32_0 = arith.constant 0 : i32
    %c0_i32_1 = arith.constant 0 : i32
    return %arg0, %arg1, %c0_i32, %c0_i32_0 : i32, i32, i32, i32
  }
  func.func @transform_1(%arg0: i32, %arg1: i32) -> (i32, i32, i32, i32) {
    %c0_i32 = arith.constant 0 : i32
    %c0_i32_0 = arith.constant 0 : i32
    %c0_i32_1 = arith.constant 0 : i32
    return %arg0, %arg1, %c0_i32, %c0_i32_0 : i32, i32, i32, i32
  }
  func.func @transform_2(%arg0: i32, %arg1: i32) -> (i32, i32, i32, i32) {
    %c0_i32 = arith.constant 0 : i32
    %c0_i32_0 = arith.constant 0 : i32
    %c0_i32_1 = arith.constant 0 : i32
    return %arg0, %arg1, %c0_i32, %c0_i32_0 : i32, i32, i32, i32
  }
  func.func @transform_3(%arg0: i32, %arg1: i32) -> (i32, i32, i32, i32) {
    %c0_i32 = arith.constant 0 : i32
    %c0_i32_0 = arith.constant 0 : i32
    %c0_i32_1 = arith.constant 0 : i32
    return %arg0, %arg1, %c0_i32, %c0_i32_0 : i32, i32, i32, i32
  }
  func.func @transform_4(%arg0: i32, %arg1: i32) -> (i32, i32, i32, i32) {
    %c0_i32 = arith.constant 0 : i32
    %c0_i32_0 = arith.constant 0 : i32
    %c0_i32_1 = arith.constant 0 : i32
    return %arg0, %arg1, %c0_i32, %c0_i32_0 : i32, i32, i32, i32
  }
  func.func @transform_5(%arg0: i32, %arg1: i32) -> (i32, i32, i32, i32) {
    %c0_i32 = arith.constant 0 : i32
    %c0_i32_0 = arith.constant 0 : i32
    %c0_i32_1 = arith.constant 0 : i32
    return %arg0, %arg1, %c0_i32, %c0_i32_0 : i32, i32, i32, i32
  }
  func.func @transform_6(%arg0: i32, %arg1: i32) -> (i32, i32, i32, i32) {
    %c0_i32 = arith.constant 0 : i32
    %c0_i32_0 = arith.constant 0 : i32
    %c0_i32_1 = arith.constant 0 : i32
    return %arg0, %arg1, %c0_i32, %c0_i32_0 : i32, i32, i32, i32
  }
  func.func @transform_7(%arg0: i32, %arg1: i32) -> (i32, i32, i32, i32) {
    %c0_i32 = arith.constant 0 : i32
    %c0_i32_0 = arith.constant 0 : i32
    %c0_i32_1 = arith.constant 0 : i32
    return %arg0, %arg1, %c0_i32, %c0_i32_0 : i32, i32, i32, i32
  }
}

</mosaic_0001>

<bundles_post_ra>
// kernel: ktv_loss.1
= control target key start
LH: loop header
LB: loop body
LE: loop exit
PB: predicated region body
PF: predicated region fallthrough
CT: control target
= control target key end

     0   :  { %s4780_s0 = inlined_call_operand.hbm [shape: f32[2,4,16,16], index: 0, kind: input, shape index: {}]   ;;  %s4781_s1 = inlined_call_operand.hbm [shape: f32[2,4,16,16], index: 1, kind: input, shape index: {}]   ;;  %s4782_s2 = inlined_call_operand.hbm [shape: f32[2,4,16,16], index: 2, kind: input, shape index: {}]   ;;  %s4783_s3 = inlined_call_operand.vmem [shape: f32[2,4,6,128], index: 3, kind: output, shape index: {0}]   ;;  %s4784_s4 = inlined_call_operand.vmem [shape: f32[2,4,6,128], index: 4, kind: output, shape index: {1}]   ;;  %s4785_s5 = inlined_call_operand.vmem [shape: f32[2,4,7,128], index: 5, kind: output, shape index: {2}]   ;;  %s4786_s6 = inlined_call_operand.vmem [shape: f32[2,4,7,128], index: 6, kind: output, shape index: {3}]   ;;  %s4787_s7 = inlined_call_operand.vmem [shape: f32[2,1,1,2], index: 7, kind: output, shape index: {4}]  }
   0x1   :  { %4842 = sst [smem:[#allocation51_spill]] %s4780_s0 }
   0x2   :  { %4843 = sst [smem:[#allocation52_spill]] %s4781_s1 }
   0x3   :  { %13 = vsyncpa [#allocation3], 0 }
   0x4   :  { %15 = vsyncpa [#allocation3 + $0x1], 0 }
   0x5   :  { %16 = vsyncpa [#allocation5], 0 }
   0x6   :  { %18 = vsyncpa [#allocation5 + $0x1], 0  ;;  %s3016_s24 = smov 0   ;;  %s3018_s25 = smov 0  }
   0x7   :  { %s3020_s26 = smov 0   ;;  %s3022_s27 = smov 0  }
   0x8   :  { %s3024_s28 = smov 0   ;;  %s3026_s29 = smov 0  }
   0x9 LB: > { %4844 = sst [smem:[#allocation9_spill]] %s2957_s28  ;;  %s4788_s30 = sadd.s32 4294967295, %s2961_s29   ;;  %s2961_s29 = sphi %s3026_s29, %s24_s29   ;;  %s2957_s28 = sphi %s3024_s28, %s4953_s28   ;;  %s2953_s27 = sphi %s3022_s27, %s4952_s27   ;;  %s2949_s26 = sphi %s3020_s26, %s4956_s26   ;;  %s2945_s25 = sphi %s3018_s25, %s4955_s25   ;;  %s2941_s24 = sphi %s3016_s24, %s4954_s24  }
   0xa   : > { %s36_s8 = sadd.s32 1, %s2957_s28  ;;  %s45_s9 = sadd.s32 1, %s2949_s26 }
   0xb   : > { %p38_p0 = scmp.ge.s32.totalorder %s36_s8, 2  ;;  %p52_p1 = scmp.ne.s32.totalorder %s2949_s26, %s2945_s25 }
   0xc   : > { %p53_p2 = scmp.eq.s32.totalorder %s2961_s29, 0  ;;  %p58_p4 = scmp.ne.s32.totalorder %s2945_s25, %s2941_s24 }
   0xd   : > { %s4958_s8 = smov (%p38_p0, %s36_s8), 0  ;;  %p59_p5 = scmp.eq.s32.totalorder %s4788_s30, 0 }
   0xe   : > { %4845 = sst [smem:[#allocation10_spill]] %s4958_s8  ;;  %p54_p3 = por %p53_p2, %p52_p1 }
   0xf   : > { %s40_s10 = ssub.s32 %s2957_s28, %s4958_s8  ;;  %p3057_p7 = por %p59_p5, %p58_p4 }
  0x10   : > { %p43_p6 = scmp.eq.s32.totalorder %s40_s10, 0  ;;  %p2764_p8 = scmp.lt.s32.totalorder %s2961_s29, 2 }
  0x11   : > { %s278_s13 = sand.u32 1, %s2949_s26   ;;  %s3067_s14 = sshll.u32 %s2957_s28, 10 }
  0x12   : > { %s3063_s12 = scalar_select %p43_p6, %s2949_s26, %s45_s9  }
  0x13   : > { %s3071_s15 = sshll.u32 %s278_s13, 6  ;;  %p3073_p9 = pnand %p2764_p8, %p54_p3 }
  0x14   : > { %s302_s17 = sand.u32 1, %s2961_s29   ;;  %s4848_s1 = sld [smem:[#allocation52_spill]] }
  0x15   : > { %s306_s21 = scalar_lea.vmem [#allocation4], %s3071_s15  ;;  %p2727_p10 = scmp.ge.s32.totalorder %s2961_s29, 1 }
  0x16   : > { %s316_s22 = sshll.u32 %s306_s21, 4  ;;  %s3084_s23 = scalar_lea.sflag [#allocation5], %s302_s17  ;;  %s317_s22 = int_to_ptr.vmem [resolvable:$true] %s316_s22 }
  0x17   : > { %p2825_p11 = pneg %p3073_p9  ;;  %s2836_s24 = scalar_lea.vmem %s317_s22, 1024 }
  0x18   : > { %p2837_p12 = scmp.ne.s32.totalorder %s317_s22, %s2836_s24  ;;  %s2963_s9 = smov [#allocation4]  }
  0x19   : > { %s2841_s10 = sshll.u32 %s2963_s9, 4  ;;  %s2842_s10 = int_to_ptr.vmem [resolvable:$false] %s2841_s10 }
  0x1a   : > { %s315_s20 = scalar_lea.hbm %s4848_s1, %s3067_s14  ;;  %p2839_p13 = pnand %p2837_p12, %p2825_p11 }
  0x1b   : > { %s2843_s30 = scalar_lea.vmem %s2842_s10, 2048  ;;  %p2844_p1 = scmp.lt.s32.totalorder %s317_s22, %s2842_s10 }
  0x1c   : > { %p2840_p0 = pneg %p2839_p13  ;;  %p2845_p2 = scmp.lt.s32.totalorder %s2843_s30, %s2836_s24 }
  0x1e   : > { %p2846_p3 = por %p2845_p2, %p2844_p1 }
  0x20   : > { %p2847_p4 = pnand %p2846_p3, %p2840_p0 }
  0x22   : > { %2850 = shalt.err (!%p2847_p4)
}
  0x23   : > { %s4790_s18 = smov 128   ;;  %s2965_s17 = smov 8  }
  0x24   : > { %2760 = dma.hbm_to_vmem [thread:$0]  (!%p3073_p9), %s315_s20, 1024, %s317_s22, %s3084_s23, %s4790_s18, %s4790_s18, %s2965_s17  }
  0x25   : > { %p348_p5 = scmp.lt.s32.totalorder %s2961_s29, 3  ;;  %s4850_s0 = sld [smem:[#allocation51_spill]] }
  0x26   : > { %s282_s9 = scalar_lea.vmem [#allocation2], %s3071_s15  ;;  %s279_s1 = scalar_lea.sflag [#allocation3], %s278_s13 }
  0x27   : > { %p3100_p6 = pnand %p2727_p10, %p348_p5  ;;  %s292_s10 = sshll.u32 %s282_s9, 4  ;;  %s293_s10 = int_to_ptr.vmem [resolvable:$true] %s292_s10 }
  0x28   : > { %s2864_s8 = scalar_lea.vmem %s293_s10, 1024  ;;  %s2966_s20 = smov [#allocation2]  }
  0x29   : > { %p2865_p8 = scmp.ne.s32.totalorder %s293_s10, %s2864_s8  ;;  %s2869_s22 = sshll.u32 %s2966_s20, 4  ;;  %s2870_s22 = int_to_ptr.vmem [resolvable:$false] %s2869_s22 }
  0x2a   : > { %s2871_s18 = scalar_lea.vmem %s2870_s22, 2048  ;;  %p2872_p10 = scmp.lt.s32.totalorder %s293_s10, %s2870_s22 }
  0x2b   : > { %s291_s24 = scalar_lea.hbm %s4850_s0, %s3067_s14  ;;  %p2867_p12 = pnand %p2865_p8, %p2825_p11 }
  0x2c   : > { %p2873_p0 = scmp.lt.s32.totalorder %s2871_s18, %s2864_s8 }
  0x2d   : > { %p2868_p13 = pneg %p2867_p12 }
  0x2e   : > { %p2874_p1 = por %p2873_p0, %p2872_p10 }
  0x30   : > { %p2875_p2 = pnand %p2874_p1, %p2868_p13 }
  0x32   : > { %2878 = shalt.err (!%p2875_p2)
}
  0x33   : > { %s4851_s19 = smov 128   ;;  %s339_s9 = scalar_lea.hbm %s4782_s2, %s3067_s14 }
  0x34   : > { %2757 = dma.hbm_to_vmem [thread:$0]  (!%p3073_p9), %s291_s24, 1024, %s293_s10, %s279_s1, %s4851_s19, %s4851_s19, %s2965_s17  }
  0x35   : > { %s330_s20 = scalar_lea.vmem [#allocation6], %s3071_s15  ;;  %s2967_s18 = smov [#allocation6]  }
  0x36   : > { %s340_s0 = sshll.u32 %s330_s20, 4  ;;  %s2897_s22 = sshll.u32 %s2967_s18, 4  ;;  %s341_s0 = int_to_ptr.vmem [resolvable:$true] %s340_s0  ;;  %s2898_s22 = int_to_ptr.vmem [resolvable:$false] %s2897_s22 }
  0x37   : > { %s2892_s8 = scalar_lea.vmem %s341_s0, 1024  ;;  %s2899_s28 = scalar_lea.vmem %s2898_s22, 2048 }
  0x38   : > { %p2893_p3 = scmp.ne.s32.totalorder %s341_s0, %s2892_s8  ;;  %p2900_p8 = scmp.lt.s32.totalorder %s341_s0, %s2898_s22 }
  0x39   : > { %p2901_p12 = scmp.lt.s32.totalorder %s2899_s28, %s2892_s8 }
  0x3a   : > { %p2895_p4 = pnand %p2893_p3, %p2825_p11 }
  0x3b   : > { %p2902_p13 = por %p2901_p12, %p2900_p8 }
  0x3c   : > { %p2896_p5 = pneg %p2895_p4 }
  0x3e   : > { %p2903_p10 = pnand %p2902_p13, %p2896_p5 }
  0x40   : > { %2906 = shalt.err (!%p2903_p10)
}
  0x41   : > { %2763 = dma.hbm_to_vmem [thread:$0]  (!%p3073_p9), %s339_s9, 1024, %s341_s0, %s3084_s23, %s4851_s19, %s4851_s19, %s2965_s17  }
  0x42   : > { %352 = sbr.rel (%p3100_p6) target bundleno = 1935 (0x78f), region = 32 }
  0x47   : > { %s354_s1 = sand.u32 1, %s2945_s25  }
  0x48   : > { %s3136_s14 = sshll.u32 %s354_s1, 6  ;;  %s355_s28 = scalar_lea.sflag [#allocation3], %s354_s1 }
  0x49   : > { %s3139_s15 = scalar_lea.vmem [#allocation2], %s3136_s14 }
  0x4a   : > { %2932 = dma.done.wait (%p3057_p7), %s355_s28, 1024  }
  0x4b   : > { %2934 = vsyncadd (%p3057_p7), %s355_s28, 4294966272  ;;  %s4852_s16 = sadd.s32 4294967295, %s2961_s29   ;;  %s3148_s17 = scalar_lea.vmem [#allocation4], %s3136_s14 }
  0x4c   : > { %s363_s0 = sand.u32 1, %s4852_s16  }
  0x4d   : > { %s364_s23 = scalar_lea.sflag [#allocation5], %s363_s0 }
  0x4e   : > { %2936 = dma.done.wait (%p3057_p7), %s364_s23, 2048  }
  0x4f   : > { %2938 = vsyncadd (%p3057_p7), %s364_s23, 4294965248  ;;  %v3155_v0 = vld [vmem:[%s3139_s15] sm:$0xff]  ;;  %v3158_v1 = vld [vmem:[%s3139_s15 + $0x10] sm:$0xff]  ;;  %s2968_s30 = smov 16   ;;  %s3235_s11 = scalar_lea.vmem [#allocation6], %s3136_s14  ;;  %vm842_vm0 = vcmask 1047680  }
  0x50   : > { %1360 = vrot.lane.b32.xlu0 %v3155_v0, %s2968_s30  ;;  %1366 = vrot.lane.b32.xlu1 %v3158_v1, %s2968_s30  ;;  %v3165_v2 = vld [vmem:[%s3139_s15 + $0x8] sm:$0xff]  ;;  %v3168_v3 = vld [vmem:[%s3139_s15 + $0x18] sm:$0xff]  ;;  %s2969_s24 = smov 1   ;;  %vm684_vm1 = vcmask 1046528   ;;  %vm768_vm2 = vcmask 1045504   ;;  %vm805_vm3 = vcmask 1043456  }
  0x51   : > { %v3175_v4 = vld [vmem:[%s3139_s15 + $0x20] sm:$0xff]  ;;  %v3178_v5 = vld [vmem:[%s3139_s15 + $0x28] sm:$0xff]  ;;  %v3185_v6 = vld [vmem:[%s3139_s15 + $0x30] sm:$0xff]  ;;  %s2970_s10 = smov 127   ;;  %vm519_vm4 = vcmask 1040384   ;;  %s2971_s19 = smov 126  }
  0x52   : > { %v3188_v7 = vld [vmem:[%s3139_s15 + $0x38] sm:$0xff]  ;;  %v3195_v8 = vld [vmem:[%s3148_s17] sm:$0xff]  ;;  %v3198_v9 = vld [vmem:[%s3148_s17 + $0x8] sm:$0xff]  ;;  %vm660_vm5 = vcmask 130049   ;;  %s2972_s13 = smov 121   ;;  %vm668_vm7 = vcmask 130048  }
  0x53   : > { %v3205_v10 = vld [vmem:[%s3148_s17 + $0x10] sm:$0xff]  ;;  %v3208_v11 = vld [vmem:[%s3148_s17 + $0x18] sm:$0xff]  ;;  %v3215_v12 = vld [vmem:[%s3148_s17 + $0x20] sm:$0xff]  ;;  %s2973_s21 = smov 125   ;;  %s2974_s9 = smov 124   ;;  %vm698_vm8 = vcmask 0  }
  0x54   : > { %1363 = vrot.lane.b32.xlu0 %v3165_v2, %s2968_s30  ;;  %1369 = vrot.lane.b32.xlu1 %v3168_v3, %s2968_s30  ;;  %v3218_v13 = vld [vmem:[%s3148_s17 + $0x28] sm:$0xff]  ;;  %v3225_v14 = vld [vmem:[%s3148_s17 + $0x30] sm:$0xff]  ;;  %s2975_s20 = smov 120   ;;  %p458_p7 = scmp.lt.s32.totalorder %s2953_s27, 1  ;;  %vm1031_vm9 = vcmask 55297   ;;  %vm2064_vm10 = vcmask 47104  }
  0x55   : > { %v3228_v15 = vld [vmem:[%s3148_s17 + $0x38] sm:$0xff]  ;;  %v3238_v16 = vld [vmem:[%s3235_s11] sm:$0xff]  ;;  %v3241_v17 = vld [vmem:[%s3235_s11 + $0x8] sm:$0xff]  ;;  %vm1734_vm11 = vcmask 8200  }
  0x56   : > { %v3248_v18 = vld [vmem:[%s3235_s11 + $0x10] sm:$0xff]  ;;  %v3251_v19 = vld [vmem:[%s3235_s11 + $0x18] sm:$0xff]  ;;  %v3258_v20 = vld [vmem:[%s3235_s11 + $0x20] sm:$0xff]  ;;  %s4960_s27 = smov (!%p458_p7, %s2953_s27), 1 }
  0x57   : > { %v3261_v21 = vld [vmem:[%s3235_s11 + $0x28] sm:$0xff]  ;;  %v3268_v22 = vld [vmem:[%s3235_s11 + $0x30] sm:$0xff]  ;;  %v3271_v23 = vld [vmem:[%s3235_s11 + $0x38] sm:$0xff]  ;;  %s4692_s22 = scalar_lea.vmem %s4787_s7, %s4960_s27  ;;  %s4696_s1 = sshll.u32 %s4960_s27, 5 }
  0x58   : > { %1372 = vrot.lane.b32.xlu0 %v3175_v4, %s2968_s30  ;;  %1375 = vrot.lane.b32.xlu1 %v3178_v5, %s2968_s30  ;;  %s4714_s0 = scalar_lea.vmem %s4784_s4, %s4696_s1 }
  0x5c   : > { %1378 = vrot.lane.b32.xlu0 %v3185_v6, %s2968_s30  ;;  %1381 = vrot.lane.b32.xlu1 %v3188_v7, %s2968_s30 }
  0x60   : > { %1456 = vrot.lane.b32.xlu0 %v3195_v8, %s2968_s30  ;;  %1459 = vrot.lane.b32.xlu1 %v3198_v9, %s2968_s30 }
  0x64   : > { %1462 = vrot.lane.b32.xlu0 %v3205_v10, %s2968_s30  ;;  %1465 = vrot.lane.b32.xlu1 %v3208_v11, %s2968_s30 }
  0x68   : > { %1468 = vrot.lane.b32.xlu0 %v3215_v12, %s2968_s30  ;;  %1471 = vrot.lane.b32.xlu1 %v3218_v13, %s2968_s30 }
  0x6c   : > { %1474 = vrot.lane.b32.xlu0 %v3225_v14, %s2968_s30  ;;  %1477 = vrot.lane.b32.xlu1 %v3228_v15, %s2968_s30 }
  0x70   : > { %1552 = vrot.lane.b32.xlu0 %v3238_v16, %s2968_s30  ;;  %1555 = vrot.lane.b32.xlu1 %v3241_v17, %s2968_s30 }
  0x74   : > { %1558 = vrot.lane.b32.xlu0 %v3248_v18, %s2968_s30  ;;  %1561 = vrot.lane.b32.xlu1 %v3251_v19, %s2968_s30 }
  0x78   : > { %1564 = vrot.lane.b32.xlu0 %v3258_v20, %s2968_s30  ;;  %1567 = vrot.lane.b32.xlu1 %v3261_v21, %s2968_s30 }
  0x7c   : > { %1570 = vrot.lane.b32.xlu0 %v3268_v22, %s2968_s30  ;;  %1573 = vrot.lane.b32.xlu1 %v3271_v23, %s2968_s30 }
  0x80   : > { %1416 = vrot.lane.b32.xlu0 %v3155_v0, %s2969_s24  ;;  %1418 = vrot.lane.b32.xlu1 %v3165_v2, %s2969_s24 }
  0x84   : > { %1420 = vrot.lane.b32.xlu0 %v3158_v1, %s2969_s24  ;;  %1422 = vrot.lane.b32.xlu1 %v3168_v3, %s2969_s24 }
  0x88   : > { %1424 = vrot.lane.b32.xlu0 %v3175_v4, %s2969_s24  ;;  %1426 = vrot.lane.b32.xlu1 %v3178_v5, %s2969_s24 }
  0x8c   : > { %1428 = vrot.lane.b32.xlu0 %v3185_v6, %s2969_s24  ;;  %1430 = vrot.lane.b32.xlu1 %v3188_v7, %s2969_s24 }
  0x90   : > { %1512 = vrot.lane.b32.xlu0 %v3195_v8, %s2969_s24  ;;  %1514 = vrot.lane.b32.xlu1 %v3198_v9, %s2969_s24 }
  0x94   : > { %1516 = vrot.lane.b32.xlu0 %v3205_v10, %s2969_s24  ;;  %1518 = vrot.lane.b32.xlu1 %v3208_v11, %s2969_s24 }
  0x98   : > { %1520 = vrot.lane.b32.xlu0 %v3215_v12, %s2969_s24  ;;  %1522 = vrot.lane.b32.xlu1 %v3218_v13, %s2969_s24 }
  0x9c   : > { %1524 = vrot.lane.b32.xlu0 %v3225_v14, %s2969_s24  ;;  %1526 = vrot.lane.b32.xlu1 %v3228_v15, %s2969_s24 }
  0xc2   : > { %v1361_v24 = vpop.permute.xlu0 %1360  ;;  %v1367_v25 = vpop.permute.xlu1 %1366 }
  0xc3   : > { %v1362_v26 = vsel %vm842_vm0, %v1361_v24, %v3155_v0  ;;  %v1368_v27 = vsel %vm842_vm0, %v1367_v25, %v3158_v1 }
  0xc4   : > { %1384 = vrot.lane.b32.xlu0 %v1362_v26, %s2968_s30 }
  0xc6   : > { %v1364_v28 = vpop.permute.xlu0 %1363  ;;  %v1370_v29 = vpop.permute.xlu1 %1369 }
  0xc7   : > { %v1365_v30 = vsel %vm842_vm0, %v1364_v28, %v3165_v2  ;;  %v1371_v31 = vsel %vm842_vm0, %v1370_v29, %v3168_v3 }
  0xc8   : > { %1388 = vrot.lane.b32.xlu0 %v1368_v27, %s2968_s30  ;;  %1386 = vrot.lane.b32.xlu1 %v1365_v30, %s2968_s30 }
  0xca   : > { %v1373_v32 = vpop.permute.xlu0 %1372  ;;  %v1376_v33 = vpop.permute.xlu1 %1375 }
  0xcb   : > { %v1374_v34 = vsel %vm842_vm0, %v1373_v32, %v3175_v4  ;;  %v1377_v35 = vsel %vm842_vm0, %v1376_v33, %v3178_v5 }
  0xcc   : > { %1390 = vrot.lane.b32.xlu1 %v1371_v31, %s2968_s30  ;;  %1392 = vrot.lane.b32.xlu0 %v1374_v34, %s2968_s30 }
  0xce   : > { %v1379_v36 = vpop.permute.xlu0 %1378  ;;  %v1382_v37 = vpop.permute.xlu1 %1381 }
  0xcf   : > { %v1380_v38 = vsel %vm842_vm0, %v1379_v36, %v3185_v6  ;;  %v1383_v39 = vsel %vm842_vm0, %v1382_v37, %v3188_v7 }
  0xd0   : > { %1394 = vrot.lane.b32.xlu1 %v1377_v35, %s2968_s30  ;;  %1396 = vrot.lane.b32.xlu0 %v1380_v38, %s2968_s30 }
  0xd2   : > { %v1457_v40 = vpop.permute.xlu0 %1456  ;;  %v1460_v41 = vpop.permute.xlu1 %1459 }
  0xd3   : > { %v1458_v42 = vsel %vm842_vm0, %v1457_v40, %v3195_v8  ;;  %v1461_v43 = vsel %vm842_vm0, %v1460_v41, %v3198_v9 }
  0xd4   : > { %1398 = vrot.lane.b32.xlu1 %v1383_v39, %s2968_s30  ;;  %1480 = vrot.lane.b32.xlu0 %v1458_v42, %s2968_s30 }
  0xd6   : > { %v1463_v44 = vpop.permute.xlu0 %1462  ;;  %v1466_v45 = vpop.permute.xlu1 %1465 }
  0xd7   : > { %v1464_v46 = vsel %vm842_vm0, %v1463_v44, %v3205_v10  ;;  %v1467_v47 = vsel %vm842_vm0, %v1466_v45, %v3208_v11 }
  0xd8   : > { %1482 = vrot.lane.b32.xlu1 %v1461_v43, %s2968_s30  ;;  %1484 = vrot.lane.b32.xlu0 %v1464_v46, %s2968_s30 }
  0xda   : > { %v1469_v48 = vpop.permute.xlu0 %1468  ;;  %v1472_v49 = vpop.permute.xlu1 %1471 }
  0xdb   : > { %v1470_v50 = vsel %vm842_vm0, %v1469_v48, %v3215_v12  ;;  %v1473_v51 = vsel %vm842_vm0, %v1472_v49, %v3218_v13 }
  0xdc   : > { %1486 = vrot.lane.b32.xlu1 %v1467_v47, %s2968_s30  ;;  %1488 = vrot.lane.b32.xlu0 %v1470_v50, %s2968_s30 }
  0xde   : > { %v1475_v52 = vpop.permute.xlu0 %1474  ;;  %v1478_v53 = vpop.permute.xlu1 %1477 }
  0xdf   : > { %v1476_v54 = vsel %vm842_vm0, %v1475_v52, %v3225_v14  ;;  %v1479_v55 = vsel %vm842_vm0, %v1478_v53, %v3228_v15 }
  0xe0   : > { %1490 = vrot.lane.b32.xlu1 %v1473_v51, %s2968_s30  ;;  %1492 = vrot.lane.b32.xlu0 %v1476_v54, %s2968_s30 }
  0xe2   : > { %v1553_v56 = vpop.permute.xlu0 %1552  ;;  %v1556_v57 = vpop.permute.xlu1 %1555 }
  0xe3   : > { %v1554_v58 = vsel %vm842_vm0, %v1553_v56, %v3238_v16  ;;  %v1557_v59 = vsel %vm842_vm0, %v1556_v57, %v3241_v17 }
  0xe4   : > { %1494 = vrot.lane.b32.xlu1 %v1479_v55, %s2968_s30  ;;  %1576 = vrot.lane.b32.xlu0 %v1554_v58, %s2968_s30 }
  0xe6   : > { %v1559_v60 = vpop.permute.xlu0 %1558  ;;  %v1562_v61 = vpop.permute.xlu1 %1561 }
  0xe7   : > { %v1560_v62 = vsel %vm842_vm0, %v1559_v60, %v3248_v18  ;;  %v1563_v63 = vsel %vm842_vm0, %v1562_v61, %v3251_v19 }
  0xe8   : > { %1578 = vrot.lane.b32.xlu1 %v1557_v59, %s2968_s30  ;;  %1580 = vrot.lane.b32.xlu0 %v1560_v62, %s2968_s30 }
  0xea   : > { %v1565_v24 = vpop.permute.xlu0 %1564  ;;  %v1568_v25 = vpop.permute.xlu1 %1567 }
  0xeb   : > { %v1566_v26 = vsel %vm842_vm0, %v1565_v24, %v3258_v20  ;;  %v1569_v27 = vsel %vm842_vm0, %v1568_v25, %v3261_v21 }
  0xec   : > { %1582 = vrot.lane.b32.xlu1 %v1563_v63, %s2968_s30  ;;  %1584 = vrot.lane.b32.xlu0 %v1566_v26, %s2968_s30 }
  0xee   : > { %v1571_v28 = vpop.permute.xlu0 %1570  ;;  %v1574_v29 = vpop.permute.xlu1 %1573 }
  0xef   : > { %v1572_v30 = vsel %vm842_vm0, %v1571_v28, %v3268_v22  ;;  %v1575_v31 = vsel %vm842_vm0, %v1574_v29, %v3271_v23 }
  0xf0   : > { %1586 = vrot.lane.b32.xlu1 %v1569_v27, %s2968_s30  ;;  %1588 = vrot.lane.b32.xlu0 %v1572_v30, %s2968_s30 }
  0xf2   : > { %v1417_v32 = vpop.permute.xlu0 %1416  ;;  %v1419_v33 = vpop.permute.xlu1 %1418 }
  0xf4   : > { %1590 = vrot.lane.b32.xlu1 %v1575_v31, %s2968_s30  ;;  %1608 = vrot.lane.b32.xlu0 %v3238_v16, %s2969_s24 }
  0xf6   : > { %v1421_v34 = vpop.permute.xlu0 %1420  ;;  %v1423_v35 = vpop.permute.xlu1 %1422 }
  0xf8   : > { %1610 = vrot.lane.b32.xlu1 %v3241_v17, %s2969_s24  ;;  %1612 = vrot.lane.b32.xlu0 %v3248_v18, %s2969_s24 }
  0xfa   : > { %v1425_v36 = vpop.permute.xlu0 %1424  ;;  %v1427_v37 = vpop.permute.xlu1 %1426 }
  0xfc   : > { %1614 = vrot.lane.b32.xlu1 %v3251_v19, %s2969_s24  ;;  %1616 = vrot.lane.b32.xlu0 %v3258_v20, %s2969_s24 }
  0xfe   : > { %v3397_v38 = vpop.permute.xlu0 %1428  ;;  %v3399_v39 = vpop.permute.xlu1 %1430 }
 0x100   : > { %1618 = vrot.lane.b32.xlu1 %v3261_v21, %s2969_s24  ;;  %1620 = vrot.lane.b32.xlu0 %v3268_v22, %s2969_s24 }
 0x102   : > { %v1513_v40 = vpop.permute.xlu0 %1512  ;;  %v1515_v41 = vpop.permute.xlu1 %1514 }
 0x104   : > { %1622 = vrot.lane.b32.xlu1 %v3271_v23, %s2969_s24 }
 0x106   : > { %v1517_v42 = vpop.permute.xlu0 %1516  ;;  %v1519_v43 = vpop.permute.xlu1 %1518 }
 0x10a   : > { %v1521_v44 = vpop.permute.xlu0 %1520  ;;  %v1523_v45 = vpop.permute.xlu1 %1522 }
 0x10e   : > { %v1525_v46 = vpop.permute.xlu0 %1524  ;;  %v3401_v47 = vpop.permute.xlu1 %1526 }
 0x136   : > { %v1385_v48 = vpop.permute.xlu0 %1384 }
 0x137   : > { %v1400_v55 = vsel %vm842_vm0, %v1385_v48, %v3155_v0 }
 0x138   : > { %v1440_v59 = vsub.f32 %v1400_v55, %v1417_v32 }
 0x13a   : > { %v1387_v49 = vpop.permute.xlu1 %1386  ;;  %v1389_v50 = vpop.permute.xlu0 %1388  ;;  %v1736_v28 = vand.u32 2147483647, %v1440_v59 }
 0x13b   : > { %v1401_v56 = vsel %vm842_vm0, %v1387_v49, %v3165_v2  ;;  %v1402_v63 = vsel %vm842_vm0, %v1389_v50, %v3158_v1 }
 0x13c   : > { %v1441_v62 = vsub.f32 %v1401_v56, %v1419_v33  ;;  %v3417_v31 = vsub.f32 %v1402_v63, %v1421_v34 }
 0x13e   : > { %v1391_v51 = vpop.permute.xlu1 %1390  ;;  %v1393_v52 = vpop.permute.xlu0 %1392  ;;  %v1737_v48 = vand.u32 2147483647, %v1441_v62 }
 0x13f   : > { %v1403_v32 = vsel %vm842_vm0, %v1391_v51, %v3168_v3  ;;  %v1404_v49 = vsel %vm842_vm0, %v1393_v52, %v3175_v4 }
 0x140   : > { %v1444_v4 = vsub.f32 %v1404_v49, %v1425_v36 }
 0x142   : > { %v1395_v53 = vpop.permute.xlu1 %1394  ;;  %v1397_v54 = vpop.permute.xlu0 %1396 }
 0x143   : > { %v1405_v50 = vsel %vm842_vm0, %v1395_v53, %v3178_v5 }
 0x144   : > { %v1445_v53 = vsub.f32 %v1405_v50, %v1427_v37 }
 0x146   : > { %v1399_v57 = vpop.permute.xlu1 %1398  ;;  %v1481_v58 = vpop.permute.xlu0 %1480 }
 0x147   : > { %v1496_v60 = vsel %vm842_vm0, %v1481_v58, %v3195_v8 }
 0x148   : > { %v1536_v61 = vsub.f32 %v1496_v60, %v1513_v40 }
 0x14a   : > { %v3411_v24 = vadd.f32 %v1536_v61, %v1440_v59  ;;  %v1744_v25 = vand.u32 2147483647, %v1536_v61  ;;  %v1483_v26 = vpop.permute.xlu1 %1482  ;;  %v1485_v27 = vpop.permute.xlu0 %1484  ;;  %v1443_v61 = vsub.f32 %v1403_v32, %v1423_v35 }
 0x14b   : > { %v1497_v29 = vsel %vm842_vm0, %v1483_v26, %v3198_v9  ;;  %v1498_v30 = vsel %vm842_vm0, %v1485_v27, %v3205_v10 }
 0x14c   : > { %4853 = vst [vmem:[#allocation11_spill] sm:$0xff] %v3411_v24  ;;  %v1537_v33 = vsub.f32 %v1497_v29, %v1515_v41  ;;  %v1538_v40 = vsub.f32 %v1498_v30, %v1517_v42  ;;  %v1752_v55 = vadd.f32 %v1744_v25, %v1736_v28  ;;  %v1407_v29 = vsel %vm842_vm0, %v1399_v57, %v3188_v7 }
 0x14d   : > { %v1739_v57 = vand.u32 2147483647, %v1443_v61 }
 0x14e   : > { %v3425_v56 = vadd.f32 %v1537_v33, %v1441_v62  ;;  %v1745_v58 = vand.u32 2147483647, %v1537_v33  ;;  %v3428_v59 = vadd.f32 %v1538_v40, %v3417_v31  ;;  %v1487_v34 = vpop.permute.xlu1 %1486  ;;  %v1489_v60 = vpop.permute.xlu0 %1488  ;;  %v1406_v62 = vsel %vm842_vm0, %v1397_v54, %v3185_v6 }
 0x14f   : > { %v1499_v41 = vsel %vm842_vm0, %v1487_v34, %v3208_v11  ;;  %v1500_v42 = vsel %vm842_vm0, %v1489_v60, %v3215_v12  ;;  %v1768_v63 = vrot.slane %v1752_v55, 1  ;;  %v1446_v37 = vsub.f32 %v1406_v62, %v3397_v38 }
 0x150   : > { %4854 = vst [vmem:[#allocation12_spill] sm:$0xff] %v3425_v56  ;;  %4855 = vst [vmem:[#allocation13_spill] sm:$0xff] %v3428_v59  ;;  %v1753_v51 = vadd.f32 %v1745_v58, %v1737_v48  ;;  %v1539_v52 = vsub.f32 %v1499_v41, %v1519_v43  ;;  %v1540_v5 = vsub.f32 %v1500_v42, %v1521_v44  ;;  %v1741_v54 = vand.u32 2147483647, %v1445_v53 }
 0x151   : > { %v1447_v58 = vsub.f32 %v1407_v29, %v3399_v39  ;;  %v1746_v60 = vand.u32 2147483647, %v1538_v40 }
 0x152   : > { %v1769_v25 = vrot.slane %v1753_v51, 1  ;;  %v3436_v26 = vadd.f32 %v1539_v52, %v1443_v61  ;;  %v3438_v35 = vadd.f32 %v1540_v5, %v1444_v4  ;;  %v1491_v27 = vpop.permute.xlu1 %1490  ;;  %v1493_v28 = vpop.permute.xlu0 %1492  ;;  %v1748_v30 = vand.u32 2147483647, %v1540_v5 }
 0x153   : > { %v1501_v12 = vsel %vm842_vm0, %v1491_v27, %v3218_v13  ;;  %v1502_v36 = vsel %vm842_vm0, %v1493_v28, %v3225_v14  ;;  %v1747_v50 = vand.u32 2147483647, %v1539_v52  ;;  %v1738_v52 = vand.u32 2147483647, %v3417_v31 }
 0x154   : > { %4856 = vst [vmem:[#allocation14_spill] sm:$0xff] %v3436_v26  ;;  %4857 = vst [vmem:[#allocation15_spill] sm:$0xff] %v3438_v35  ;;  %v1541_v43 = vsub.f32 %v1501_v12, %v1523_v45  ;;  %v1542_v44 = vsub.f32 %v1502_v36, %v1525_v46  ;;  %v1770_v6 = vsel %vm684_vm1, %v1768_v63, %v1769_v25  ;;  %v1740_v46 = vand.u32 2147483647, %v1444_v4  ;;  %v595_v35 = vld [vmem:[%s3235_s11 + $0x18] sm:$0xff] }
 0x155   : > { %v1788_v38 = vadd.f32 %v1770_v6, %v1752_v55  ;;  %v3454_v45 = vadd.f32 %v1769_v25, %v1753_v51  ;;  %v1755_v62 = vadd.f32 %v1747_v50, %v1739_v57  ;;  %v1754_v4 = vadd.f32 %v1746_v60, %v1738_v52 }
 0x156   : > { %v3448_v32 = vadd.f32 %v1541_v43, %v1445_v53  ;;  %v1749_v33 = vand.u32 2147483647, %v1541_v43  ;;  %v3450_v48 = vadd.f32 %v1542_v44, %v1446_v37  ;;  %v1495_v13 = vpop.permute.xlu1 %1494  ;;  %v1577_v49 = vpop.permute.xlu0 %1576  ;;  %v1756_v41 = vadd.f32 %v1748_v30, %v1740_v46 }
 0x157   : > { %v1503_v14 = vsel %vm842_vm0, %v1495_v13, %v3228_v15  ;;  %v1804_v15 = vrot.slane %v1788_v38, 2  ;;  %v1805_v55 = vrot.slane %v3454_v45, 2  ;;  %v1743_v61 = vand.u32 2147483647, %v1447_v58 }
 0x158   : > { %4858 = vst [vmem:[#allocation16_spill] sm:$0xff] %v3448_v32  ;;  %4859 = vst [vmem:[#allocation17_spill] sm:$0xff] %v3450_v48  ;;  %v1757_v34 = vadd.f32 %v1749_v33, %v1741_v54  ;;  %v1543_v7 = vsub.f32 %v1503_v14, %v3401_v47  ;;  %v1774_v63 = vrot.slane %v1756_v41, 1  ;;  %v1772_v40 = vrot.slane %v1755_v62, 1 }
 0x159   : > { %v1750_v27 = vand.u32 2147483647, %v1542_v44  ;;  %v1806_v28 = vsel %vm768_vm2, %v1804_v15, %v1805_v55  ;;  %v1742_v36 = vand.u32 2147483647, %v1446_v37  ;;  %v1771_v31 = vrot.slane %v1754_v4, 1 }
 0x15a   : > { %v3458_v42 = vadd.f32 %v1543_v7, %v1447_v58  ;;  %v1579_v5 = vpop.permute.xlu1 %1578  ;;  %v1581_v53 = vpop.permute.xlu0 %1580  ;;  %v1775_v51 = vrot.slane %v1757_v34, 1  ;;  %v1751_v39 = vand.u32 2147483647, %v1543_v7  ;;  %v1824_v29 = vadd.f32 %v1806_v28, %v1788_v38 }
 0x15b   : > { %v1758_v33 = vadd.f32 %v1750_v27, %v1742_v36  ;;  %v1773_v50 = vsel %vm684_vm1, %v1771_v31, %v1772_v40  ;;  %v1825_v14 = vadd.f32 %v1805_v55, %v3454_v45  ;;  %v1592_v44 = vsel %vm842_vm0, %v1577_v49, %v3238_v16 }
 0x15c   : > { %4860 = vst [vmem:[#allocation18_spill] sm:$0xff] %v3458_v42  ;;  %v1776_v12 = vsel %vm684_vm1, %v1774_v63, %v1775_v51  ;;  %v1759_v43 = vadd.f32 %v1751_v39, %v1743_v61  ;;  %v3464_v30 = vadd.f32 %v1775_v51, %v1757_v34  ;;  %v1840_v7 = vrot.slane %v1824_v29, 4 }
 0x15d   : > { %v1792_v13 = vadd.f32 %v1776_v12, %v1756_v41  ;;  %v1790_v60 = vadd.f32 %v1773_v50, %v1754_v4  ;;  %v3473_v38 = vadd.f32 %v1772_v40, %v1755_v62  ;;  %v1777_v34 = vrot.slane %v1758_v33, 1 }
 0x15e   : > { %v1583_v25 = vpop.permute.xlu1 %1582  ;;  %v1585_v47 = vpop.permute.xlu0 %1584  ;;  %v1778_v46 = vrot.slane %v1759_v43, 1  ;;  %v1811_v57 = vrot.slane %v3464_v30, 2  ;;  %v1841_v15 = vrot.slane %v1825_v14, 4  ;;  %v1593_v55 = vsel %vm842_vm0, %v1579_v5, %v3241_v17 }
 0x15f   : > { %v1810_v41 = vrot.slane %v1792_v13, 2  ;;  %v1594_v16 = vsel %vm842_vm0, %v1581_v53, %v3248_v18  ;;  %v1807_v61 = vrot.slane %v1790_v60, 2  ;;  %v1808_v40 = vrot.slane %v3473_v38, 2 }
 0x160   : > { %v1779_v51 = vsel %vm684_vm1, %v1777_v34, %v1778_v46  ;;  %v1842_v39 = vsel %vm805_vm3, %v1840_v7, %v1841_v15  ;;  %v3486_v63 = vadd.f32 %v1811_v57, %v3464_v30  ;;  %v1595_v27 = vsel %vm842_vm0, %v1583_v25, %v3251_v19 }
 0x161   : > { %v1812_v53 = vsel %vm768_vm2, %v1810_v41, %v1811_v57  ;;  %v1596_v28 = vsel %vm842_vm0, %v1585_v47, %v3258_v20  ;;  %v3499_v12 = vadd.f32 %v1779_v51, %v1758_v33  ;;  %v3506_v14 = vadd.f32 %v1778_v46, %v1759_v43 }
 0x162   : > { %v1587_v6 = vpop.permute.xlu1 %1586  ;;  %v1589_v54 = vpop.permute.xlu0 %1588  ;;  %v3508_v7 = vadd.f32 %v1842_v39, %v1824_v29  ;;  %v3510_v19 = vadd.f32 %v1812_v53, %v1792_v13  ;;  %v1809_v20 = vsel %vm768_vm2, %v1807_v61, %v1808_v40  ;;  %v3514_v25 = vadd.f32 %v1808_v40, %v3473_v38 }
 0x163   : > { %v1597_v47 = vsel %vm842_vm0, %v1587_v6, %v3261_v21  ;;  %v1598_v43 = vsel %vm842_vm0, %v1589_v54, %v3268_v22  ;;  %v1814_v21 = vrot.slane %v3506_v14, 2  ;;  %v612_v59 = vrot.slane %v595_v35, 7 }
 0x166   : > { %v3470_v58 = vpop.permute.xlu1 %1590  ;;  %v1609_v37 = vpop.permute.xlu0 %1608 }
 0x167   : > { %v3475_v52 = vsub.f32 %v1592_v44, %v1609_v37 }
 0x169   : > { %4861 = vst [vmem:[#allocation19_spill] sm:$0xff] %v3475_v52  ;;  %v2069_v17 = vand.u32 2147483647, %v3475_v52 }
 0x16a   : > { %v1611_v4 = vpop.permute.xlu1 %1610  ;;  %v1613_v62 = vpop.permute.xlu0 %1612 }
 0x16b   : > { %v3490_v5 = vsub.f32 %v1593_v55, %v1611_v4  ;;  %v3492_v18 = vsub.f32 %v1594_v16, %v1613_v62  ;;  %v2085_v33 = vrot.slane %v2069_v17, 1  ;;  %v1813_v55 = vrot.slane %v3499_v12, 2 }
 0x16d   : > { %4862 = vst [vmem:[#allocation20_spill] sm:$0xff] %v3490_v5  ;;  %4863 = vst [vmem:[#allocation21_spill] sm:$0xff] %v3492_v18  ;;  %v2070_v31 = vand.u32 2147483647, %v3490_v5  ;;  %v2071_v29 = vand.u32 2147483647, %v3492_v18 }
 0x16e   : > { %v1615_v44 = vpop.permute.xlu1 %1614  ;;  %v1617_v37 = vpop.permute.xlu0 %1616 }
 0x16f   : > { %v2086_v57 = vrot.slane %v2070_v31, 1  ;;  %v3522_v46 = vsub.f32 %v1595_v27, %v1615_v44  ;;  %v3524_v13 = vsub.f32 %v1596_v28, %v1617_v37  ;;  %v2088_v53 = vrot.slane %v2071_v29, 1 }
 0x170   : > { %v3542_v28 = vadd.f32 %v1809_v20, %v1790_v60  ;;  %v1599_v20 = vsel %vm842_vm0, %v3470_v58, %v3271_v23 }
 0x171   : > { %4864 = vst [vmem:[#allocation22_spill] sm:$0xff] %v3522_v46  ;;  %4865 = vst [vmem:[#allocation23_spill] sm:$0xff] %v3524_v13  ;;  %v2087_v41 = vsel %vm684_vm1, %v2085_v33, %v2086_v57  ;;  %v3527_v15 = vadd.f32 %v2086_v57, %v2070_v31  ;;  %v2072_v16 = vand.u32 2147483647, %v3522_v46  ;;  %v2073_v54 = vand.u32 2147483647, %v3524_v13 }
 0x172   : > { %v1619_v51 = vpop.permute.xlu1 %1618  ;;  %v1621_v4 = vpop.permute.xlu0 %1620  ;;  %v2105_v40 = vadd.f32 %v2087_v41, %v2069_v17  ;;  %v1844_v31 = vrot.slane %v3514_v25, 4  ;;  %v594_v13 = vld [vmem:[%s3235_s11 + $0x10] sm:$0xff] }
 0x173   : > { %v2122_v62 = vrot.slane %v3527_v15, 2  ;;  %v3538_v39 = vsub.f32 %v1597_v47, %v1619_v51  ;;  %v3540_v61 = vsub.f32 %v1598_v43, %v1621_v4  ;;  %v2089_v27 = vrot.slane %v2072_v16, 1 }
 0x174   : > { %v1846_v47 = vrot.slane %v3510_v19, 4  ;;  %v2121_v60 = vrot.slane %v2105_v40, 2  ;;  %v2091_v25 = vrot.slane %v2073_v54, 1  ;;  %v1815_v4 = vsel %vm768_vm2, %v1813_v55, %v1814_v21 }
 0x175   : > { %4866 = vst [vmem:[#allocation24_spill] sm:$0xff] %v3538_v39  ;;  %4867 = vst [vmem:[#allocation25_spill] sm:$0xff] %v3540_v61  ;;  %v2074_v37 = vand.u32 2147483647, %v3538_v39  ;;  %v2142_v57 = vadd.f32 %v2122_v62, %v3527_v15  ;;  %v2090_v17 = vsel %vm684_vm1, %v2088_v53, %v2089_v27  ;;  %v2108_v43 = vadd.f32 %v2089_v27, %v2072_v16 }
 0x176   : > { %v1623_v41 = vpop.permute.xlu1 %1622  ;;  %v2075_v33 = vand.u32 2147483647, %v3540_v61  ;;  %v2123_v6 = vsel %vm768_vm2, %v2121_v60, %v2122_v62  ;;  %v2107_v50 = vadd.f32 %v2090_v17, %v2071_v29  ;;  %v1843_v62 = vrot.slane %v3542_v28, 4 }
 0x177   : > { %v2092_v51 = vrot.slane %v2074_v37, 1  ;;  %v2125_v44 = vrot.slane %v2108_v43, 2  ;;  %v3558_v22 = vsub.f32 %v1599_v20, %v1623_v41  ;;  %v2141_v27 = vadd.f32 %v2123_v6, %v2105_v40 }
 0x178   : > { %v2158_v36 = vrot.slane %v2142_v57, 4  ;;  %v2124_v48 = vrot.slane %v2107_v50, 2  ;;  %v2094_v41 = vrot.slane %v2075_v33, 1  ;;  %v1831_v60 = vadd.f32 %v1814_v21, %v3506_v14 }
 0x179   : > { %4868 = vst [vmem:[#allocation26_spill] sm:$0xff] %v3558_v22  ;;  %v2093_v53 = vsel %vm684_vm1, %v2091_v25, %v2092_v51  ;;  %v2110_v16 = vadd.f32 %v2092_v51, %v2074_v37  ;;  %v2144_v49 = vadd.f32 %v2125_v44, %v2108_v43  ;;  %v2076_v58 = vand.u32 2147483647, %v3558_v22 }
 0x17a   : > { %v2157_v34 = vrot.slane %v2141_v27, 4  ;;  %v2109_v61 = vadd.f32 %v2093_v53, %v2073_v54  ;;  %v2126_v29 = vsel %vm768_vm2, %v2124_v48, %v2125_v44  ;;  %v1830_v40 = vadd.f32 %v1815_v4, %v3499_v12 }
 0x17b   : > { %v2128_v55 = vrot.slane %v2110_v16, 2  ;;  %v2095_v20 = vrot.slane %v2076_v58, 1  ;;  %v2143_v51 = vadd.f32 %v2126_v29, %v2107_v50  ;;  %v2161_v23 = vrot.slane %v2144_v49, 4 }
 0x17c   : > { %v2159_v6 = vsel %vm805_vm3, %v2157_v34, %v2158_v36  ;;  %v2127_v37 = vrot.slane %v2109_v61, 2  ;;  %v4869_v48 = vrot.slane %v3486_v63, 4  ;;  %v1845_v50 = vsel %vm805_vm3, %v1843_v62, %v1844_v31 }
 0x17d   : > { %v2096_v57 = vsel %vm684_vm1, %v2094_v41, %v2095_v20  ;;  %v2112_v17 = vadd.f32 %v2095_v20, %v2076_v58  ;;  %v2173_v25 = vadd.f32 %v2159_v6, %v2141_v27  ;;  %v2146_v54 = vadd.f32 %v2128_v55, %v2110_v16 }
 0x17e   : > { %v2129_v53 = vsel %vm768_vm2, %v2127_v37, %v2128_v55  ;;  %v2111_v22 = vadd.f32 %v2096_v57, %v2075_v33  ;;  %v2160_v36 = vrot.slane %v2143_v51, 4  ;;  %v1848_v12 = vsel %vm805_vm3, %v1846_v47, %v4869_v48 }
 0x17f   : > { %v2131_v42 = vrot.slane %v2112_v17, 2  ;;  %v3573_v21 = vadd.f32 %v2173_v25, %v3527_v15  ;;  %v2145_v34 = vadd.f32 %v2129_v53, %v2109_v61  ;;  %v1849_v33 = vrot.slane %v1830_v40, 4 }
 0x180   : > { %v2130_v44 = vrot.slane %v2111_v22, 2  ;;  %v2162_v49 = vsel %vm805_vm3, %v2160_v36, %v2161_v23  ;;  %v2164_v27 = vrot.slane %v2146_v54, 4  ;;  %v3584_v15 = vadd.f32 %v3508_v7, %v3454_v45 }
 0x181   : > { %2185 = vrot.lane.b32.xlu0 %v3573_v21, %s2970_s10  ;;  %v2163_v4 = vrot.slane %v2145_v34, 4  ;;  %v2174_v61 = vadd.f32 %v2162_v49, %v2143_v51  ;;  %v2148_v47 = vadd.f32 %v2131_v42, %v2112_v17  ;;  %v1858_v58 = vadd.f32 %v1848_v12, %v3510_v19 }
 0x182   : > { %v2132_v63 = vsel %vm768_vm2, %v2130_v44, %v2131_v42  ;;  %v1850_v55 = vrot.slane %v1831_v60, 4  ;;  %v1857_v23 = vadd.f32 %v1845_v50, %v3542_v28  ;;  %v520_v51 = vrot.slane %v3155_v0, 7 }
 0x183   : > { %v2147_v41 = vadd.f32 %v2132_v63, %v2111_v22  ;;  %v3588_v20 = vadd.f32 %v2174_v61, %v2108_v43  ;;  %v2165_v31 = vsel %vm805_vm3, %v2163_v4, %v2164_v27  ;;  %v2167_v42 = vrot.slane %v2148_v47, 4 }
 0x184   : > { %v1851_v45 = vsel %vm805_vm3, %v1849_v33, %v1850_v55  ;;  %v3598_v19 = vadd.f32 %v1858_v58, %v3464_v30  ;;  %v2175_v22 = vadd.f32 %v2165_v31, %v2145_v34  ;;  %v3601_v43 = vadd.f32 %v1857_v23, %v3473_v38  ;;  %v507_v58 = vld [vmem:[%s3139_s15 + $0x20] sm:$0xff] }
 0x185   : > { %1868 = vrot.lane.b32.xlu0 %v3584_v15, %s2970_s10  ;;  %v2166_v7 = vrot.slane %v2147_v41, 4  ;;  %2187 = vrot.lane.b32.xlu1 %v3588_v20, %s2970_s10  ;;  %v1859_v28 = vadd.f32 %v1851_v45, %v1830_v40  ;;  %v521_v54 = vrot.slane %v3165_v2, 7  ;;  %v564_v53 = vrot.slane %v3195_v8, 7 }
 0x186   : > { %v3608_v60 = vadd.f32 %v2175_v22, %v2110_v16  ;;  %v565_v36 = vrot.slane %v3198_v9, 7  ;;  %v523_v12 = vrot.slane %v3158_v1, 7  ;;  %v3661_v44 = vsub.f32 %v3155_v0, %v520_v51 }
 0x187   : > { %v2168_v62 = vsel %vm805_vm3, %v2166_v7, %v2167_v42  ;;  %v3611_v6 = vadd.f32 %v1859_v28, %v3506_v14  ;;  %v522_v34 = vsel %vm519_vm4, %v520_v51, %v521_v54  ;;  %v524_v49 = vrot.slane %v3168_v3, 7  ;;  %v552_v7 = vld [vmem:[%s3148_s17 + $0x20] sm:$0xff]  ;;  %v553_v42 = vld [vmem:[%s3148_s17 + $0x28] sm:$0xff]  ;;  %v510_v51 = vld [vmem:[%s3139_s15 + $0x38] sm:$0xff] }
 0x188   : > { %v2176_v30 = vadd.f32 %v2168_v62, %v2147_v41  ;;  %v566_v48 = vsel %vm519_vm4, %v564_v53, %v565_v36  ;;  %v567_v50 = vrot.slane %v3205_v10, 7  ;;  %v568_v33 = vrot.slane %v3208_v11, 7 }
 0x189   : > { %1872 = vrot.lane.b32.xlu0 %v3598_v19, %s2970_s10  ;;  %1870 = vrot.lane.b32.xlu1 %v3601_v43, %s2970_s10  ;;  %v3667_v4 = vsub.f32 %v3165_v2, %v522_v34  ;;  %v3670_v27 = vsub.f32 %v3195_v8, %v564_v53  ;;  %v3673_v61 = vsub.f32 %v3198_v9, %v566_v48  ;;  %v700_v0 = vand.u32 2147483647, %v3661_v44  ;;  %v508_v9 = vld [vmem:[%s3139_s15 + $0x28] sm:$0xff]  ;;  %v555_v34 = vld [vmem:[%s3148_s17 + $0x38] sm:$0xff] }
 0x18a   : > { %v3617_v38 = vadd.f32 %v2176_v30, %v2112_v17  ;;  %v525_v63 = vsel %vm519_vm4, %v523_v12, %v524_v49  ;;  %v569_v47 = vsel %vm519_vm4, %v567_v50, %v568_v33  ;;  %v3683_v8 = vsub.f32 %v3158_v1, %v523_v12  ;;  %v509_v1 = vld [vmem:[%s3139_s15 + $0x30] sm:$0xff]  ;;  %s4702_s15 = scalar_lea.vmem %s4783_s3, %s4696_s1 }
 0x18b   : > { %4870 = vst [vmem:[#allocation27_spill] sm:$0xff] %v3667_v4  ;;  %4871 = vst [vmem:[#allocation28_spill] sm:$0xff] %v3673_v61  ;;  %v701_v55 = vand.u32 2147483647, %v3667_v4  ;;  %v708_v2 = vand.u32 2147483647, %v3670_v27  ;;  %v3687_v23 = vsub.f32 %v3168_v3, %v525_v63  ;;  %v3690_v31 = vsub.f32 %v3205_v10, %v567_v50 }
 0x18c   : > { %v709_v41 = vand.u32 2147483647, %v3673_v61  ;;  %v3693_v45 = vsub.f32 %v3208_v11, %v569_v47  ;;  %v526_v22 = vrot.slane %v507_v58, 7  ;;  %v527_v30 = vrot.slane %v508_v9, 7  ;;  %v554_v3 = vld [vmem:[%s3148_s17 + $0x30] sm:$0xff] }
 0x18d   : > { %2189 = vrot.lane.b32.xlu0 %v3608_v60, %s2970_s10  ;;  %1874 = vrot.lane.b32.xlu1 %v3611_v6, %s2970_s10  ;;  %4872 = vst [vmem:[#allocation29_spill] sm:$0xff] %v3687_v23  ;;  %v716_v28 = vadd.f32 %v708_v2, %v700_v0  ;;  %v702_v54 = vand.u32 2147483647, %v3683_v8  ;;  %v570_v53 = vrot.slane %v552_v7, 7  ;;  %v571_v36 = vrot.slane %v553_v42, 7 }
 0x18e   : > { %4873 = vst [vmem:[#allocation30_spill] sm:$0xff] %v3693_v45  ;;  %v717_v62 = vadd.f32 %v709_v41, %v701_v55  ;;  %v703_v10 = vand.u32 2147483647, %v3687_v23  ;;  %v710_v11 = vand.u32 2147483647, %v3690_v31  ;;  %v3705_v12 = vsub.f32 %v507_v58, %v526_v22  ;;  %v592_v58 = vld [vmem:[%s3235_s11] sm:$0xff] }
 0x18f   : > { %v711_v48 = vand.u32 2147483647, %v3693_v45  ;;  %v732_v49 = vrot.slane %v716_v28, 1  ;;  %v528_v33 = vsel %vm519_vm4, %v526_v22, %v527_v30  ;;  %v529_v0 = vrot.slane %v509_v1, 7  ;;  %v593_v45 = vld [vmem:[%s3235_s11 + $0x8] sm:$0xff] }
 0x190   : > { %4874 = vst [vmem:[#allocation31_spill] sm:$0xff] %v3705_v12  ;;  %v733_v50 = vrot.slane %v717_v62, 1  ;;  %v572_v63 = vsel %vm519_vm4, %v570_v53, %v571_v36  ;;  %v530_v47 = vrot.slane %v510_v51, 7  ;;  %v573_v55 = vrot.slane %v554_v3, 7 }
 0x191   : > { %2191 = vrot.lane.b32.xlu1 %v3617_v38, %s2970_s10  ;;  %v574_v2 = vrot.slane %v555_v34, 7  ;;  %v718_v41 = vadd.f32 %v710_v11, %v702_v54  ;;  %v719_v23 = vadd.f32 %v711_v48, %v703_v10  ;;  %v3709_v61 = vsub.f32 %v508_v9, %v528_v33  ;;  %v596_v33 = vld [vmem:[%s3235_s11 + $0x20] sm:$0xff] }
 0x192   : > { %v3711_v4 = vsub.f32 %v552_v7, %v570_v53  ;;  %v3715_v39 = vsub.f32 %v553_v42, %v572_v63  ;;  %v734_v22 = vsel %vm684_vm1, %v732_v49, %v733_v50  ;;  %v704_v30 = vand.u32 2147483647, %v3705_v12  ;;  %v597_v49 = vld [vmem:[%s3235_s11 + $0x28] sm:$0xff] }
 0x193   : > { %4875 = vst [vmem:[#allocation32_spill] sm:$0xff] %v3709_v61  ;;  %v531_v36 = vsel %vm519_vm4, %v529_v0, %v530_v47  ;;  %v575_v54 = vsel %vm519_vm4, %v573_v55, %v574_v2  ;;  %v735_v9 = vrot.slane %v718_v41, 1  ;;  %v736_v10 = vrot.slane %v719_v23, 1 }
 0x194   : > { %4876 = vst [vmem:[#allocation33_spill] sm:$0xff] %v3711_v4  ;;  %4877 = vst [vmem:[#allocation34_spill] sm:$0xff] %v3715_v39  ;;  %v608_v11 = vrot.slane %v592_v58, 7  ;;  %v609_v7 = vrot.slane %v593_v45, 7  ;;  %v705_v53 = vand.u32 2147483647, %v3709_v61  ;;  %v3723_v42 = vsub.f32 %v509_v1, %v529_v0 }
 0x195   : > { %v712_v48 = vand.u32 2147483647, %v3711_v4  ;;  %v713_v63 = vand.u32 2147483647, %v3715_v39  ;;  %v3728_v32 = vsub.f32 %v510_v51, %v531_v36  ;;  %v3730_v47 = vsub.f32 %v554_v3, %v573_v55  ;;  %v598_v3 = vld [vmem:[%s3235_s11 + $0x30] sm:$0xff]  ;;  %v599_v55 = vld [vmem:[%s3235_s11 + $0x38] sm:$0xff] }
 0x196   : > { %4878 = vst [vmem:[#allocation35_spill] sm:$0xff] %v3723_v42  ;;  %v3732_v2 = vsub.f32 %v555_v34, %v575_v54  ;;  %v752_v46 = vadd.f32 %v734_v22, %v716_v28  ;;  %v3736_v61 = vadd.f32 %v733_v50, %v717_v62  ;;  %v737_v1 = vsel %vm684_vm1, %v735_v9, %v736_v10 }
 0x197   : > { %4879 = vst [vmem:[#allocation36_spill] sm:$0xff] %v3728_v32  ;;  %4880 = vst [vmem:[#allocation37_spill] sm:$0xff] %v3730_v47  ;;  %v610_v0 = vsel %vm519_vm4, %v608_v11, %v609_v7  ;;  %v614_v26 = vrot.slane %v596_v33, 7  ;;  %v615_v18 = vrot.slane %v597_v49, 7  ;;  %v720_v39 = vadd.f32 %v712_v48, %v704_v30 }
 0x198   : > { %4881 = vst [vmem:[#allocation38_spill] sm:$0xff] %v3732_v2  ;;  %v706_v51 = vand.u32 2147483647, %v3723_v42  ;;  %v611_v36 = vrot.slane %v594_v13, 7  ;;  %v721_v34 = vadd.f32 %v713_v63, %v705_v53  ;;  %v707_v54 = vand.u32 2147483647, %v3728_v32 }
 0x199   : > { %v714_v28 = vand.u32 2147483647, %v3730_v47  ;;  %v715_v62 = vand.u32 2147483647, %v3732_v2  ;;  %v3746_v50 = vsub.f32 %v592_v58, %v608_v11  ;;  %v3748_v22 = vsub.f32 %v593_v45, %v610_v0 }
 0x19a   : > { %v769_v9 = vrot.slane %v752_v46, 2  ;;  %v770_v30 = vrot.slane %v3736_v61, 2  ;;  %v3751_v7 = vadd.f32 %v736_v10, %v719_v23  ;;  %v616_v48 = vsel %vm519_vm4, %v614_v26, %v615_v18 }
 0x19b   : > { %4882 = vst [vmem:[#allocation39_spill] sm:$0xff] %v3746_v50  ;;  %4883 = vst [vmem:[#allocation40_spill] sm:$0xff] %v3748_v22  ;;  %v754_v5 = vadd.f32 %v737_v1, %v718_v41  ;;  %v613_v53 = vsel %vm519_vm4, %v611_v36, %v612_v59  ;;  %v617_v63 = vrot.slane %v598_v3, 7  ;;  %v618_v32 = vrot.slane %v599_v55, 7 }
 0x19c   : > { %v738_v56 = vrot.slane %v720_v39, 1  ;;  %v739_v52 = vrot.slane %v721_v34, 1  ;;  %v722_v24 = vadd.f32 %v714_v28, %v706_v51  ;;  %v723_v2 = vadd.f32 %v715_v62, %v707_v54 }
 0x19d   : > { %v1036_v58 = vand.u32 2147483647, %v3746_v50  ;;  %v1037_v45 = vand.u32 2147483647, %v3748_v22  ;;  %v3757_v11 = vsub.f32 %v596_v33, %v614_v26  ;;  %v3759_v0 = vsub.f32 %v597_v49, %v616_v48 }
 0x19e   : > { %v3761_v23 = vsub.f32 %v594_v13, %v611_v36  ;;  %v3763_v18 = vsub.f32 %v595_v35, %v613_v53  ;;  %v771_v59 = vsel %vm768_vm2, %v769_v9, %v770_v30  ;;  %v772_v41 = vrot.slane %v754_v5, 2 }
 0x19f   : > { %4884 = vst [vmem:[#allocation41_spill] sm:$0xff] %v3757_v11  ;;  %4885 = vst [vmem:[#allocation42_spill] sm:$0xff] %v3759_v0  ;;  %v773_v10 = vrot.slane %v3751_v7, 2  ;;  %v619_v1 = vsel %vm519_vm4, %v617_v63, %v618_v32  ;;  %v740_v51 = vsel %vm684_vm1, %v738_v56, %v739_v52  ;;  %v3769_v54 = vadd.f32 %v739_v52, %v721_v34 }
 0x1a0   : > { %4886 = vst [vmem:[#allocation43_spill] sm:$0xff] %v3761_v23  ;;  %4887 = vst [vmem:[#allocation44_spill] sm:$0xff] %v3763_v18  ;;  %v741_v28 = vrot.slane %v722_v24, 1  ;;  %v742_v26 = vrot.slane %v723_v2, 1  ;;  %v1052_v33 = vrot.slane %v1036_v58, 1  ;;  %v1053_v49 = vrot.slane %v1037_v45, 1 }
 0x1a1   : > { %v1040_v13 = vand.u32 2147483647, %v3757_v11  ;;  %v1041_v35 = vand.u32 2147483647, %v3759_v0  ;;  %v1038_v36 = vand.u32 2147483647, %v3761_v23  ;;  %v3775_v9 = vsub.f32 %v598_v3, %v617_v63 }
 0x1a2   : > { %v1039_v62 = vand.u32 2147483647, %v3763_v18  ;;  %v3777_v48 = vsub.f32 %v599_v55, %v619_v1  ;;  %v756_v32 = vadd.f32 %v740_v51, %v720_v39  ;;  %v789_v56 = vadd.f32 %v771_v59, %v752_v46 }
 0x1a3   : > { %4888 = vst [vmem:[#allocation45_spill] sm:$0xff] %v3775_v9  ;;  %v790_v52 = vadd.f32 %v770_v30, %v3736_v61  ;;  %v774_v34 = vsel %vm768_vm2, %v772_v41, %v773_v10  ;;  %v743_v53 = vsel %vm684_vm1, %v741_v28, %v742_v26  ;;  %v776_v22 = vrot.slane %v3769_v54, 2 }
 0x1a4   : > { %4889 = vst [vmem:[#allocation46_spill] sm:$0xff] %v3777_v48  ;;  %v1054_v0 = vsel %vm684_vm1, %v1052_v33, %v1053_v49  ;;  %v1058_v11 = vrot.slane %v1040_v13, 1  ;;  %v1059_v47 = vrot.slane %v1041_v35, 1  ;;  %v1055_v42 = vrot.slane %v1038_v36, 1 }
 0x1a5   : > { %v1056_v18 = vrot.slane %v1039_v62, 1  ;;  %v1042_v3 = vand.u32 2147483647, %v3775_v9  ;;  %v1043_v55 = vand.u32 2147483647, %v3777_v48  ;;  %v775_v39 = vrot.slane %v756_v32, 2 }
 0x1a6   : > { %v758_v46 = vadd.f32 %v743_v53, %v722_v24  ;;  %v3786_v63 = vadd.f32 %v742_v26, %v723_v2  ;;  %v3788_v30 = vadd.f32 %v1053_v49, %v1037_v45  ;;  %v1072_v59 = vadd.f32 %v1054_v0, %v1036_v58 }
 0x1a7   : > { %v806_v41 = vrot.slane %v789_v56, 4  ;;  %v807_v1 = vrot.slane %v790_v52, 4  ;;  %v792_v51 = vadd.f32 %v773_v10, %v3751_v7  ;;  %v1060_v28 = vsel %vm684_vm1, %v1058_v11, %v1059_v47 }
 0x1a8   : > { %v3792_v33 = vadd.f32 %v774_v34, %v754_v5  ;;  %v1057_v23 = vsel %vm684_vm1, %v1055_v42, %v1056_v18  ;;  %v1061_v9 = vrot.slane %v1042_v3, 1  ;;  %v1062_v50 = vrot.slane %v1043_v55, 1 }
 0x1a9   : > { %v777_v48 = vsel %vm768_vm2, %v775_v39, %v776_v22  ;;  %v778_v24 = vrot.slane %v758_v46, 2  ;;  %v779_v2 = vrot.slane %v3786_v63, 2  ;;  %v1089_v45 = vrot.slane %v3788_v30, 2 }
 0x1aa   : > { %v1088_v58 = vrot.slane %v1072_v59, 2  ;;  %v3798_v0 = vadd.f32 %v1056_v18, %v1039_v62  ;;  %v1076_v26 = vadd.f32 %v1060_v28, %v1040_v13  ;;  %v3800_v10 = vadd.f32 %v1059_v47, %v1041_v35 }
 0x1ab   : > { %v1074_v11 = vadd.f32 %v1057_v23, %v1038_v36  ;;  %v793_v5 = vadd.f32 %v777_v48, %v756_v32  ;;  %v794_v49 = vadd.f32 %v776_v22, %v3769_v54  ;;  %v1063_v42 = vsel %vm684_vm1, %v1061_v9, %v1062_v50 }
 0x1ac   : > { %v808_v52 = vsel %vm805_vm3, %v806_v41, %v807_v1  ;;  %v809_v34 = vrot.slane %v3792_v33, 4  ;;  %v810_v53 = vrot.slane %v792_v51, 4  ;;  %v780_v39 = vsel %vm768_vm2, %v778_v24, %v779_v2 }
 0x1ad   : > { %v1090_v18 = vsel %vm768_vm2, %v1088_v58, %v1089_v45  ;;  %v1092_v13 = vrot.slane %v3798_v0, 2  ;;  %v1094_v47 = vrot.slane %v1076_v26, 2  ;;  %v1095_v23 = vrot.slane %v3800_v10, 2 }
 0x1ae   : > { %v1091_v35 = vrot.slane %v1074_v11, 2  ;;  %v1078_v36 = vadd.f32 %v1063_v42, %v1042_v3  ;;  %v3812_v62 = vadd.f32 %v1062_v50, %v1043_v55  ;;  %v812_v9 = vrot.slane %v793_v5, 4 }
 0x1af   : > { %v813_v48 = vrot.slane %v794_v49, 4  ;;  %v795_v32 = vadd.f32 %v780_v39, %v758_v46  ;;  %v796_v41 = vadd.f32 %v779_v2, %v3786_v63  ;;  %v1108_v1 = vadd.f32 %v1090_v18, %v1072_v59 }
 0x1b0   : > { %v1109_v51 = vadd.f32 %v1089_v45, %v3788_v30  ;;  %v822_v24 = vadd.f32 %v808_v52, %v789_v56  ;;  %v811_v58 = vsel %vm805_vm3, %v809_v34, %v810_v53  ;;  %v1093_v3 = vsel %vm768_vm2, %v1091_v35, %v1092_v13 }
 0x1b1   : > { %v1097_v55 = vrot.slane %v1078_v36, 2  ;;  %v1098_v46 = vrot.slane %v3812_v62, 2  ;;  %v814_v56 = vsel %vm805_vm3, %v812_v9, %v813_v48  ;;  %v815_v2 = vrot.slane %v795_v32, 4 }
 0x1b2   : > { %v816_v45 = vrot.slane %v796_v41, 4  ;;  %v1124_v49 = vrot.slane %v1108_v1, 4  ;;  %v1125_v42 = vrot.slane %v1109_v51, 4  ;;  %v1113_v34 = vadd.f32 %v1095_v23, %v3800_v10 }
 0x1b3   : > { %v1110_v39 = vadd.f32 %v1093_v3, %v1074_v11  ;;  %v1111_v18 = vadd.f32 %v1092_v13, %v3798_v0  ;;  %v3837_v9 = vadd.f32 %v822_v24, %v3736_v61  ;;  %v1115_v3 = vadd.f32 %v1098_v46, %v3812_v62 }
 0x1b4   : > { %v817_v11 = vsel %vm805_vm3, %v815_v2, %v816_v45  ;;  %v1126_v13 = vsel %vm805_vm3, %v1124_v49, %v1125_v42  ;;  %v1131_v41 = vrot.slane %v1113_v34, 4 }
 0x1b5   : > { %v1134_v45 = vrot.slane %v1115_v3, 4 }
 0x1f3   : > { %v3621_v29 = vpop.permute.xlu0 %2185 }
 0x1f4   : > { %2197 = vrot.lane.b32.xlu0 %v3621_v29, %s2968_s30 }
 0x1f7   : > { %v3625_v16 = vpop.permute.xlu0 %1868  ;;  %v3627_v14 = vpop.permute.xlu1 %2187 }
 0x1f8   : > { %1880 = vrot.lane.b32.xlu0 %v3625_v16, %s2968_s30  ;;  %2200 = vrot.lane.b32.xlu1 %v3627_v14, %s2968_s30 }
 0x1fb   : > { %v3633_v40 = vpop.permute.xlu0 %1872  ;;  %v3635_v37 = vpop.permute.xlu1 %1870 }
 0x1fc   : > { %1886 = vrot.lane.b32.xlu0 %v3633_v40, %s2968_s30  ;;  %1883 = vrot.lane.b32.xlu1 %v3635_v37, %s2968_s30 }
 0x1ff   : > { %v3641_v57 = vpop.permute.xlu0 %2189  ;;  %v3643_v17 = vpop.permute.xlu1 %1874 }
 0x200   : > { %2203 = vrot.lane.b32.xlu0 %v3641_v57, %s2968_s30  ;;  %1889 = vrot.lane.b32.xlu1 %v3643_v17, %s2968_s30 }
 0x203   : > { %v3649_v25 = vpop.permute.xlu1 %2191 }
 0x204   : > { %2206 = vrot.lane.b32.xlu1 %v3649_v25, %s2968_s30 }
 0x266   : > { %v2198_v4 = vpop.permute.xlu0 %2197 }
 0x267   : > { %v2199_v22 = vsel %vm842_vm0, %v2198_v4, %v3621_v29  ;;  %v1096_v4 = vsel %vm768_vm2, %v1094_v47, %v1095_v23  ;;  %v824_v23 = vadd.f32 %v814_v56, %v793_v5  ;;  %v3850_v5 = vrot.slane %v3837_v9, 1 }
 0x268   : > { %2209 = vrot.lane.b32.xlu0 %v2199_v22, %s2968_s30  ;;  %v1112_v52 = vadd.f32 %v1096_v4, %v1076_v26  ;;  %v1099_v22 = vsel %vm768_vm2, %v1097_v55, %v1098_v46  ;;  %v823_v26 = vadd.f32 %v811_v58, %v3792_v33  ;;  %v1128_v4 = vrot.slane %v1111_v18, 4 }
 0x269   : > { %v3853_v24 = vadd.f32 %v824_v23, %v3769_v54  ;;  %v1140_v58 = vadd.f32 %v1126_v13, %v1108_v1  ;;  %v825_v46 = vadd.f32 %v817_v11, %v795_v32 }
 0x26a   : > { %v1881_v28 = vpop.permute.xlu0 %1880  ;;  %v2201_v12 = vpop.permute.xlu1 %2200  ;;  %v1130_v48 = vrot.slane %v1112_v52, 4 }
 0x26b   : > { %v1882_v50 = vsel %vm842_vm0, %v1881_v28, %v3625_v16  ;;  %v2202_v59 = vsel %vm842_vm0, %v2201_v12, %v3627_v14  ;;  %v1127_v28 = vrot.slane %v1110_v39, 4  ;;  %v3866_v54 = vrot.slane %v3853_v24, 1 }
 0x26c   : > { %1892 = vrot.lane.b32.xlu0 %v1882_v50, %s2968_s30  ;;  %2211 = vrot.lane.b32.xlu1 %v2202_v59, %s2968_s30  ;;  %v1114_v50 = vadd.f32 %v1099_v22, %v1078_v36  ;;  %v3857_v36 = vadd.f32 %v823_v26, %v3751_v7  ;;  %v1132_v59 = vsel %vm805_vm3, %v1130_v48, %v1131_v41 }
 0x26d   : > { %v1129_v56 = vsel %vm805_vm3, %v1127_v28, %v1128_v4  ;;  %v3869_v7 = vadd.f32 %v1140_v58, %v3788_v30  ;;  %v1142_v32 = vadd.f32 %v1132_v59, %v1112_v52  ;;  %v3876_v34 = vadd.f32 %v825_v46, %v3786_v63 }
 0x26e   : > { %v1887_v53 = vpop.permute.xlu0 %1886  ;;  %v1884_v47 = vpop.permute.xlu1 %1883  ;;  %v1133_v2 = vrot.slane %v1114_v50, 4  ;;  %v3873_v1 = vrot.slane %v3857_v36, 1 }
 0x26f   : > { %v1888_v12 = vsel %vm842_vm0, %v1887_v53, %v3633_v40  ;;  %v1885_v35 = vsel %vm842_vm0, %v1884_v47, %v3635_v37  ;;  %v1141_v53 = vadd.f32 %v1129_v56, %v1110_v39  ;;  %v3882_v47 = vrot.slane %v3869_v7, 1 }
 0x270   : > { %1896 = vrot.lane.b32.xlu0 %v1888_v12, %s2968_s30  ;;  %1894 = vrot.lane.b32.xlu1 %v1885_v35, %s2968_s30  ;;  %v1135_v18 = vsel %vm805_vm3, %v1133_v2, %v1134_v45  ;;  %v3885_v30 = vadd.f32 %v1142_v32, %v3800_v10  ;;  %v3890_v52 = vrot.slane %v3876_v34, 1 }
 0x271   : > { %v3893_v63 = vadd.f32 %v1141_v53, %v3798_v0  ;;  %v1143_v39 = vadd.f32 %v1135_v18, %v1114_v50 }
 0x272   : > { %v2204_v51 = vpop.permute.xlu0 %2203  ;;  %v1890_v55 = vpop.permute.xlu1 %1889  ;;  %v3898_v12 = vrot.slane %v3885_v30, 1 }
 0x273   : > { %v2205_v61 = vsel %vm842_vm0, %v2204_v51, %v3641_v57  ;;  %v1891_v33 = vsel %vm842_vm0, %v1890_v55, %v3643_v17  ;;  %v3903_v10 = vrot.slane %v3893_v63, 1  ;;  %v3906_v22 = vadd.f32 %v1143_v39, %v3812_v62 }
 0x274   : > { %2213 = vrot.lane.b32.xlu0 %v2205_v61, %s2968_s30  ;;  %1898 = vrot.lane.b32.xlu1 %v1891_v33, %s2968_s30 }
 0x275   : > { %v3913_v0 = vrot.slane %v3906_v22, 1 }
 0x276   : > { %v2207_v49 = vpop.permute.xlu1 %2206 }
 0x277   : > { %v2208_v42 = vsel %vm842_vm0, %v2207_v49, %v3649_v25 }
 0x278   : > { %843 = vrot.lane.b32.xlu0 %v3850_v5, %s2968_s30  ;;  %2215 = vrot.lane.b32.xlu1 %v2208_v42, %s2968_s30 }
 0x27c   : > { %849 = vrot.lane.b32.xlu0 %v3866_v54, %s2968_s30  ;;  %846 = vrot.lane.b32.xlu1 %v3873_v1, %s2968_s30 }
 0x280   : > { %1160 = vrot.lane.b32.xlu0 %v3882_v47, %s2968_s30  ;;  %852 = vrot.lane.b32.xlu1 %v3890_v52, %s2968_s30 }
 0x284   : > { %1166 = vrot.lane.b32.xlu0 %v3898_v12, %s2968_s30  ;;  %1163 = vrot.lane.b32.xlu1 %v3903_v10, %s2968_s30 }
 0x288   : > { %1169 = vrot.lane.b32.xlu1 %v3913_v0, %s2968_s30 }
 0x2da   : > { %v2210_v35 = vpop.permute.xlu0 %2209 }
 0x2db   : > { %v2217_v26 = vsel %vm842_vm0, %v2210_v35, %v3621_v29 }
 0x2dc   : > { %v3920_v23 = vadd.f32 %v2217_v26, %v3573_v21 }
 0x2de   : > { %v1893_v62 = vpop.permute.xlu0 %1892  ;;  %2229 = vrot.lane.b32.xlu0 %v3920_v23, %s2970_s10  ;;  %v2212_v11 = vpop.permute.xlu1 %2211 }
 0x2df   : > { %v1900_v13 = vsel %vm842_vm0, %v1893_v62, %v3625_v16  ;;  %v2218_v48 = vsel %vm842_vm0, %v2212_v11, %v3627_v14 }
 0x2e0   : > { %v3929_v41 = vadd.f32 %v1900_v13, %v3584_v15  ;;  %v3932_v51 = vadd.f32 %v2218_v48, %v3588_v20 }
 0x2e2   : > { %v1897_v29 = vpop.permute.xlu0 %1896  ;;  %1912 = vrot.lane.b32.xlu0 %v3929_v41, %s2970_s10  ;;  %v1895_v21 = vpop.permute.xlu1 %1894  ;;  %2231 = vrot.lane.b32.xlu1 %v3932_v51, %s2970_s10 }
 0x2e3   : > { %v1902_v28 = vsel %vm842_vm0, %v1897_v29, %v3633_v40  ;;  %v1901_v16 = vsel %vm842_vm0, %v1895_v21, %v3635_v37 }
 0x2e4   : > { %v3943_v15 = vadd.f32 %v1902_v28, %v3598_v19  ;;  %v3946_v20 = vadd.f32 %v1901_v16, %v3601_v43 }
 0x2e6   : > { %v2214_v14 = vpop.permute.xlu0 %2213  ;;  %1916 = vrot.lane.b32.xlu0 %v3943_v15, %s2970_s10  ;;  %v1899_v4 = vpop.permute.xlu1 %1898  ;;  %1914 = vrot.lane.b32.xlu1 %v3946_v20, %s2970_s10 }
 0x2e7   : > { %v2219_v40 = vsel %vm842_vm0, %v2214_v14, %v3641_v57  ;;  %v1903_v37 = vsel %vm842_vm0, %v1899_v4, %v3643_v17 }
 0x2e8   : > { %v3957_v19 = vadd.f32 %v2219_v40, %v3608_v60  ;;  %v3960_v43 = vadd.f32 %v1903_v37, %v3611_v6 }
 0x2ea   : > { %2233 = vrot.lane.b32.xlu0 %v3957_v19, %s2970_s10  ;;  %v844_v50 = vpop.permute.xlu0 %843  ;;  %v2216_v3 = vpop.permute.xlu1 %2215  ;;  %1918 = vrot.lane.b32.xlu1 %v3960_v43, %s2970_s10 }
 0x2eb   : > { %v845_v57 = vsel %vm842_vm0, %v844_v50, %v3850_v5  ;;  %v2220_v17 = vsel %vm842_vm0, %v2216_v3, %v3649_v25 }
 0x2ec   : > { %v3971_v60 = vadd.f32 %v2220_v17, %v3617_v38 }
 0x2ee   : > { %855 = vrot.lane.b32.xlu0 %v845_v57, %s2968_s30  ;;  %v850_v6 = vpop.permute.xlu0 %849  ;;  %2235 = vrot.lane.b32.xlu1 %v3971_v60, %s2970_s10  ;;  %v847_v55 = vpop.permute.xlu1 %846 }
 0x2ef   : > { %v851_v61 = vsel %vm842_vm0, %v850_v6, %v3866_v54  ;;  %v848_v33 = vsel %vm842_vm0, %v847_v55, %v3873_v1 }
 0x2f2   : > { %859 = vrot.lane.b32.xlu0 %v851_v61, %s2968_s30  ;;  %v1161_v58 = vpop.permute.xlu0 %1160  ;;  %857 = vrot.lane.b32.xlu1 %v848_v33, %s2968_s30  ;;  %v853_v38 = vpop.permute.xlu1 %852 }
 0x2f3   : > { %v1162_v25 = vsel %vm842_vm0, %v1161_v58, %v3882_v47  ;;  %v854_v46 = vsel %vm842_vm0, %v853_v38, %v3890_v52 }
 0x2f6   : > { %1172 = vrot.lane.b32.xlu0 %v1162_v25, %s2968_s30  ;;  %v1167_v59 = vpop.permute.xlu0 %1166  ;;  %861 = vrot.lane.b32.xlu1 %v854_v46, %s2968_s30  ;;  %v1164_v56 = vpop.permute.xlu1 %1163 }
 0x2f7   : > { %v1168_v2 = vsel %vm842_vm0, %v1167_v59, %v3898_v12  ;;  %v1165_v45 = vsel %vm842_vm0, %v1164_v56, %v3903_v10 }
 0x2fa   : > { %1176 = vrot.lane.b32.xlu0 %v1168_v2, %s2968_s30  ;;  %1174 = vrot.lane.b32.xlu1 %v1165_v45, %s2968_s30  ;;  %v1170_v49 = vpop.permute.xlu1 %1169 }
 0x2fb   : > { %v1171_v42 = vsel %vm842_vm0, %v1170_v49, %v3913_v0 }
 0x2fe   : > { %1178 = vrot.lane.b32.xlu1 %v1171_v42, %s2968_s30 }
 0x350   : > { %v3997_v32 = vpop.permute.xlu0 %2229 }
 0x351   : > { %2241 = vrot.lane.b32.xlu0 %v3997_v32, %s2968_s30 }
 0x354   : > { %v4001_v53 = vpop.permute.xlu0 %1912  ;;  %v4003_v18 = vpop.permute.xlu1 %2231 }
 0x355   : > { %1924 = vrot.lane.b32.xlu0 %v4001_v53, %s2968_s30  ;;  %2244 = vrot.lane.b32.xlu1 %v4003_v18, %s2968_s30 }
 0x358   : > { %v4009_v39 = vpop.permute.xlu0 %1916  ;;  %v4011_v35 = vpop.permute.xlu1 %1914 }
 0x359   : > { %1930 = vrot.lane.b32.xlu0 %v4009_v39, %s2968_s30  ;;  %1927 = vrot.lane.b32.xlu1 %v4011_v35, %s2968_s30 }
 0x35c   : > { %v4017_v26 = vpop.permute.xlu0 %2233  ;;  %v4019_v62 = vpop.permute.xlu1 %1918 }
 0x35d   : > { %2247 = vrot.lane.b32.xlu0 %v4017_v26, %s2968_s30  ;;  %1933 = vrot.lane.b32.xlu1 %v4019_v62, %s2968_s30 }
 0x360   : > { %v856_v11 = vpop.permute.xlu0 %855  ;;  %v4025_v13 = vpop.permute.xlu1 %2235 }
 0x361   : > { %v863_v48 = vsel %vm842_vm0, %v856_v11, %v3850_v5  ;;  %2250 = vrot.lane.b32.xlu1 %v4025_v13, %s2968_s30 }
 0x362   : > { %v871_v29 = vrot.slane %v863_v48, 7 }
 0x364   : > { %875 = vrot.lane.b32.xlu0 %v871_v29, %s2970_s10  ;;  %v860_v21 = vpop.permute.xlu0 %859  ;;  %v858_v28 = vpop.permute.xlu1 %857 }
 0x365   : > { %v865_v16 = vsel %vm842_vm0, %v860_v21, %v3866_v54  ;;  %v864_v14 = vsel %vm842_vm0, %v858_v28, %v3873_v1 }
 0x366   : > { %v873_v4 = vrot.slane %v865_v16, 7  ;;  %v872_v40 = vrot.slane %v864_v14, 7 }
 0x368   : > { %879 = vrot.lane.b32.xlu0 %v873_v4, %s2970_s10  ;;  %v1173_v37 = vpop.permute.xlu0 %1172  ;;  %877 = vrot.lane.b32.xlu1 %v872_v40, %s2970_s10  ;;  %v862_v5 = vpop.permute.xlu1 %861 }
 0x369   : > { %v1180_v50 = vsel %vm842_vm0, %v1173_v37, %v3882_v47  ;;  %v866_v3 = vsel %vm842_vm0, %v862_v5, %v3890_v52 }
 0x36a   : > { %v1188_v57 = vrot.slane %v1180_v50, 7  ;;  %v874_v17 = vrot.slane %v866_v3, 7 }
 0x36c   : > { %1192 = vrot.lane.b32.xlu0 %v1188_v57, %s2970_s10  ;;  %v1177_v54 = vpop.permute.xlu0 %1176  ;;  %881 = vrot.lane.b32.xlu1 %v874_v17, %s2970_s10  ;;  %v1175_v1 = vpop.permute.xlu1 %1174 }
 0x36d   : > { %v1182_v6 = vsel %vm842_vm0, %v1177_v54, %v3898_v12  ;;  %v1181_v55 = vsel %vm842_vm0, %v1175_v1, %v3903_v10 }
 0x36e   : > { %v1190_v61 = vrot.slane %v1182_v6, 7  ;;  %v1189_v33 = vrot.slane %v1181_v55, 7 }
 0x370   : > { %1196 = vrot.lane.b32.xlu0 %v1190_v61, %s2970_s10  ;;  %1194 = vrot.lane.b32.xlu1 %v1189_v33, %s2970_s10  ;;  %v1179_v47 = vpop.permute.xlu1 %1178 }
 0x371   : > { %v1183_v52 = vsel %vm842_vm0, %v1179_v47, %v3913_v0 }
 0x372   : > { %v1191_v58 = vrot.slane %v1183_v52, 7 }
 0x374   : > { %1198 = vrot.lane.b32.xlu1 %v1191_v58, %s2970_s10 }
 0x3c3   : > { %v2242_v38 = vpop.permute.xlu0 %2241 }
 0x3c4   : > { %v2243_v12 = vsel %vm842_vm0, %v2242_v38, %v3997_v32 }
 0x3c5   : > { %2253 = vrot.lane.b32.xlu0 %v2243_v12, %s2968_s30 }
 0x3c7   : > { %v1925_v10 = vpop.permute.xlu0 %1924  ;;  %v2245_v25 = vpop.permute.xlu1 %2244 }
 0x3c8   : > { %v2246_v46 = vsel %vm842_vm0, %v2245_v25, %v4003_v18  ;;  %v1926_v11 = vsel %vm842_vm0, %v1925_v10, %v4001_v53 }
 0x3c9   : > { %2255 = vrot.lane.b32.xlu1 %v2246_v46, %s2968_s30 }
 0x3cb   : > { %v1931_v59 = vpop.permute.xlu0 %1930  ;;  %v1928_v56 = vpop.permute.xlu1 %1927 }
 0x3cc   : > { %v1929_v0 = vsel %vm842_vm0, %v1928_v56, %v4011_v35  ;;  %v1932_v16 = vsel %vm842_vm0, %v1931_v59, %v4009_v39 }
 0x3cd   : > { %1938 = vrot.lane.b32.xlu1 %v1929_v0, %s2968_s30 }
 0x3cf   : > { %v2248_v2 = vpop.permute.xlu0 %2247  ;;  %v1934_v45 = vpop.permute.xlu1 %1933 }
 0x3d0   : > { %v2249_v49 = vsel %vm842_vm0, %v2248_v2, %v4017_v26  ;;  %v1935_v42 = vsel %vm842_vm0, %v1934_v45, %v4019_v62 }
 0x3d1   : > { %2257 = vrot.lane.b32.xlu0 %v2249_v49, %s2968_s30  ;;  %1942 = vrot.lane.b32.xlu1 %v1935_v42, %s2968_s30 }
 0x3d3   : > { %v2251_v48 = vpop.permute.xlu1 %2250 }
 0x3d4   : > { %v2252_v29 = vsel %vm842_vm0, %v2251_v48, %v4025_v13 }
 0x3d5   : > { %1936 = vrot.lane.b32.xlu0 %v1926_v11, %s2968_s30  ;;  %2259 = vrot.lane.b32.xlu1 %v2252_v29, %s2968_s30 }
 0x3d6   : > { %v876_v21 = vpop.permute.xlu0 %875 }
 0x3d7   : > { %v4075_v28 = vadd.f32 %v876_v21, %v3837_v9 }
 0x3d9   : > { %v4080_v14 = vrot.slane %v4075_v28, 1  ;;  %1940 = vrot.lane.b32.xlu0 %v1932_v16, %s2968_s30 }
 0x3da   : > { %v880_v4 = vpop.permute.xlu0 %879  ;;  %v878_v40 = vpop.permute.xlu1 %877 }
 0x3db   : > { %v4084_v37 = vadd.f32 %v880_v4, %v3853_v24  ;;  %v4087_v5 = vadd.f32 %v878_v40, %v3857_v36 }
 0x3dd   : > { %v4090_v50 = vrot.slane %v4084_v37, 1  ;;  %903 = vrot.lane.b32.xlu0 %v4080_v14, %s2968_s30  ;;  %v4095_v9 = vrot.slane %v4087_v5, 1 }
 0x3de   : > { %v1193_v3 = vpop.permute.xlu0 %1192  ;;  %v882_v57 = vpop.permute.xlu1 %881 }
 0x3df   : > { %v4098_v17 = vadd.f32 %v1193_v3, %v3869_v7  ;;  %v4101_v24 = vadd.f32 %v882_v57, %v3876_v34  ;;  %906 = vrot.lane.b32.xlu1 %v4095_v9, %s2968_s30 }
 0x3e1   : > { %v4106_v36 = vrot.slane %v4098_v17, 1  ;;  %909 = vrot.lane.b32.xlu0 %v4090_v50, %s2968_s30  ;;  %v4111_v54 = vrot.slane %v4101_v24, 1 }
 0x3e2   : > { %v1197_v1 = vpop.permute.xlu0 %1196  ;;  %v1195_v6 = vpop.permute.xlu1 %1194 }
 0x3e3   : > { %v4114_v7 = vadd.f32 %v1197_v1, %v3885_v30  ;;  %v4117_v34 = vadd.f32 %v1195_v6, %v3893_v63  ;;  %912 = vrot.lane.b32.xlu1 %v4111_v54, %s2968_s30 }
 0x3e5   : > { %v4122_v55 = vrot.slane %v4114_v7, 1  ;;  %1220 = vrot.lane.b32.xlu0 %v4106_v36, %s2968_s30  ;;  %v4127_v61 = vrot.slane %v4117_v34, 1 }
 0x3e6   : > { %v1199_v33 = vpop.permute.xlu1 %1198 }
 0x3e7   : > { %v4130_v47 = vadd.f32 %v1199_v33, %v3906_v22  ;;  %1223 = vrot.lane.b32.xlu1 %v4127_v61, %s2968_s30 }
 0x3e9   : > { %1226 = vrot.lane.b32.xlu0 %v4122_v55, %s2968_s30  ;;  %v4137_v30 = vrot.slane %v4130_v47, 1 }
 0x3eb   : > { %1229 = vrot.lane.b32.xlu1 %v4137_v30, %s2968_s30 }
 0x437   : > { %v2254_v63 = vpop.permute.xlu0 %2253 }
 0x438   : > { %v4143_v52 = vsel %vm842_vm0, %v2254_v63, %v3997_v32 }
 0x439   : > { %2269 = vrot.lane.b32.xlu0 %v4143_v52, %s2970_s10 }
 0x43b   : > { %v2256_v22 = vpop.permute.xlu1 %2255 }
 0x43c   : > { %v4149_v58 = vsel %vm842_vm0, %v2256_v22, %v4003_v18 }
 0x43d   : > { %2271 = vrot.lane.b32.xlu1 %v4149_v58, %s2970_s10 }
 0x43f   : > { %v1939_v38 = vpop.permute.xlu1 %1938 }
 0x440   : > { %v4155_v12 = vsel %vm842_vm0, %v1939_v38, %v4011_v35 }
 0x441   : > { %1954 = vrot.lane.b32.xlu1 %v4155_v12, %s2970_s10 }
 0x443   : > { %v2258_v32 = vpop.permute.xlu0 %2257  ;;  %v1943_v10 = vpop.permute.xlu1 %1942 }
 0x444   : > { %v4161_v25 = vsel %vm842_vm0, %v2258_v32, %v4017_v26  ;;  %v4165_v18 = vsel %vm842_vm0, %v1943_v10, %v4019_v62 }
 0x445   : > { %2273 = vrot.lane.b32.xlu0 %v4161_v25, %s2970_s10  ;;  %1958 = vrot.lane.b32.xlu1 %v4165_v18, %s2970_s10 }
 0x447   : > { %v1937_v35 = vpop.permute.xlu0 %1936  ;;  %v2260_v46 = vpop.permute.xlu1 %2259 }
 0x448   : > { %v4173_v59 = vsel %vm842_vm0, %v1937_v35, %v4001_v53  ;;  %v4177_v26 = vsel %vm842_vm0, %v2260_v46, %v4025_v13 }
 0x449   : > { %1952 = vrot.lane.b32.xlu0 %v4173_v59, %s2970_s10  ;;  %2275 = vrot.lane.b32.xlu1 %v4177_v26, %s2970_s10 }
 0x44b   : > { %v1941_v62 = vpop.permute.xlu0 %1940 }
 0x44c   : > { %v4185_v56 = vsel %vm842_vm0, %v1941_v62, %v4009_v39 }
 0x44d   : > { %1956 = vrot.lane.b32.xlu0 %v4185_v56, %s2970_s10 }
 0x44f   : > { %v904_v53 = vpop.permute.xlu0 %903 }
 0x450   : > { %v905_v0 = vsel %vm842_vm0, %v904_v53, %v4080_v14 }
 0x451   : > { %915 = vrot.lane.b32.xlu0 %v905_v0, %s2968_s30  ;;  %v907_v13 = vpop.permute.xlu1 %906 }
 0x452   : > { %v908_v2 = vsel %vm842_vm0, %v907_v13, %v4095_v9 }
 0x453   : > { %v910_v45 = vpop.permute.xlu0 %909  ;;  %917 = vrot.lane.b32.xlu1 %v908_v2, %s2968_s30 }
 0x454   : > { %v911_v39 = vsel %vm842_vm0, %v910_v45, %v4090_v50 }
 0x455   : > { %919 = vrot.lane.b32.xlu0 %v911_v39, %s2968_s30  ;;  %v913_v49 = vpop.permute.xlu1 %912 }
 0x456   : > { %v914_v42 = vsel %vm842_vm0, %v913_v49, %v4111_v54 }
 0x457   : > { %v1221_v11 = vpop.permute.xlu0 %1220  ;;  %921 = vrot.lane.b32.xlu1 %v914_v42, %s2968_s30 }
 0x458   : > { %v1222_v48 = vsel %vm842_vm0, %v1221_v11, %v4106_v36 }
 0x459   : > { %1232 = vrot.lane.b32.xlu0 %v1222_v48, %s2968_s30  ;;  %v1224_v29 = vpop.permute.xlu1 %1223 }
 0x45a   : > { %v1225_v21 = vsel %vm842_vm0, %v1224_v29, %v4127_v61 }
 0x45b   : > { %v1227_v16 = vpop.permute.xlu0 %1226  ;;  %1234 = vrot.lane.b32.xlu1 %v1225_v21, %s2968_s30 }
 0x45c   : > { %v1228_v4 = vsel %vm842_vm0, %v1227_v16, %v4122_v55 }
 0x45d   : > { %1236 = vrot.lane.b32.xlu0 %v1228_v4, %s2968_s30  ;;  %v1230_v40 = vpop.permute.xlu1 %1229 }
 0x45e   : > { %v1231_v3 = vsel %vm842_vm0, %v1230_v40, %v4137_v30 }
 0x45f   : > { %1238 = vrot.lane.b32.xlu1 %v1231_v3, %s2968_s30 }
 0x4ab   : > { %v2270_v1 = vpop.permute.xlu0 %2269 }
 0x4ac   : > { %v4273_v16 = vadd.f32 %v2270_v1, %v3920_v23 }
 0x4af   : > { %v2272_v57 = vpop.permute.xlu1 %2271 }
 0x4b3   : > { %v1955_v6 = vpop.permute.xlu1 %1954 }
 0x4b4   : > { %v4290_v23 = vadd.f32 %v1955_v6, %v3946_v20 }
 0x4b7   : > { %v2274_v33 = vpop.permute.xlu0 %2273  ;;  %v1959_v22 = vpop.permute.xlu1 %1958 }
 0x4b8   : > { %v4283_v4 = vadd.f32 %v2274_v33, %v3957_v19  ;;  %v4300_v19 = vadd.f32 %v1959_v22, %v3960_v43 }
 0x4bb   : > { %v1953_v63 = vpop.permute.xlu0 %1952  ;;  %v2276_v32 = vpop.permute.xlu1 %2275 }
 0x4bf   : > { %v1957_v38 = vpop.permute.xlu0 %1956 }
 0x4c3   : > { %v916_v10 = vpop.permute.xlu0 %915 }
 0x4c4   : > { %v4215_v35 = vsel %vm842_vm0, %v916_v10, %v4080_v14 }
 0x4c5   : > { %v4832_v46 = vrot.slane %v4215_v35, 7  ;;  %v918_v62 = vpop.permute.xlu1 %917 }
 0x4c6   : > { %v4220_v53 = vsel %vm842_vm0, %v918_v62, %v4095_v9 }
 0x4c7   : > { %935 = vrot.lane.b32.xlu0 %v4832_v46, %s2971_s19  ;;  %v920_v0 = vpop.permute.xlu0 %919  ;;  %v4836_v13 = vrot.slane %v4220_v53, 7 }
 0x4c8   : > { %v4228_v2 = vsel %vm842_vm0, %v920_v0, %v4090_v50 }
 0x4c9   : > { %v4831_v14 = vrot.slane %v4228_v2, 7  ;;  %937 = vrot.lane.b32.xlu1 %v4836_v13, %s2971_s19  ;;  %v922_v9 = vpop.permute.xlu1 %921  ;;  %v4933_v13 = vld [vmem:[#allocation40_spill] sm:$0xff] }
 0x4ca   : > { %v4236_v45 = vsel %vm842_vm0, %v922_v9, %v4111_v54 }
 0x4cb   : > { %939 = vrot.lane.b32.xlu0 %v4831_v14, %s2971_s19  ;;  %v1233_v39 = vpop.permute.xlu0 %1232  ;;  %v4835_v49 = vrot.slane %v4236_v45, 7  ;;  %v4900_v14 = vld [vmem:[#allocation41_spill] sm:$0xff] }
 0x4cc   : > { %v4244_v50 = vsel %vm842_vm0, %v1233_v39, %v4106_v36 }
 0x4cd   : > { %v4830_v42 = vrot.slane %v4244_v50, 7  ;;  %941 = vrot.lane.b32.xlu1 %v4835_v49, %s2971_s19  ;;  %v1235_v11 = vpop.permute.xlu1 %1234 }
 0x4ce   : > { %v4252_v54 = vsel %vm842_vm0, %v1235_v11, %v4127_v61  ;;  %v4270_v61 = vadd.f32 %v2272_v57, %v3932_v51  ;;  %v4293_v51 = vadd.f32 %v1953_v63, %v3929_v41 }
 0x4cf   : > { %1252 = vrot.lane.b32.xlu0 %v4830_v42, %s2971_s19  ;;  %v1237_v48 = vpop.permute.xlu0 %1236  ;;  %v4834_v29 = vrot.slane %v4252_v54, 7 }
 0x4d0   : > { %v4260_v36 = vsel %vm842_vm0, %v1237_v48, %v4122_v55  ;;  %v4280_v55 = vadd.f32 %v2276_v32, %v3971_v60  ;;  %v4303_v60 = vadd.f32 %v1957_v38, %v3943_v15  ;;  %v4894_v48 = vld [vmem:[#allocation31_spill] sm:$0xff] }
 0x4d1   : > { %v4829_v21 = vrot.slane %v4260_v36, 7  ;;  %1254 = vrot.lane.b32.xlu1 %v4834_v29, %s2971_s19  ;;  %v1239_v40 = vpop.permute.xlu1 %1238 }
 0x4d2   : > { %v4307_v20 = vsel %vm842_vm0, %v1239_v40, %v4137_v30  ;;  %v4895_v40 = vld [vmem:[#allocation33_spill] sm:$0xff] }
 0x4d3   : > { %1256 = vrot.lane.b32.xlu0 %v4829_v21, %s2971_s19  ;;  %v4833_v41 = vrot.slane %v4307_v20, 7  ;;  %v4899_v21 = vld [vmem:[#allocation37_spill] sm:$0xff] }
 0x4d5   : > { %2291 = vrot.lane.b32.xlu1 %v4270_v61, %s2970_s10 }
 0x4d7   : > { %2289 = vrot.lane.b32.xlu0 %v4273_v16, %s2970_s10 }
 0x4d9   : > { %2295 = vrot.lane.b32.xlu1 %v4280_v55, %s2970_s10 }
 0x4db   : > { %2293 = vrot.lane.b32.xlu0 %v4283_v4, %s2970_s10 }
 0x4dd   : > { %1974 = vrot.lane.b32.xlu1 %v4290_v23, %s2970_s10 }
 0x4df   : > { %1972 = vrot.lane.b32.xlu0 %v4293_v51, %s2970_s10 }
 0x4e1   : > { %1978 = vrot.lane.b32.xlu1 %v4300_v19, %s2970_s10 }
 0x4e3   : > { %1976 = vrot.lane.b32.xlu0 %v4303_v60, %s2970_s10 }
 0x4e5   : > { %1258 = vrot.lane.b32.xlu1 %v4833_v41, %s2971_s19 }
 0x539   : > { %v936_v43 = vpop.permute.xlu0 %935 }
 0x53a   : > { %v4318_v15 = vadd.f32 %v936_v43, %v4075_v28  ;;  %v640_v43 = vadd.f32 %v4895_v40, %v4894_v48 }
 0x53b   : > { %v938_v30 = vpop.permute.xlu1 %937 }
 0x53c   : > { %4890 = vst [vmem:[#allocation47_spill] sm:$0xff] %v4318_v15  ;;  %v4321_v3 = vrot.slane %v4318_v15, 1  ;;  %v4324_v57 = vadd.f32 %v938_v30, %v4087_v5  ;;  %v4896_v30 = vld [vmem:[#allocation39_spill] sm:$0xff]  ;;  %v648_v46 = vsub.f32 %v640_v43, %v4900_v14 }
 0x53d   : > { %v940_v1 = vpop.permute.xlu0 %939 }
 0x53e   : > { %v4327_v6 = vadd.f32 %v940_v1, %v4084_v37  ;;  %963 = vrot.lane.b32.xlu0 %v4321_v3, %s2968_s30  ;;  %v4332_v33 = vrot.slane %v4324_v57, 1  ;;  %v656_v29 = vand.u32 2147483647, %v648_v46  ;;  %v4903_v46 = vld [vmem:[#allocation11_spill] sm:$0xff] }
 0x53f   : > { %v942_v63 = vpop.permute.xlu1 %941 }
 0x540   : > { %4891 = vst [vmem:[#allocation48_spill] sm:$0xff] %v4327_v6  ;;  %v4335_v28 = vrot.slane %v4327_v6, 1  ;;  %v4338_v22 = vadd.f32 %v942_v63, %v4101_v24  ;;  %966 = vrot.lane.b32.xlu1 %v4332_v33, %s2968_s30  ;;  %v4897_v63 = vld [vmem:[#allocation43_spill] sm:$0xff]  ;;  %v664_v43 = vsel %vm660_vm5, %v656_v29, 0.0 }
 0x541   : > { %v1253_v5 = vpop.permute.xlu0 %1252 }
 0x542   : > { %v4343_v37 = vadd.f32 %v1253_v5, %v4098_v17  ;;  %969 = vrot.lane.b32.xlu0 %v4335_v28, %s2968_s30  ;;  %v4348_v38 = vrot.slane %v4338_v22, 1 }
 0x543   : > { %v1255_v10 = vpop.permute.xlu1 %1254 }
 0x544   : > { %4892 = vst [vmem:[#allocation49_spill] sm:$0xff] %v4343_v37  ;;  %v4351_v32 = vrot.slane %v4343_v37, 1  ;;  %v4354_v24 = vadd.f32 %v1255_v10, %v4117_v34  ;;  %972 = vrot.lane.b32.xlu1 %v4348_v38, %s2968_s30  ;;  %v638_v34 = vadd.f32 %v3690_v31, %v3683_v8  ;;  %v4901_v8 = vld [vmem:[#allocation45_spill] sm:$0xff]  ;;  %v4935_v37 = vld [vmem:[#allocation36_spill] sm:$0xff] }
 0x545   : > { %v1257_v62 = vpop.permute.xlu0 %1256 }
 0x546   : > { %v4359_v17 = vadd.f32 %v1257_v62, %v4114_v7  ;;  %1280 = vrot.lane.b32.xlu0 %v4351_v32, %s2968_s30  ;;  %v4364_v0 = vrot.slane %v4354_v24, 1  ;;  %v636_v7 = vadd.f32 %v3670_v27, %v3661_v44  ;;  %v646_v5 = vsub.f32 %v638_v34, %v4897_v63  ;;  %v4898_v62 = vld [vmem:[#allocation35_spill] sm:$0xff] }
 0x547   : > { %v4369_v39 = vpop.permute.xlu1 %2291  ;;  %v642_v42 = vadd.f32 %v4899_v21, %v4898_v62 }
 0x548   : > { %4893 = vst [vmem:[#allocation50_spill] sm:$0xff] %v4359_v17  ;;  %v4367_v9 = vrot.slane %v4359_v17, 1  ;;  %1283 = vrot.lane.b32.xlu1 %v4364_v0, %s2968_s30  ;;  %v644_v1 = vsub.f32 %v636_v7, %v4896_v30  ;;  %v654_v27 = vand.u32 2147483647, %v646_v5 }
 0x549   : > { %v650_v31 = vsub.f32 %v642_v42, %v4901_v8 }
 0x54a   : > { %1286 = vrot.lane.b32.xlu0 %v4367_v9, %s2968_s30  ;;  %v652_v44 = vand.u32 2147483647, %v644_v1  ;;  %v662_v7 = vsel %vm660_vm5, %v654_v27, 0.0  ;;  %v4904_v1 = vld [vmem:[#allocation19_spill] sm:$0xff]  ;;  %v4907_v27 = vld [vmem:[#allocation20_spill] sm:$0xff] }
 0x54b   : > { %v4379_v11 = vpop.permute.xlu1 %2295  ;;  %v658_v14 = vand.u32 2147483647, %v650_v31  ;;  %v4905_v63 = vsub.f32 %v4903_v46, %v4904_v1  ;;  %v4909_v31 = vld [vmem:[#allocation13_spill] sm:$0xff] }
 0x54c   : > { %v661_v48 = vsel %vm660_vm5, %v652_v44, 0.0  ;;  %v4906_v44 = vld [vmem:[#allocation12_spill] sm:$0xff] }
 0x54d   : > { %v663_v30 = vadd.f32 %v662_v7, %v661_v48  ;;  %v1656_v5 = vand.u32 2147483647, %v4905_v63  ;;  %v666_v62 = vsel %vm660_vm5, %v658_v14, 0.0  ;;  %v4908_v8 = vsub.f32 %v4906_v44, %v4907_v27  ;;  %v4910_v7 = vld [vmem:[#allocation21_spill] sm:$0xff]  ;;  %v4913_v14 = vld [vmem:[#allocation22_spill] sm:$0xff]  ;;  %v4916_v63 = vld [vmem:[#allocation23_spill] sm:$0xff] }
 0x54e   : > { %v4918_v27 = vld [vmem:[#allocation16_spill] sm:$0xff] }
 0x54f   : > { %v4385_v10 = vpop.permute.xlu1 %1974  ;;  %v665_v42 = vadd.f32 %v664_v43, %v663_v30  ;;  %v1657_v48 = vand.u32 2147483647, %v4908_v8  ;;  %v4912_v43 = vld [vmem:[#allocation14_spill] sm:$0xff]  ;;  %v4919_v8 = vld [vmem:[#allocation24_spill] sm:$0xff] }
 0x550   : > { %v4914_v46 = vsub.f32 %v4912_v43, %v4913_v14 }
 0x552   : > { %v1659_v1 = vand.u32 2147483647, %v4914_v46  ;;  %v4924_v46 = vld [vmem:[#allocation18_spill] sm:$0xff] }
 0x553   : > { %v4390_v41 = vpop.permute.xlu1 %1978 }
 0x557   : > { %v1259_v34 = vpop.permute.xlu1 %1258 }
 0x558   : > { %v4396_v40 = vadd.f32 %v1259_v34, %v4130_v47  ;;  %v667_v47 = vadd.f32 %v666_v62, %v665_v42  ;;  %v4911_v34 = vsub.f32 %v4909_v31, %v4910_v7  ;;  %v4915_v42 = vld [vmem:[#allocation15_spill] sm:$0xff]  ;;  %v4921_v7 = vld [vmem:[#allocation17_spill] sm:$0xff] }
 0x55a   : > { %4902 = vst [vmem:[#allocation31_spill] sm:$0xff] %v4396_v40  ;;  %v4399_v21 = vrot.slane %v4396_v40, 1  ;;  %v676_v29 = vsel %vm660_vm5, %v667_v47, 0.0  ;;  %v1658_v30 = vand.u32 2147483647, %v4911_v34  ;;  %v4428_v47 = vpop.permute.xlu0 %2289  ;;  %v4922_v34 = vld [vmem:[#allocation25_spill] sm:$0xff] }
 0x55c   : > { %1289 = vrot.lane.b32.xlu1 %v4399_v21, %s2968_s30 }
 0x55e   : > { %v4434_v44 = vpop.permute.xlu0 %2293 }
 0x560   : > { %1675 = vrot.lane.b32.xlu1 %v1656_v5, %s2970_s10  ;;  %v4917_v5 = vsub.f32 %v4915_v42, %v4916_v63 }
 0x562   : > { %v1660_v62 = vand.u32 2147483647, %v4917_v5  ;;  %v4445_v31 = vpop.permute.xlu0 %1972 }
 0x564   : > { %1677 = vrot.lane.b32.xlu1 %v1657_v48, %s2970_s10  ;;  %v4920_v48 = vsub.f32 %v4918_v27, %v4919_v8 }
 0x566   : > { %v4454_v14 = vpop.permute.xlu0 %1976 }
 0x568   : > { %1679 = vrot.lane.b32.xlu1 %v1658_v30, %s2970_s10  ;;  %v4923_v30 = vsub.f32 %v4921_v7, %v4922_v34 }
 0x569   : > { %677 = vadd.xlane.f32.xlu0 %v676_v29  ;;  %v1661_v29 = vand.u32 2147483647, %v4920_v48 }
 0x56a   : > { %v1662_v43 = vand.u32 2147483647, %v4923_v30 }
 0x56c   : > { %1681 = vrot.lane.b32.xlu1 %v1659_v1, %s2970_s10  ;;  %v4925_v1 = vld [vmem:[#allocation26_spill] sm:$0xff] }
 0x56d   : > { %v4926_v42 = vsub.f32 %v4924_v46, %v4925_v1 }
 0x56f   : > { %v1663_v63 = vand.u32 2147483647, %v4926_v42 }
 0x570   : > { %1683 = vrot.lane.b32.xlu1 %v1660_v62, %s2970_s10 }
 0x574   : > { %2304 = vrot.lane.b32.xlu1 %v4369_v39, %s2968_s30 }
 0x578   : > { %2310 = vrot.lane.b32.xlu1 %v4379_v11, %s2968_s30 }
 0x57c   : > { %1987 = vrot.lane.b32.xlu1 %v4385_v10, %s2968_s30 }
 0x57f   : > { %2301 = vrot.lane.b32.xlu0 %v4428_v47, %s2968_s30 }
 0x580   : > { %1993 = vrot.lane.b32.xlu1 %v4390_v41, %s2968_s30 }
 0x583   : > { %2307 = vrot.lane.b32.xlu0 %v4434_v44, %s2968_s30 }
 0x584   : > { %1685 = vrot.lane.b32.xlu1 %v1661_v29, %s2970_s10 }
 0x587   : > { %1984 = vrot.lane.b32.xlu0 %v4445_v31, %s2968_s30 }
 0x588   : > { %1687 = vrot.lane.b32.xlu1 %v1662_v43, %s2970_s10 }
 0x58b   : > { %1990 = vrot.lane.b32.xlu0 %v4454_v14, %s2968_s30 }
 0x58c   : > { %1689 = vrot.lane.b32.xlu1 %v1663_v63, %s2970_s10 }
 0x5b0   : > { %v964_v5 = vpop.permute.xlu0 %963 }
 0x5b1   : > { %v965_v62 = vsel %vm842_vm0, %v964_v5, %v4321_v3 }
 0x5b2   : > { %975 = vrot.lane.b32.xlu0 %v965_v62, %s2968_s30  ;;  %v967_v27 = vpop.permute.xlu1 %966  ;;  %v1664_v62 = vlaneseq }
 0x5b3   : > { %v968_v8 = vsel %vm842_vm0, %v967_v27, %v4332_v33 }
 0x5b4   : > { %977 = vrot.lane.b32.xlu1 %v968_v8, %s2968_s30  ;;  %v970_v48 = vpop.permute.xlu0 %969  ;;  %v1665_v8 = vand.u32 127, %v1664_v62 }
 0x5b5   : > { %v971_v29 = vsel %vm842_vm0, %v970_v48, %v4335_v28 }
 0x5b6   : > { %v973_v7 = vpop.permute.xlu1 %972  ;;  %vm1666_vm6 = vcmp.lt.s32.totalorder %v1665_v8, 15 }
 0x5b7   : > { %v974_v34 = vsel %vm842_vm0, %v973_v7, %v4348_v38 }
 0x5b8   : > { %979 = vrot.lane.b32.xlu1 %v971_v29, %s2968_s30  ;;  %v1281_v30 = vpop.permute.xlu0 %1280 }
 0x5b9   : > { %v1282_v43 = vsel %vm842_vm0, %v1281_v30, %v4351_v32 }
 0x5ba   : > { %v1284_v46 = vpop.permute.xlu1 %1283 }
 0x5bb   : > { %v1285_v1 = vsel %vm842_vm0, %v1284_v46, %v4364_v0 }
 0x5bc   : > { %981 = vrot.lane.b32.xlu1 %v974_v34, %s2968_s30  ;;  %v1287_v42 = vpop.permute.xlu0 %1286 }
 0x5bd   : > { %v1288_v63 = vsel %vm842_vm0, %v1287_v42, %v4367_v9 }
 0x5c0   : > { %1292 = vrot.lane.b32.xlu1 %v1282_v43, %s2968_s30 }
 0x5c4   : > { %1294 = vrot.lane.b32.xlu1 %v1285_v1, %s2968_s30 }
 0x5c8   : > { %1296 = vrot.lane.b32.xlu1 %v1288_v63, %s2968_s30 }
 0x5cc   : > { %2028 = vrot.lane.b32.xlu1 %v4173_v59, %s2972_s13 }
 0x5ce   : > { %v1290_v5 = vpop.permute.xlu1 %1289 }
 0x5cf   : > { %v1291_v27 = vsel %vm842_vm0, %v1290_v5, %v4399_v21 }
 0x5d0   : > { %1298 = vrot.lane.b32.xlu0 %v1291_v27, %s2968_s30  ;;  %2032 = vrot.lane.b32.xlu1 %v4185_v56, %s2972_s13 }
 0x5d2   : > { %v1676_v48 = vpop.permute.xlu1 %1675 }
 0x5d3   : > { %v1699_v59 = vsel %vm1666_vm6, %v1676_v48, 0.0 }
 0x5d4   : > { %2030 = vrot.lane.b32.xlu0 %v4155_v12, %s2972_s13  ;;  %v1707_v30 = vsel %vm668_vm7, %v1699_v59, 0.0 }
 0x5d6   : > { %v1678_v29 = vpop.permute.xlu1 %1677 }
 0x5d7   : > { %v1700_v43 = vsel %vm1666_vm6, %v1678_v29, 0.0 }
 0x5d8   : > { %2034 = vrot.lane.b32.xlu0 %v4165_v18, %s2972_s13  ;;  %v1714_v42 = vsel %vm668_vm7, %v1700_v43, 0.0 }
 0x5da   : > { %v1680_v7 = vpop.permute.xlu1 %1679 }
 0x5db   : > { %v1701_v34 = vsel %vm1666_vm6, %v1680_v7, 0.0 }
 0x5dc   : > { %v1708_v56 = vsel %vm668_vm7, %v1701_v34, 0.0 }
 0x5dd   : > { %v1709_v46 = vadd.f32 %v1708_v56, %v1707_v30 }
 0x5de   : > { %v1682_v1 = vpop.permute.xlu1 %1681 }
 0x5df   : > { %v1702_v12 = vsel %vm1666_vm6, %v1682_v1, 0.0 }
 0x5e0   : > { %v1715_v18 = vsel %vm668_vm7, %v1702_v12, 0.0 }
 0x5e1   : > { %v1716_v63 = vadd.f32 %v1715_v18, %v1714_v42 }
 0x5e2   : > { %v1684_v5 = vpop.permute.xlu1 %1683 }
 0x5e3   : > { %v1703_v62 = vsel %vm1666_vm6, %v1684_v5, 0.0 }
 0x5e4   : > { %v1710_v27 = vsel %vm668_vm7, %v1703_v62, 0.0 }
 0x5e5   : > { %v1711_v48 = vadd.f32 %v1710_v27, %v1709_v46 }
 0x5e6   : > { %v2305_v59 = vpop.permute.xlu1 %2304 }
 0x5e7   : > { %v2306_v7 = vsel %vm842_vm0, %v2305_v59, %v4369_v39 }
 0x5e8   : > { %2315 = vrot.lane.b32.xlu1 %v2306_v7, %s2968_s30 }
 0x5ea   : > { %v2311_v29 = vpop.permute.xlu1 %2310 }
 0x5eb   : > { %v2312_v34 = vsel %vm842_vm0, %v2311_v29, %v4379_v11 }
 0x5ec   : > { %2319 = vrot.lane.b32.xlu1 %v2312_v34, %s2968_s30 }
 0x5ee   : > { %v1988_v30 = vpop.permute.xlu1 %1987 }
 0x5ef   : > { %v1989_v56 = vsel %vm842_vm0, %v1988_v30, %v4385_v10 }
 0x5f0   : > { %1998 = vrot.lane.b32.xlu1 %v1989_v56, %s2968_s30 }
 0x5f2   : > { %v4513_v43 = vpop.xlane.xlu0 %677  ;;  %v1994_v46 = vpop.permute.xlu1 %1993 }
 0x5f3   : > { %v1995_v1 = vsel %vm842_vm0, %v1994_v46, %v4390_v41 }
 0x5f4   : > { %2002 = vrot.lane.b32.xlu1 %v1995_v1, %s2968_s30 }
 0x5f6   : > { %v2302_v12 = vpop.permute.xlu0 %2301  ;;  %v1686_v42 = vpop.permute.xlu1 %1685 }
 0x5f7   : > { %v2303_v18 = vsel %vm842_vm0, %v2302_v12, %v4428_v47  ;;  %v1704_v5 = vsel %vm1666_vm6, %v1686_v42, 0.0 }
 0x5f8   : > { %2313 = vrot.lane.b32.xlu0 %v2303_v18, %s2968_s30  ;;  %v1717_v62 = vsel %vm668_vm7, %v1704_v5, 0.0  ;;  %2345 = vrot.lane.b32.xlu1 %v4143_v52, %s2972_s13 }
 0x5f9   : > { %v1718_v27 = vadd.f32 %v1717_v62, %v1716_v63 }
 0x5fa   : > { %v2308_v59 = vpop.permute.xlu0 %2307  ;;  %v1688_v7 = vpop.permute.xlu1 %1687 }
 0x5fb   : > { %v2309_v29 = vsel %vm842_vm0, %v2308_v59, %v4434_v44  ;;  %v1705_v34 = vsel %vm1666_vm6, %v1688_v7, 0.0 }
 0x5fc   : > { %2317 = vrot.lane.b32.xlu0 %v2309_v29, %s2968_s30  ;;  %v1712_v30 = vsel %vm668_vm7, %v1705_v34, 0.0  ;;  %2349 = vrot.lane.b32.xlu1 %v4161_v25, %s2972_s13 }
 0x5fd   : > { %v1713_v56 = vadd.f32 %v1712_v30, %v1711_v48 }
 0x5fe   : > { %v1985_v46 = vpop.permute.xlu0 %1984  ;;  %v1690_v1 = vpop.permute.xlu1 %1689 }
 0x5ff   : > { %v1986_v52 = vsel %vm842_vm0, %v1985_v46, %v4445_v31  ;;  %v1706_v63 = vsel %vm1666_vm6, %v1690_v1, 0.0 }
 0x600   : > { %1996 = vrot.lane.b32.xlu0 %v1986_v52, %s2968_s30  ;;  %v1719_v12 = vsel %vm668_vm7, %v1706_v63, 0.0 }
 0x601   : > { %v4537_v42 = vadd.f32 %v1719_v12, %v1718_v27 }
 0x602   : > { %v1991_v18 = vpop.permute.xlu0 %1990 }
 0x603   : > { %v1992_v5 = vsel %vm842_vm0, %v1991_v18, %v4454_v14 }
 0x604   : > { %2000 = vrot.lane.b32.xlu0 %v1992_v5, %s2968_s30  ;;  %s4723_s30 = scalar_lea.vmem %s4786_s6, %s4696_s1 }
 0x608   : > { %2347 = vrot.lane.b32.xlu0 %v4149_v58, %s2972_s13 }
 0x60c   : > { %2351 = vrot.lane.b32.xlu0 %v4177_v26, %s2972_s13 }
 0x624   : > { %v4556_v29 = vpop.permute.xlu0 %975 }
 0x626   : > { %v978_v25 = vpop.permute.xlu1 %977 }
 0x62a   : > { %v980_v8 = vpop.permute.xlu1 %979 }
 0x62e   : > { %v4546_v48 = vpop.permute.xlu1 %981 }
 0x632   : > { %v4548_v62 = vpop.permute.xlu1 %1292 }
 0x636   : > { %v4550_v27 = vpop.permute.xlu1 %1294 }
 0x63a   : > { %v4552_v59 = vpop.permute.xlu1 %1296 }
 0x63e   : > { %v4554_v7 = vpop.permute.xlu1 %2028 }
 0x642   : > { %v4558_v34 = vpop.permute.xlu1 %2032  ;;  %v4560_v58 = vpop.permute.xlu0 %1298 }
 0x646   : > { %v4565_v1 = vpop.permute.xlu0 %2030 }
 0x64a   : > { %v4573_v18 = vpop.permute.xlu0 %2034 }
 0x65a   : > { %v2316_v30 = vpop.permute.xlu1 %2315 }
 0x65b   : > { %v2322_v26 = vsel %vm842_vm0, %v2316_v30, %v4369_v39 }
 0x65c   : > { %2331 = vrot.lane.b32.xlu0 %v2322_v26, %s2973_s21 }
 0x65e   : > { %v2320_v46 = vpop.permute.xlu1 %2319 }
 0x65f   : > { %v2324_v52 = vsel %vm842_vm0, %v2320_v46, %v4379_v11 }
 0x660   : > { %2335 = vrot.lane.b32.xlu0 %v2324_v52, %s2973_s21 }
 0x662   : > { %v1999_v63 = vpop.permute.xlu1 %1998 }
 0x663   : > { %v2005_v12 = vsel %vm842_vm0, %v1999_v63, %v4385_v10  ;;  %v4928_v63 = vld [vmem:[#allocation28_spill] sm:$0xff] }
 0x664   : > { %2014 = vrot.lane.b32.xlu0 %v2005_v12, %s2973_s21 }
 0x66a   : > { %v2314_v39 = vpop.permute.xlu0 %2313 }
 0x66b   : > { %v2321_v5 = vsel %vm842_vm0, %v2314_v39, %v4428_v47  ;;  %v4927_v47 = vld [vmem:[#allocation27_spill] sm:$0xff]  ;;  %v4929_v39 = vld [vmem:[#allocation29_spill] sm:$0xff] }
 0x66c   : > { %2329 = vrot.lane.b32.xlu1 %v2321_v5, %s2973_s21  ;;  %v637_v12 = vadd.f32 %v4928_v63, %v4927_v47  ;;  %v4930_v5 = vld [vmem:[#allocation30_spill] sm:$0xff] }
 0x66d   : > { %v4938_v63 = vld [vmem:[#allocation46_spill] sm:$0xff] }
 0x66e   : > { %v2318_v30 = vpop.permute.xlu0 %2317  ;;  %v645_v17 = vsub.f32 %v637_v12, %v4933_v13 }
 0x66f   : > { %v2323_v11 = vsel %vm842_vm0, %v2318_v30, %v4434_v44  ;;  %v639_v44 = vadd.f32 %v4930_v5, %v4929_v39  ;;  %v4931_v30 = vld [vmem:[#allocation32_spill] sm:$0xff] }
 0x670   : > { %2333 = vrot.lane.b32.xlu1 %v2323_v11, %s2973_s21  ;;  %v4932_v11 = vld [vmem:[#allocation34_spill] sm:$0xff]  ;;  %v653_v15 = vand.u32 2147483647, %v645_v17 }
 0x671   : > { %v641_v49 = vadd.f32 %v4932_v11, %v4931_v30 }
 0x672   : > { %v1997_v26 = vpop.permute.xlu0 %1996  ;;  %v669_v5 = vsel %vm668_vm7, %v653_v15, 0.0  ;;  %v984_v15 = vsel %vm842_vm0, %v978_v25, %v4332_v33  ;;  %v1724_v25 = vsel %vm668_vm7, %v4537_v42, 0.0  ;;  %v983_v42 = vsel %vm842_vm0, %v4556_v29, %v4321_v3 }
 0x673   : > { %v2004_v10 = vsel %vm842_vm0, %v1997_v26, %v4445_v31  ;;  %v4934_v31 = vld [vmem:[#allocation44_spill] sm:$0xff]  ;;  %v1302_v3 = vsel %vm842_vm0, %v4552_v59, %v4367_v9  ;;  %v4943_v59 = vrot.slane %v4215_v35, 7  ;;  %v4946_v35 = vrot.slane %v4260_v36, 7 }
 0x674   : > { %2012 = vrot.lane.b32.xlu1 %v2004_v10, %s2973_s21  ;;  %v647_v26 = vsub.f32 %v639_v44, %v4934_v31  ;;  %v1721_v10 = vsel %vm668_vm7, %v1713_v56, 0.0 }
 0x676   : > { %v2001_v46 = vpop.permute.xlu0 %2000  ;;  %v655_v47 = vand.u32 2147483647, %v647_v26 }
 0x677   : > { %v2006_v52 = vsel %vm842_vm0, %v2001_v46, %v4454_v14  ;;  %v4936_v14 = vld [vmem:[#allocation38_spill] sm:$0xff] }
 0x678   : > { %2016 = vrot.lane.b32.xlu1 %v2006_v52, %s2973_s21  ;;  %v643_v46 = vadd.f32 %v4936_v14, %v4935_v37  ;;  %v4937_v52 = vld [vmem:[#allocation42_spill] sm:$0xff]  ;;  %v670_v30 = vsel %vm668_vm7, %v655_v47, 0.0  ;;  %v2003_v37 = vpop.permute.xlu1 %2002  ;;  %v1301_v14 = vsel %vm842_vm0, %v4550_v27, %v4364_v0  ;;  %v4939_v0 = vrot.slane %v4220_v53, 7 }
 0x679   : > { %v649_v6 = vsub.f32 %v641_v49, %v4937_v52  ;;  %v671_v13 = vadd.f32 %v670_v30, %v669_v5  ;;  %v2007_v49 = vsel %vm842_vm0, %v2003_v37, %v4390_v41  ;;  %v986_v41 = vsel %vm842_vm0, %v4546_v48, %v4348_v38 }
 0x67a   : > { %v651_v40 = vsub.f32 %v643_v46, %v4938_v63  ;;  %v1309_v33 = vrot.slane %v1301_v14, 7  ;;  %v4940_v48 = vrot.slane %v4236_v45, 7  ;;  %v4942_v46 = vrot.slane %v4307_v20, 7 }
 0x67b   : > { %v657_v39 = vand.u32 2147483647, %v649_v6  ;;  %v992_v6 = vrot.slane %v984_v15, 7  ;;  %v1300_v53 = vsel %vm842_vm0, %v4548_v62, %v4351_v32  ;;  %v1310_v5 = vrot.slane %v1302_v3, 7 }
 0x67c   : > { %v659_v12 = vand.u32 2147483647, %v651_v40  ;;  %v985_v40 = vsel %vm842_vm0, %v980_v8, %v4335_v28  ;;  %v1303_v28 = vsel %vm842_vm0, %v4560_v58, %v4399_v21  ;;  %v2348_v8 = vpop.permute.xlu0 %2347  ;;  %v4941_v21 = vrot.slane %v4252_v54, 7  ;;  %v2346_v20 = vpop.permute.xlu1 %2345 }
 0x67d   : > { %v672_v44 = vsel %vm668_vm7, %v657_v39, 0.0  ;;  %v993_v26 = vrot.slane %v985_v40, 7  ;;  %v1311_v38 = vrot.slane %v1303_v28, 7  ;;  %v991_v58 = vrot.slane %v983_v42, 7 }
 0x67e   : > { %v673_v56 = vadd.f32 %v672_v44, %v671_v13  ;;  %v674_v11 = vsel %vm668_vm7, %v659_v12, 0.0  ;;  %v1308_v52 = vrot.slane %v1300_v53, 7  ;;  %v4944_v12 = vrot.slane %v4228_v2, 7 }
 0x680   : > { %v675_v31 = vadd.f32 %v674_v11, %v673_v56  ;;  %v2352_v27 = vpop.permute.xlu0 %2351  ;;  %v2350_v30 = vpop.permute.xlu1 %2349 }
 0x682   : > { %v679_v17 = vsel %vm668_vm7, %v675_v31, 0.0 }
 0x683   : > { %1722 = vadd.xlane.f32.xlu0 %v1721_v10  ;;  %v994_v10 = vrot.slane %v986_v41, 7 }
 0x699   : > { %2018 = vrot.lane.b32.xlu0 %v2007_v49, %s2973_s21 }
 0x69c   : > { %680 = vadd.xlane.f32.xlu1 %v679_v17 }
 0x6ad   : > { %997 = vrot.lane.b32.xlu1 %v992_v6, %s2974_s9 }
 0x6b1   : > { %999 = vrot.lane.b32.xlu1 %v993_v26, %s2974_s9 }
 0x6b5   : > { %1001 = vrot.lane.b32.xlu1 %v994_v10, %s2974_s9  ;;  %v685_v10 = vrot.slane %v4513_v43, 1 }
 0x6b8   : > { %1725 = vadd.xlane.f32.xlu0 %v1724_v25 }
 0x6b9   : > { %1314 = vrot.lane.b32.xlu1 %v1309_v33, %s2974_s9 }
 0x6bd   : > { %1318 = vrot.lane.b32.xlu1 %v1311_v38, %s2974_s9 }
 0x6c1   : > { %1013 = vrot.lane.b32.xlu1 %v4939_v0, %s2975_s20 }
 0x6c5   : > { %1017 = vrot.lane.b32.xlu1 %v4940_v48, %s2975_s20 }
 0x6c9   : > { %1330 = vrot.lane.b32.xlu1 %v4941_v21, %s2975_s20 }
 0x6cd   : > { %1334 = vrot.lane.b32.xlu1 %v4942_v46, %s2975_s20 }
 0x6ce   : > { %995 = vrot.lane.b32.xlu0 %v991_v58, %s2974_s9  ;;  %v2332_v45 = vpop.permute.xlu0 %2331 }
 0x6cf   : > { %v2342_v54 = vadd.f32 %v2332_v45, %v4270_v61 }
 0x6d1   : > { %v2358_v29 = vadd.f32 %v2348_v8, %v2342_v54 }
 0x6d2   : > { %1312 = vrot.lane.b32.xlu0 %v1308_v52, %s2974_s9  ;;  %v2336_v47 = vpop.permute.xlu0 %2335 }
 0x6d3   : > { %v2362_v63 = vmul.f32 0.01, %v2358_v29  ;;  %v2344_v39 = vadd.f32 %v2336_v47, %v4280_v55 }
 0x6d5   : > { %v2360_v32 = vadd.f32 %v2352_v27, %v2344_v39  ;;  %2371 = vrot.lane.b32.xlu1 %v2362_v63, %s2970_s10 }
 0x6d6   : > { %1316 = vrot.lane.b32.xlu0 %v1310_v5, %s2974_s9  ;;  %v2015_v61 = vpop.permute.xlu0 %2014 }
 0x6d7   : > { %v2025_v62 = vadd.f32 %v2015_v61, %v4290_v23  ;;  %v4945_v23 = vrot.slane %v4244_v50, 7 }
 0x6d9   : > { %v2041_v9 = vadd.f32 %v4565_v1, %v2025_v62 }
 0x6da   : > { %1011 = vrot.lane.b32.xlu0 %v4943_v59, %s2975_s20 }
 0x6db   : > { %v2045_v13 = vmul.f32 0.01, %v2041_v9 }
 0x6dd   : > { %2054 = vrot.lane.b32.xlu1 %v2045_v13, %s2970_s10 }
 0x6de   : > { %v2330_v55 = vpop.permute.xlu1 %2329  ;;  %1015 = vrot.lane.b32.xlu0 %v4944_v12, %s2975_s20 }
 0x6df   : > { %v2341_v44 = vadd.f32 %v2330_v55, %v4273_v16 }
 0x6e1   : > { %v2357_v1 = vadd.f32 %v2346_v20, %v2341_v44 }
 0x6e2   : > { %v2334_v56 = vpop.permute.xlu1 %2333  ;;  %1328 = vrot.lane.b32.xlu0 %v4945_v23, %s2975_s20 }
 0x6e3   : > { %v2361_v37 = vmul.f32 0.01, %v2357_v1  ;;  %v2343_v50 = vadd.f32 %v2334_v56, %v4283_v4  ;;  %v2364_v4 = vmul.f32 0.01, %v2360_v32 }
 0x6e5   : > { %v2359_v36 = vadd.f32 %v2350_v30, %v2343_v50 }
 0x6e6   : > { %v2013_v11 = vpop.permute.xlu1 %2012  ;;  %1332 = vrot.lane.b32.xlu0 %v4946_v35, %s2975_s20  ;;  %v4948_v35 = vld [vmem:[#allocation47_spill] sm:$0xff] }
 0x6e7   : > { %v2024_v31 = vadd.f32 %v2013_v11, %v4293_v51  ;;  %v2363_v51 = vmul.f32 0.01, %v2359_v36  ;;  %v4950_v36 = vld [vmem:[#allocation49_spill] sm:$0xff] }
 0x6e9   : > { %v2040_v49 = vadd.f32 %v4554_v7, %v2024_v31 }
 0x6ea   : > { %v2017_v2 = vpop.permute.xlu1 %2016  ;;  %2369 = vrot.lane.b32.xlu0 %v2361_v37, %s2970_s10 }
 0x6eb   : > { %v2044_v17 = vmul.f32 0.01, %v2040_v49  ;;  %v2026_v16 = vadd.f32 %v2017_v2, %v4303_v60 }
 0x6ed   : > { %v2042_v15 = vadd.f32 %v4558_v34, %v2026_v16 }
 0x6ee   : > { %2052 = vrot.lane.b32.xlu0 %v2044_v17, %s2970_s10  ;;  %v4949_v17 = vld [vmem:[#allocation48_spill] sm:$0xff] }
 0x6ef   : > { %v2046_v6 = vmul.f32 0.01, %v2042_v15 }
 0x6f2   : > { %2056 = vrot.lane.b32.xlu0 %v2046_v6, %s2970_s10 }
 0x6f6   : > { %2373 = vrot.lane.b32.xlu0 %v2363_v51, %s2970_s10 }
 0x70c   : > { %v1723_v7 = vpop.xlane.xlu0 %1722 }
 0x710   : > { %v2019_v40 = vpop.permute.xlu0 %2018 }
 0x711   : > { %v2027_v26 = vadd.f32 %v2019_v40, %v4300_v19 }
 0x713   : > { %v2043_v60 = vadd.f32 %v4573_v18, %v2027_v26 }
 0x715   : > { %v2047_v41 = vmul.f32 0.01, %v2043_v60  ;;  %v4951_v60 = vld [vmem:[#allocation50_spill] sm:$0xff] }
 0x717   : > { %2058 = vrot.lane.b32.xlu1 %v2047_v41, %s2970_s10 }
 0x71b   : > { %2375 = vrot.lane.b32.xlu1 %v2364_v4, %s2970_s10  ;;  %s4733_s10 = scalar_lea.vmem %s4785_s5, %s4696_s1 }
 0x725   : > { %v681_v34 = vpop.xlane.xlu1 %680 }
 0x726   : > { %v686_v14 = vrot.slane %v681_v34, 1 }
 0x728   : > { %v687_v33 = vsel %vm684_vm1, %v685_v10, %v686_v14  ;;  %v690_v28 = vsel %vm684_vm1, %v686_v14, 0.0 }
 0x729   : > { %v691_v25 = vadd.f32 %v690_v28, %v687_v33  ;;  %v998_v38 = vpop.permute.xlu1 %997 }
 0x72a   : > { %v1008_v46 = vadd.f32 %v998_v38, %v4324_v57 }
 0x72b   : > { %v692_v19 = vrot.slane %v691_v25, 4 }
 0x72d   : > { %v693_v18 = vadd.f32 %v692_v19, %v691_v25  ;;  %v1000_v0 = vpop.permute.xlu1 %999 }
 0x72e   : > { %v1009_v16 = vadd.f32 %v1000_v0, %v4949_v17 }
 0x72f   : > { %v694_v8 = vrot.slane %v693_v18, 2 }
 0x731   : > { %v695_v48 = vadd.f32 %v694_v8, %v693_v18  ;;  %v1002_v21 = vpop.permute.xlu1 %1001 }
 0x732   : > { %v1010_v54 = vadd.f32 %v1002_v21, %v4338_v22  ;;  %v4947_v22 = vld [vmem:[#allocation31_spill] sm:$0xff] }
 0x733   : > { %v696_v42 = vrot.slane %v695_v48, 1 }
 0x735   : > { %v697_v43 = vadd.f32 %v696_v42, %v695_v48  ;;  %v1315_v27 = vpop.permute.xlu1 %1314 }
 0x736   : > { %v1325_v20 = vadd.f32 %v1315_v27, %v4354_v24 }
 0x737   : > { %699 = vst.msk [vmem:[%s4692_s22] sm:$0x1] %vm698_vm8, %v697_v43 }
 0x739   : > { %v1319_v58 = vpop.permute.xlu1 %1318 }
 0x73a   : > { %v1327_v30 = vadd.f32 %v1319_v58, %v4947_v22 }
 0x73d   : > { %v1014_v53 = vpop.permute.xlu1 %1013 }
 0x73e   : > { %v1024_v45 = vadd.f32 %v1014_v53, %v1008_v46 }
 0x740   : > { %v1028_v52 = vmul.f32 0.01, %v1024_v45 }
 0x741   : > { %v1018_v3 = vpop.permute.xlu1 %1017  ;;  %v1726_v57 = vpop.xlane.xlu0 %1725 }
 0x742   : > { %1033 = vst.msk [vmem:[%s4702_s15 + $0x7] sm:$0x7e] %vm1031_vm9, %v1028_v52  ;;  %v1026_v29 = vadd.f32 %v1018_v3, %v1010_v54  ;;  %v1727_v47 = vadd.f32 %v1726_v57, %v1723_v7 }
 0x744   : > { %v1030_v63 = vmul.f32 0.01, %v1026_v29  ;;  %v1728_v39 = vrot.slane %v1727_v47, 4 }
 0x745   : > { %v1331_v5 = vpop.permute.xlu1 %1330  ;;  %v996_v32 = vpop.permute.xlu0 %995 }
 0x746   : > { %1035 = vst.msk [vmem:[%s4702_s15 + $0x17] sm:$0x7e] %vm1031_vm9, %v1030_v63  ;;  %v1341_v61 = vadd.f32 %v1331_v5, %v1325_v20  ;;  %v1729_v62 = vadd.f32 %v1728_v39, %v1727_v47  ;;  %v1007_v31 = vadd.f32 %v996_v32, %v4948_v35 }
 0x748   : > { %v1345_v9 = vmul.f32 0.01, %v1341_v61  ;;  %v1730_v24 = vrot.slane %v1729_v62, 2 }
 0x749   : > { %v1335_v59 = vpop.permute.xlu1 %1334  ;;  %v1313_v13 = vpop.permute.xlu0 %1312 }
 0x74a   : > { %1349 = vst.msk [vmem:[%s4714_s0 + $0x7] sm:$0x7e] %vm1031_vm9, %v1345_v9  ;;  %v1343_v55 = vadd.f32 %v1335_v59, %v1327_v30  ;;  %v1731_v12 = vadd.f32 %v1730_v24, %v1729_v62  ;;  %v1324_v51 = vadd.f32 %v1313_v13, %v4950_v36 }
 0x74c   : > { %v1347_v44 = vmul.f32 0.01, %v1343_v55  ;;  %v1732_v56 = vrot.slane %v1731_v12, 1 }
 0x74d   : > { %v2372_v23 = vpop.permute.xlu1 %2371  ;;  %v1317_v1 = vpop.permute.xlu0 %1316 }
 0x74e   : > { %1351 = vst.msk [vmem:[%s4714_s0 + $0x17] sm:$0x7e] %vm1031_vm9, %v1347_v44  ;;  %v1733_v11 = vadd.f32 %v1732_v56, %v1731_v12  ;;  %v1326_v41 = vadd.f32 %v1317_v1, %v4951_v60 }
 0x74f   : > { %2382 = vst.msk [vmem:[%s4723_s30 + $0x8] sm:$0x7f] %vm2064_vm10, %v2372_v23 }
 0x750   : > { %1735 = vst.msk [vmem:[%s4692_s22] sm:$0x1] %vm1734_vm11, %v1733_v11 }
 0x751   : > { %v2055_v37 = vpop.permute.xlu1 %2054  ;;  %v1012_v49 = vpop.permute.xlu0 %1011 }
 0x752   : > { %2066 = vst.msk [vmem:[%s4733_s10 + $0x8] sm:$0x7f] %vm2064_vm10, %v2055_v37  ;;  %v1023_v2 = vadd.f32 %v1012_v49, %v1007_v31 }
 0x754   : > { %v1027_v50 = vmul.f32 0.01, %v1023_v2 }
 0x755   : > { %v1016_v15 = vpop.permute.xlu0 %1015 }
 0x756   : > { %1032 = vst.msk [vmem:[%s4702_s15 - $0x1] sm:$0x7e] %vm1031_vm9, %v1027_v50  ;;  %v1025_v6 = vadd.f32 %v1016_v15, %v1009_v16 }
 0x758   : > { %v1029_v7 = vmul.f32 0.01, %v1025_v6 }
 0x759   : > { %v1329_v40 = vpop.permute.xlu0 %1328 }
 0x75a   : > { %1034 = vst.msk [vmem:[%s4702_s15 + $0xf] sm:$0x7e] %vm1031_vm9, %v1029_v7  ;;  %v1340_v26 = vadd.f32 %v1329_v40, %v1324_v51 }
 0x75c   : > { %v1344_v4 = vmul.f32 0.01, %v1340_v26 }
 0x75d   : > { %v1333_v34 = vpop.permute.xlu0 %1332 }
 0x75e   : > { %1348 = vst.msk [vmem:[%s4714_s0 - $0x1] sm:$0x7e] %vm1031_vm9, %v1344_v4  ;;  %v1342_v10 = vadd.f32 %v1333_v34, %v1326_v41 }
 0x760   : > { %v1346_v14 = vmul.f32 0.01, %v1342_v10 }
 0x761   : > { %v2370_v33 = vpop.permute.xlu0 %2369 }
 0x762   : > { %1350 = vst.msk [vmem:[%s4714_s0 + $0xf] sm:$0x7e] %vm1031_vm9, %v1346_v14 }
 0x763   : > { %2381 = vst.msk [vmem:[%s4723_s30] sm:$0x7f] %vm2064_vm10, %v2370_v33 }
 0x765   : > { %v2053_v28 = vpop.permute.xlu0 %2052 }
 0x766   : > { %2065 = vst.msk [vmem:[%s4733_s10] sm:$0x7f] %vm2064_vm10, %v2053_v28 }
 0x769   : > { %v2057_v25 = vpop.permute.xlu0 %2056 }
 0x76a   : > { %2067 = vst.msk [vmem:[%s4733_s10 + $0x10] sm:$0x7f] %vm2064_vm10, %v2057_v25 }
 0x76d   : > { %v2374_v38 = vpop.permute.xlu0 %2373 }
 0x76e   : > { %2383 = vst.msk [vmem:[%s4723_s30 + $0x10] sm:$0x7f] %vm2064_vm10, %v2374_v38 }
 0x789   : > { %v2059_v19 = vpop.permute.xlu1 %2058 }
 0x78a   : > { %2068 = vst.msk [vmem:[%s4733_s10 + $0x18] sm:$0x7f] %vm2064_vm10, %v2059_v19 }
 0x78d   : > { %v2376_v18 = vpop.permute.xlu1 %2375 }
 0x78e   : > { %2384 = vst.msk [vmem:[%s4723_s30 + $0x18] sm:$0x7f] %vm2064_vm10, %v2376_v18 }
 0x78f PF: > { %s24_s29 = sadd.s32 1, %s2961_s29   ;;  %s4952_s27 = sld [smem:[#allocation9_spill]] }
 0x790   : > { %p21_p9 = scmp.ge.s32.totalorder %s24_s29, 4   ;;  %s4953_s28 = sld [smem:[#allocation10_spill]] }
 0x791   : > { %s4954_s24 = smov %s2945_s25  ;;  %s4955_s25 = smov %s2949_s26 }
 0x792   : > { %s4956_s26 = smov %s3063_s12  ;;  %23 = sbr.rel (!%p21_p9) target bundleno = 9 (0x9), region = 144 }
 0x797   :  { %2508 = vsyncpa [#allocation3], 1 }
 0x798   :  { %2510 = vsyncpa [#allocation3 + $0x1], 1 }
 0x799   :  { %2511 = vsyncpa [#allocation5], 1 }
 0x79a   :  { %2513 = vsyncpa [#allocation5 + $0x1], 1 }

// kernel: ktv_loss.1
= control target key start
LH: loop header
LB: loop body
LE: loop exit
PB: predicated region body
PF: predicated region fallthrough
CT: control target
= control target key end

     0   :  { %s3352_s0 = inlined_call_operand.hbm [shape: f32[2,4,16,16], index: 0, kind: input, shape index: {}]   ;;  %s3353_s1 = inlined_call_operand.hbm [shape: f32[2,4,16,16], index: 1, kind: input, shape index: {}]   ;;  %s3354_s2 = inlined_call_operand.hbm [shape: f32[2,4,16,16], index: 2, kind: input, shape index: {}]   ;;  %s3355_s3 = inlined_call_operand.vmem [shape: f32[2,4,6,128], index: 3, kind: output, shape index: {0}]   ;;  %s3356_s4 = inlined_call_operand.vmem [shape: f32[2,4,6,128], index: 4, kind: output, shape index: {1}]   ;;  %s3357_s5 = inlined_call_operand.vmem [shape: f32[2,4,7,128], index: 5, kind: output, shape index: {2}]   ;;  %s3358_s6 = inlined_call_operand.vmem [shape: f32[2,4,7,128], index: 6, kind: output, shape index: {3}]   ;;  %s3359_s7 = inlined_call_operand.vmem [shape: f32[2,1,1,2], index: 7, kind: output, shape index: {4}]  }
   0x1   :  { %3385 = sst [smem:[#allocation31_spill]] %s3352_s0 }
   0x2   :  { %3386 = sst [smem:[#allocation32_spill]] %s3353_s1 }
   0x3   :  { %13 = vsyncpa [#allocation3], 0 }
   0x4   :  { %15 = vsyncpa [#allocation3 + $0x1], 0 }
   0x5   :  { %16 = vsyncpa [#allocation5], 0 }
   0x6   :  { %18 = vsyncpa [#allocation5 + $0x1], 0  ;;  %s2384_s24 = smov 0   ;;  %s2386_s25 = smov 0  }
   0x7   :  { %s2388_s26 = smov 0   ;;  %s2390_s27 = smov 0  }
   0x8   :  { %s2392_s28 = smov 0   ;;  %s2394_s29 = smov 0  }
   0x9 LB: > { %3387 = sst [smem:[#allocation9_spill]] %s2328_s28  ;;  %s3360_s30 = sadd.s32 4294967295, %s2332_s29   ;;  %s2332_s29 = sphi %s2394_s29, %s24_s29   ;;  %s2328_s28 = sphi %s2392_s28, %s3437_s28   ;;  %s2324_s27 = sphi %s2390_s27, %s3436_s27   ;;  %s2320_s26 = sphi %s2388_s26, %s3440_s26   ;;  %s2316_s25 = sphi %s2386_s25, %s3439_s25   ;;  %s2312_s24 = sphi %s2384_s24, %s3438_s24  }
   0xa   : > { %s36_s8 = sadd.s32 1, %s2328_s28  ;;  %s45_s9 = sadd.s32 1, %s2320_s26 }
   0xb   : > { %p38_p0 = scmp.ge.s32.totalorder %s36_s8, 2  ;;  %p52_p1 = scmp.ne.s32.totalorder %s2320_s26, %s2316_s25 }
   0xc   : > { %p53_p2 = scmp.eq.s32.totalorder %s2332_s29, 0  ;;  %p58_p4 = scmp.ne.s32.totalorder %s2316_s25, %s2312_s24 }
   0xd   : > { %s3442_s8 = smov (%p38_p0, %s36_s8), 0  ;;  %p59_p5 = scmp.eq.s32.totalorder %s3360_s30, 0 }
   0xe   : > { %3388 = sst [smem:[#allocation10_spill]] %s3442_s8  ;;  %p54_p3 = por %p53_p2, %p52_p1 }
   0xf   : > { %s40_s10 = ssub.s32 %s2328_s28, %s3442_s8  ;;  %p2425_p7 = por %p59_p5, %p58_p4 }
  0x10   : > { %p43_p6 = scmp.eq.s32.totalorder %s40_s10, 0  ;;  %p2138_p8 = scmp.lt.s32.totalorder %s2332_s29, 2 }
  0x11   : > { %s278_s13 = sand.u32 1, %s2320_s26   ;;  %s2435_s14 = sshll.u32 %s2328_s28, 10 }
  0x12   : > { %s2431_s12 = scalar_select %p43_p6, %s2320_s26, %s45_s9  }
  0x13   : > { %s2439_s15 = sshll.u32 %s278_s13, 6  ;;  %p2441_p9 = pnand %p2138_p8, %p54_p3 }
  0x14   : > { %s302_s17 = sand.u32 1, %s2332_s29   ;;  %s3391_s1 = sld [smem:[#allocation32_spill]] }
  0x15   : > { %s306_s21 = scalar_lea.vmem [#allocation4], %s2439_s15  ;;  %p2101_p10 = scmp.ge.s32.totalorder %s2332_s29, 1 }
  0x16   : > { %s316_s22 = sshll.u32 %s306_s21, 4  ;;  %s2452_s23 = scalar_lea.sflag [#allocation5], %s302_s17  ;;  %s317_s22 = int_to_ptr.vmem [resolvable:$true] %s316_s22 }
  0x17   : > { %p2196_p11 = pneg %p2441_p9  ;;  %s2207_s24 = scalar_lea.vmem %s317_s22, 1024 }
  0x18   : > { %p2208_p12 = scmp.ne.s32.totalorder %s317_s22, %s2207_s24  ;;  %s2334_s9 = smov [#allocation4]  }
  0x19   : > { %s2212_s10 = sshll.u32 %s2334_s9, 4  ;;  %s2213_s10 = int_to_ptr.vmem [resolvable:$false] %s2212_s10 }
  0x1a   : > { %s315_s20 = scalar_lea.hbm %s3391_s1, %s2435_s14  ;;  %p2210_p13 = pnand %p2208_p12, %p2196_p11 }
  0x1b   : > { %s2214_s30 = scalar_lea.vmem %s2213_s10, 2048  ;;  %p2215_p1 = scmp.lt.s32.totalorder %s317_s22, %s2213_s10 }
  0x1c   : > { %p2211_p0 = pneg %p2210_p13  ;;  %p2216_p2 = scmp.lt.s32.totalorder %s2214_s30, %s2207_s24 }
  0x1e   : > { %p2217_p3 = por %p2216_p2, %p2215_p1 }
  0x20   : > { %p2218_p4 = pnand %p2217_p3, %p2211_p0 }
  0x22   : > { %2221 = shalt.err (!%p2218_p4)
}
  0x23   : > { %s3362_s18 = smov 128   ;;  %s2336_s17 = smov 8  }
  0x24   : > { %2134 = dma.hbm_to_vmem [thread:$0]  (!%p2441_p9), %s315_s20, 1024, %s317_s22, %s2452_s23, %s3362_s18, %s3362_s18, %s2336_s17  }
  0x25   : > { %p348_p5 = scmp.lt.s32.totalorder %s2332_s29, 3  ;;  %s3393_s0 = sld [smem:[#allocation31_spill]] }
  0x26   : > { %s282_s9 = scalar_lea.vmem [#allocation2], %s2439_s15  ;;  %s279_s1 = scalar_lea.sflag [#allocation3], %s278_s13 }
  0x27   : > { %p2468_p6 = pnand %p2101_p10, %p348_p5  ;;  %s292_s10 = sshll.u32 %s282_s9, 4  ;;  %s293_s10 = int_to_ptr.vmem [resolvable:$true] %s292_s10 }
  0x28   : > { %s2235_s8 = scalar_lea.vmem %s293_s10, 1024  ;;  %s2337_s20 = smov [#allocation2]  }
  0x29   : > { %p2236_p8 = scmp.ne.s32.totalorder %s293_s10, %s2235_s8  ;;  %s2240_s22 = sshll.u32 %s2337_s20, 4  ;;  %s2241_s22 = int_to_ptr.vmem [resolvable:$false] %s2240_s22 }
  0x2a   : > { %s2242_s18 = scalar_lea.vmem %s2241_s22, 2048  ;;  %p2243_p10 = scmp.lt.s32.totalorder %s293_s10, %s2241_s22 }
  0x2b   : > { %s291_s24 = scalar_lea.hbm %s3393_s0, %s2435_s14  ;;  %p2238_p12 = pnand %p2236_p8, %p2196_p11 }
  0x2c   : > { %p2244_p0 = scmp.lt.s32.totalorder %s2242_s18, %s2235_s8 }
  0x2d   : > { %p2239_p13 = pneg %p2238_p12 }
  0x2e   : > { %p2245_p1 = por %p2244_p0, %p2243_p10 }
  0x30   : > { %p2246_p2 = pnand %p2245_p1, %p2239_p13 }
  0x32   : > { %2249 = shalt.err (!%p2246_p2)
}
  0x33   : > { %s3394_s19 = smov 128   ;;  %s339_s9 = scalar_lea.hbm %s3354_s2, %s2435_s14 }
  0x34   : > { %2131 = dma.hbm_to_vmem [thread:$0]  (!%p2441_p9), %s291_s24, 1024, %s293_s10, %s279_s1, %s3394_s19, %s3394_s19, %s2336_s17  }
  0x35   : > { %s330_s20 = scalar_lea.vmem [#allocation6], %s2439_s15  ;;  %s2338_s18 = smov [#allocation6]  }
  0x36   : > { %s340_s0 = sshll.u32 %s330_s20, 4  ;;  %s2268_s22 = sshll.u32 %s2338_s18, 4  ;;  %s341_s0 = int_to_ptr.vmem [resolvable:$true] %s340_s0  ;;  %s2269_s22 = int_to_ptr.vmem [resolvable:$false] %s2268_s22 }
  0x37   : > { %s2263_s8 = scalar_lea.vmem %s341_s0, 1024  ;;  %s2270_s28 = scalar_lea.vmem %s2269_s22, 2048 }
  0x38   : > { %p2264_p3 = scmp.ne.s32.totalorder %s341_s0, %s2263_s8  ;;  %p2271_p8 = scmp.lt.s32.totalorder %s341_s0, %s2269_s22 }
  0x39   : > { %p2272_p12 = scmp.lt.s32.totalorder %s2270_s28, %s2263_s8 }
  0x3a   : > { %p2266_p4 = pnand %p2264_p3, %p2196_p11 }
  0x3b   : > { %p2273_p13 = por %p2272_p12, %p2271_p8 }
  0x3c   : > { %p2267_p5 = pneg %p2266_p4 }
  0x3e   : > { %p2274_p10 = pnand %p2273_p13, %p2267_p5 }
  0x40   : > { %2277 = shalt.err (!%p2274_p10)
}
  0x41   : > { %2137 = dma.hbm_to_vmem [thread:$0]  (!%p2441_p9), %s339_s9, 1024, %s341_s0, %s2452_s23, %s3394_s19, %s3394_s19, %s2336_s17  }
  0x42   : > { %352 = sbr.rel (%p2468_p6) target bundleno = 790 (0x316), region = 32 }
  0x47   : > { %s354_s1 = sand.u32 1, %s2316_s25  }
  0x48   : > { %s2504_s14 = sshll.u32 %s354_s1, 6  ;;  %s355_s28 = scalar_lea.sflag [#allocation3], %s354_s1 }
  0x49   : > { %s2507_s15 = scalar_lea.vmem [#allocation2], %s2504_s14 }
  0x4a   : > { %2303 = dma.done.wait (%p2425_p7), %s355_s28, 1024  }
  0x4b   : > { %2305 = vsyncadd (%p2425_p7), %s355_s28, 4294966272  ;;  %s3395_s16 = sadd.s32 4294967295, %s2332_s29   ;;  %s2516_s17 = scalar_lea.vmem [#allocation4], %s2504_s14 }
  0x4c   : > { %s363_s0 = sand.u32 1, %s3395_s16  }
  0x4d   : > { %s364_s23 = scalar_lea.sflag [#allocation5], %s363_s0 }
  0x4e   : > { %2307 = dma.done.wait (%p2425_p7), %s364_s23, 2048  }
  0x4f   : > { %2309 = vsyncadd (%p2425_p7), %s364_s23, 4294965248  ;;  %v2523_v0 = vld [vmem:[%s2507_s15 + $0x10] sm:$0xff]  ;;  %v2526_v1 = vld [vmem:[%s2507_s15] sm:$0xff]  ;;  %s2339_s30 = smov 1   ;;  %vm519_vm0 = vcmask 1040384   ;;  %vm684_vm1 = vcmask 1046528  }
  0x50   : > { %1131 = vrot.lane.b32.xlu1 %v2523_v0, %s2339_s30  ;;  %1127 = vrot.lane.b32.xlu0 %v2526_v1, %s2339_s30  ;;  %v2533_v2 = vld [vmem:[%s2507_s15 + $0x18] sm:$0xff]  ;;  %v2536_v3 = vld [vmem:[%s2507_s15 + $0x8] sm:$0xff]  ;;  %v523_v6 = vrot.slane %v2523_v0, 7  ;;  %v520_v12 = vrot.slane %v2526_v1, 7  ;;  %vm768_vm2 = vcmask 1045504   ;;  %vm805_vm3 = vcmask 1043456  }
  0x51   : > { %v2539_v4 = vld [vmem:[%s2516_s17 + $0x18] sm:$0xff]  ;;  %v2542_v5 = vld [vmem:[%s2516_s17 + $0x10] sm:$0xff]  ;;  %v524_v7 = vrot.slane %v2533_v2, 7  ;;  %v2552_v9 = vld [vmem:[%s2516_s17 + $0x8] sm:$0xff]  ;;  %v521_v13 = vrot.slane %v2536_v3, 7  ;;  %s2693_s11 = scalar_lea.vmem [#allocation6], %s2504_s14 }
  0x52   : > { %v568_v8 = vrot.slane %v2539_v4, 7  ;;  %v2555_v10 = vld [vmem:[%s2516_s17] sm:$0xff]  ;;  %v567_v11 = vrot.slane %v2542_v5, 7  ;;  %v2561_v14 = vld [vmem:[%s2507_s15 + $0x28] sm:$0xff]  ;;  %v565_v18 = vrot.slane %v2552_v9, 7  ;;  %v2570_v19 = vsub.f32 %v2523_v0, %v523_v6  ;;  %v2597_v30 = vld [vmem:[%s2507_s15 + $0x38] sm:$0xff] }
  0x53   : > { %v2564_v15 = vld [vmem:[%s2507_s15 + $0x20] sm:$0xff]  ;;  %v525_v16 = vsel %vm519_vm0, %v523_v6, %v524_v7  ;;  %v564_v17 = vrot.slane %v2555_v10, 7  ;;  %v522_v24 = vsel %vm519_vm0, %v520_v12, %v521_v13  ;;  %v2584_v25 = vsub.f32 %v2526_v1, %v520_v12  ;;  %v2600_v31 = vld [vmem:[%s2507_s15 + $0x30] sm:$0xff]  ;;  %v2615_v40 = vld [vmem:[%s2516_s17 + $0x38] sm:$0xff]  ;;  %s2340_s24 = smov 127   ;;  %s2341_s10 = smov 126  }
  0x54   : > { %1133 = vrot.lane.b32.xlu1 %v2533_v2, %s2339_s30  ;;  %1129 = vrot.lane.b32.xlu0 %v2536_v3, %s2339_s30  ;;  %v2573_v20 = vsub.f32 %v2533_v2, %v525_v16  ;;  %v569_v21 = vsel %vm519_vm0, %v567_v11, %v568_v8  ;;  %v2577_v22 = vsub.f32 %v2542_v5, %v567_v11  ;;  %v702_v27 = vand.u32 2147483647, %v2570_v19  ;;  %v2618_v41 = vld [vmem:[%s2516_s17 + $0x30] sm:$0xff]  ;;  %v2655_v13 = vld [vmem:[%s2516_s17 + $0x20] sm:$0xff]  ;;  %s2342_s19 = smov 120   ;;  %s2343_s13 = smov 124  }
  0x55   : > { %v2580_v23 = vsub.f32 %v2539_v4, %v569_v21  ;;  %v566_v26 = vsel %vm519_vm0, %v564_v17, %v565_v18  ;;  %v2594_v29 = vsub.f32 %v2536_v3, %v522_v24  ;;  %v2605_v34 = vsub.f32 %v2555_v10, %v564_v17  ;;  %p458_p7 = scmp.lt.s32.totalorder %s2324_s27, 1 }
  0x56   : > { %3396 = vst [vmem:[#allocation11_spill] sm:$0xff] %v2573_v20  ;;  %v703_v28 = vand.u32 2147483647, %v2573_v20  ;;  %v710_v32 = vand.u32 2147483647, %v2577_v22  ;;  %v2608_v35 = vsub.f32 %v2552_v9, %v566_v26  ;;  %v529_v38 = vrot.slane %v2600_v31, 7 }
  0x57   : > { %3397 = vst [vmem:[#allocation12_spill] sm:$0xff] %v2580_v23  ;;  %3398 = vst [vmem:[#allocation13_spill] sm:$0xff] %v2594_v29  ;;  %v711_v33 = vand.u32 2147483647, %v2580_v23  ;;  %v700_v36 = vand.u32 2147483647, %v2584_v25 }
  0x58   : > { %1137 = vrot.lane.b32.xlu1 %v2561_v14, %s2339_s30  ;;  %1135 = vrot.lane.b32.xlu0 %v2564_v15, %s2339_s30  ;;  %3399 = vst [vmem:[#allocation14_spill] sm:$0xff] %v2608_v35  ;;  %v701_v37 = vand.u32 2147483647, %v2594_v29  ;;  %v530_v39 = vrot.slane %v2597_v30, 7  ;;  %v718_v42 = vadd.f32 %v710_v32, %v702_v27  ;;  %v708_v44 = vand.u32 2147483647, %v2605_v34 }
  0x59   : > { %v719_v43 = vadd.f32 %v711_v33, %v703_v28  ;;  %v709_v45 = vand.u32 2147483647, %v2608_v35  ;;  %v2628_v47 = vsub.f32 %v2600_v31, %v529_v38  ;;  %v573_v48 = vrot.slane %v2618_v41, 7  ;;  %s3444_s27 = smov (!%p458_p7, %s2324_s27), 1 }
  0x5a   : > { %v531_v46 = vsel %vm519_vm0, %v529_v38, %v530_v39  ;;  %v574_v49 = vrot.slane %v2615_v40, 7  ;;  %v735_v50 = vrot.slane %v718_v42, 1  ;;  %v716_v52 = vadd.f32 %v708_v44, %v700_v36  ;;  %v2668_v38 = vld [vmem:[%s2516_s17 + $0x28] sm:$0xff]  ;;  %s3262_s21 = sshll.u32 %s3444_s27, 5  ;;  %s502_s23 = scalar_lea.vmem %s3359_s7, %s3444_s27 }
  0x5b   : > { %3400 = vst [vmem:[#allocation15_spill] sm:$0xff] %v2628_v47  ;;  %v736_v51 = vrot.slane %v719_v43, 1  ;;  %v717_v53 = vadd.f32 %v709_v45, %v701_v37  ;;  %v2633_v54 = vsub.f32 %v2597_v30, %v531_v46  ;;  %v2637_v56 = vsub.f32 %v2618_v41, %v573_v48  ;;  %s3268_s8 = scalar_lea.vmem %s3355_s3, %s3262_s21  ;;  %s3277_s1 = scalar_lea.vmem %s3356_s4, %s3262_s21 }
  0x5c   : > { %1141 = vrot.lane.b32.xlu1 %v2597_v30, %s2339_s30  ;;  %1139 = vrot.lane.b32.xlu0 %v2600_v31, %s2339_s30  ;;  %v575_v55 = vsel %vm519_vm0, %v573_v48, %v574_v49  ;;  %v732_v59 = vrot.slane %v716_v52, 1  ;;  %v706_v63 = vand.u32 2147483647, %v2628_v47  ;;  %v526_v21 = vrot.slane %v2564_v15, 7  ;;  %s3291_s15 = scalar_lea.vmem %s3358_s6, %s3262_s21 }
  0x5d   : > { %3401 = vst [vmem:[#allocation16_spill] sm:$0xff] %v2633_v54  ;;  %3402 = vst [vmem:[#allocation17_spill] sm:$0xff] %v2637_v56  ;;  %v737_v57 = vsel %vm684_vm1, %v735_v50, %v736_v51  ;;  %v2640_v58 = vadd.f32 %v736_v51, %v719_v43  ;;  %v733_v60 = vrot.slane %v717_v53, 1  ;;  %v2647_v62 = vsub.f32 %v2615_v40, %v575_v55 }
  0x5e   : > { %v754_v61 = vadd.f32 %v737_v57, %v718_v42  ;;  %v707_v6 = vand.u32 2147483647, %v2633_v54  ;;  %v714_v12 = vand.u32 2147483647, %v2637_v56  ;;  %v527_v27 = vrot.slane %v2561_v14, 7 }
  0x5f   : > { %3403 = vst [vmem:[#allocation18_spill] sm:$0xff] %v2647_v62  ;;  %v773_v7 = vrot.slane %v2640_v58, 2  ;;  %v734_v8 = vsel %vm684_vm1, %v732_v59, %v733_v60  ;;  %v753_v11 = vadd.f32 %v733_v60, %v717_v53  ;;  %v715_v18 = vand.u32 2147483647, %v2647_v62 }
  0x60   : > { %1177 = vrot.lane.b32.xlu1 %v2552_v9, %s2339_s30  ;;  %1175 = vrot.lane.b32.xlu0 %v2555_v10, %s2339_s30  ;;  %v772_v16 = vrot.slane %v754_v61, 2  ;;  %v752_v17 = vadd.f32 %v734_v8, %v716_v52  ;;  %v722_v26 = vadd.f32 %v714_v12, %v706_v63  ;;  %v570_v28 = vrot.slane %v2655_v13, 7 }
  0x61   : > { %v770_v24 = vrot.slane %v753_v11, 2  ;;  %v792_v33 = vadd.f32 %v773_v7, %v2640_v58  ;;  %v723_v37 = vadd.f32 %v715_v18, %v707_v6  ;;  %v528_v44 = vsel %vm519_vm0, %v526_v21, %v527_v27  ;;  %v2711_v27 = vld [vmem:[%s2693_s11 + $0x10] sm:$0xff] }
  0x62   : > { %v774_v32 = vsel %vm768_vm2, %v772_v16, %v773_v7  ;;  %v769_v36 = vrot.slane %v752_v17, 2  ;;  %v741_v43 = vrot.slane %v722_v26, 1  ;;  %v2673_v49 = vsub.f32 %v2564_v15, %v526_v21  ;;  %v2696_v16 = vld [vmem:[%s2693_s11 + $0x8] sm:$0xff] }
  0x63   : > { %v791_v39 = vadd.f32 %v774_v32, %v754_v61  ;;  %v790_v42 = vadd.f32 %v770_v24, %v753_v11  ;;  %v810_v45 = vrot.slane %v792_v33, 4  ;;  %v742_v48 = vrot.slane %v723_v37, 1 }
  0x64   : > { %1181 = vrot.lane.b32.xlu1 %v2539_v4, %s2339_s30  ;;  %1179 = vrot.lane.b32.xlu0 %v2542_v5, %s2339_s30  ;;  %v771_v46 = vsel %vm768_vm2, %v769_v36, %v770_v24  ;;  %v2683_v57 = vsub.f32 %v2561_v14, %v528_v44  ;;  %v571_v59 = vrot.slane %v2668_v38, 7  ;;  %v2690_v12 = vsub.f32 %v2655_v13, %v570_v28 }
  0x65   : > { %v809_v50 = vrot.slane %v791_v39, 4  ;;  %v789_v51 = vadd.f32 %v771_v46, %v752_v17  ;;  %v807_v52 = vrot.slane %v790_v42, 4  ;;  %v743_v53 = vsel %vm684_vm1, %v741_v43, %v742_v48 }
  0x66   : > { %v2680_v55 = vadd.f32 %v742_v48, %v723_v37  ;;  %3404 = vst [vmem:[#allocation19_spill] sm:$0xff] %v2683_v57  ;;  %v758_v63 = vadd.f32 %v743_v53, %v722_v26  ;;  %v572_v8 = vsel %vm519_vm0, %v570_v28, %v571_v59  ;;  %v704_v24 = vand.u32 2147483647, %v2673_v49  ;;  %v2708_v26 = vld [vmem:[%s2693_s11] sm:$0xff]  ;;  %v2719_v37 = vld [vmem:[%s2693_s11 + $0x18] sm:$0xff] }
  0x67   : > { %v811_v60 = vsel %vm805_vm3, %v809_v50, %v810_v45  ;;  %v806_v61 = vrot.slane %v789_v51, 4  ;;  %v2700_v21 = vsub.f32 %v2668_v38, %v572_v8  ;;  %v705_v36 = vand.u32 2147483647, %v2683_v57  ;;  %v2729_v50 = vld [vmem:[%s2693_s11 + $0x30] sm:$0xff] }
  0x68   : > { %1185 = vrot.lane.b32.xlu1 %v2668_v38, %s2339_s30  ;;  %1183 = vrot.lane.b32.xlu0 %v2655_v13, %s2339_s30  ;;  %v823_v6 = vadd.f32 %v811_v60, %v791_v39  ;;  %v779_v7 = vrot.slane %v2680_v55, 2  ;;  %v778_v18 = vrot.slane %v758_v63, 2  ;;  %v712_v42 = vand.u32 2147483647, %v2690_v12 }
  0x69   : > { %v808_v17 = vsel %vm805_vm3, %v806_v61, %v807_v52  ;;  %3405 = vst [vmem:[#allocation20_spill] sm:$0xff] %v2700_v21  ;;  %v713_v43 = vand.u32 2147483647, %v2700_v21  ;;  %v611_v44 = vrot.slane %v2711_v27, 7  ;;  %v612_v48 = vrot.slane %v2719_v37, 7 }
  0x6a   : > { %v2714_v28 = vadd.f32 %v823_v6, %v2640_v58  ;;  %v822_v32 = vadd.f32 %v808_v17, %v789_v51  ;;  %v796_v33 = vadd.f32 %v779_v7, %v2680_v55  ;;  %v780_v39 = vsel %vm768_vm2, %v778_v18, %v779_v7  ;;  %v2743_v6 = vld [vmem:[%s2693_s11 + $0x38] sm:$0xff] }
  0x6b   : > { %v795_v58 = vadd.f32 %v780_v39, %v758_v63  ;;  %v720_v51 = vadd.f32 %v712_v42, %v704_v24  ;;  %v721_v52 = vadd.f32 %v713_v43, %v705_v36  ;;  %v2732_v53 = vsub.f32 %v2711_v27, %v611_v44 }
  0x6c   : > { %1189 = vrot.lane.b32.xlu1 %v2615_v40, %s2339_s30  ;;  %1187 = vrot.lane.b32.xlu0 %v2618_v41, %s2339_s30  ;;  %v2725_v45 = vadd.f32 %v822_v32, %v753_v11  ;;  %v816_v46 = vrot.slane %v796_v33, 4  ;;  %v608_v59 = vrot.slane %v2708_v26, 7  ;;  %v613_v60 = vsel %vm519_vm0, %v611_v44, %v612_v48 }
  0x6d   : > { %3406 = vst [vmem:[#allocation21_spill] sm:$0xff] %v2732_v53  ;;  %v815_v11 = vrot.slane %v795_v58, 4  ;;  %v609_v61 = vrot.slane %v2696_v16, 7  ;;  %v617_v63 = vrot.slane %v2729_v50, 7  ;;  %v738_v7 = vrot.slane %v720_v51, 1 }
  0x6e   : > { %v739_v8 = vrot.slane %v721_v52, 1  ;;  %v2746_v17 = vsub.f32 %v2719_v37, %v613_v60  ;;  %v917_v18 = vand.u32 2147483647, %v2732_v53  ;;  %v2752_v33 = vsub.f32 %v2708_v26, %v608_v59  ;;  %v2766_v60 = vld [vmem:[%s2693_s11 + $0x28] sm:$0xff] }
  0x6f   : > { %v817_v24 = vsel %vm805_vm3, %v815_v11, %v816_v46  ;;  %v610_v32 = vsel %vm519_vm0, %v608_v59, %v609_v61  ;;  %v618_v36 = vrot.slane %v2743_v6, 7  ;;  %vm1279_vm4 = vcmask 130056  }
  0x70   : > { %1225 = vrot.lane.b32.xlu1 %v2696_v16, %s2339_s30  ;;  %1223 = vrot.lane.b32.xlu0 %v2708_v26, %s2339_s30  ;;  %3407 = vst [vmem:[#allocation22_spill] sm:$0xff] %v2746_v17  ;;  %v825_v39 = vadd.f32 %v817_v24, %v795_v58  ;;  %v740_v42 = vsel %vm684_vm1, %v738_v7, %v739_v8  ;;  %v918_v44 = vand.u32 2147483647, %v2746_v17  ;;  %v934_v48 = vrot.slane %v917_v18, 1  ;;  %v2769_v58 = vld [vmem:[%s2693_s11 + $0x20] sm:$0xff]  ;;  %s3306_s11 = scalar_lea.vmem %s3357_s5, %s3262_s21 }
  0x71   : > { %v757_v43 = vadd.f32 %v739_v8, %v721_v52  ;;  %v756_v46 = vadd.f32 %v740_v42, %v720_v51  ;;  %v2762_v11 = vsub.f32 %v2696_v16, %v610_v32  ;;  %v915_v59 = vand.u32 2147483647, %v2752_v33 }
  0x72   : > { %v2772_v52 = vadd.f32 %v825_v39, %v2680_v55  ;;  %v935_v7 = vrot.slane %v918_v44, 1  ;;  %v619_v8 = vsel %vm519_vm0, %v617_v63, %v618_v36  ;;  %v2777_v32 = vsub.f32 %v2729_v50, %v617_v63 }
  0x73   : > { %3408 = vst [vmem:[#allocation23_spill] sm:$0xff] %v2762_v11  ;;  %v776_v61 = vrot.slane %v757_v43, 2  ;;  %v775_v24 = vrot.slane %v756_v46, 2  ;;  %v916_v51 = vand.u32 2147483647, %v2762_v11  ;;  %v931_v42 = vrot.slane %v915_v59, 1 }
  0x74   : > { %1229 = vrot.lane.b32.xlu1 %v2719_v37, %s2339_s30  ;;  %1227 = vrot.lane.b32.xlu0 %v2711_v27, %s2339_s30  ;;  %3409 = vst [vmem:[#allocation24_spill] sm:$0xff] %v2777_v32  ;;  %v936_v54 = vsel %vm684_vm1, %v934_v48, %v935_v7  ;;  %v954_v17 = vadd.f32 %v935_v7, %v918_v44  ;;  %v921_v63 = vand.u32 2147483647, %v2777_v32  ;;  %vm660_vm5 = vcmask 130049  }
  0x75   : > { %v794_v62 = vadd.f32 %v776_v61, %v757_v43  ;;  %v2781_v21 = vsub.f32 %v2743_v6, %v619_v8  ;;  %v777_v55 = vsel %vm768_vm2, %v775_v24, %v776_v61  ;;  %v953_v36 = vadd.f32 %v936_v54, %v917_v18 }
  0x76   : > { %v932_v39 = vrot.slane %v916_v51, 1  ;;  %v793_v11 = vadd.f32 %v777_v55, %v756_v46  ;;  %v971_v23 = vrot.slane %v954_v17, 2  ;;  %v940_v20 = vrot.slane %v921_v63, 1 }
  0x77   : > { %3410 = vst [vmem:[#allocation25_spill] sm:$0xff] %v2781_v21  ;;  %v813_v57 = vrot.slane %v794_v62, 4  ;;  %v922_v44 = vand.u32 2147483647, %v2781_v21  ;;  %v970_v48 = vrot.slane %v953_v36, 2  ;;  %v614_v18 = vrot.slane %v2769_v58, 7 }
  0x78   : > { %1233 = vrot.lane.b32.xlu1 %v2766_v60, %s2339_s30  ;;  %1231 = vrot.lane.b32.xlu0 %v2769_v58, %s2339_s30  ;;  %v933_v7 = vsel %vm684_vm1, %v931_v42, %v932_v39  ;;  %v952_v8 = vadd.f32 %v932_v39, %v916_v51  ;;  %v812_v35 = vrot.slane %v793_v11, 4  ;;  %v990_v29 = vadd.f32 %v971_v23, %v954_v17 }
  0x79   : > { %v951_v56 = vadd.f32 %v933_v7, %v915_v59  ;;  %v941_v47 = vrot.slane %v922_v44, 1  ;;  %v972_v54 = vsel %vm768_vm2, %v970_v48, %v971_v23  ;;  %v615_v46 = vrot.slane %v2766_v60, 7 }
  0x7a   : > { %v968_v62 = vrot.slane %v952_v8, 2  ;;  %v814_v61 = vsel %vm805_vm3, %v812_v35, %v813_v57  ;;  %v989_v24 = vadd.f32 %v972_v54, %v953_v36  ;;  %v1007_v51 = vrot.slane %v990_v29, 4 }
  0x7b   : > { %v967_v42 = vrot.slane %v951_v56, 2  ;;  %v824_v59 = vadd.f32 %v814_v61, %v793_v11  ;;  %v942_v39 = vsel %vm684_vm1, %v940_v20, %v941_v47  ;;  %v958_v7 = vadd.f32 %v941_v47, %v922_v44 }
  0x7c   : > { %1237 = vrot.lane.b32.xlu1 %v2743_v6, %s2339_s30  ;;  %1235 = vrot.lane.b32.xlu0 %v2729_v50, %s2339_s30  ;;  %v988_v55 = vadd.f32 %v968_v62, %v952_v8  ;;  %v1006_v21 = vrot.slane %v989_v24, 4  ;;  %v957_v53 = vadd.f32 %v942_v39, %v921_v63  ;;  %v616_v23 = vsel %vm519_vm0, %v614_v18, %v615_v46 }
  0x7d   : > { %v969_v32 = vsel %vm768_vm2, %v967_v42, %v968_v62  ;;  %v2806_v29 = vadd.f32 %v824_v59, %v757_v43  ;;  %v977_v11 = vrot.slane %v958_v7, 2  ;;  %v2810_v36 = vsub.f32 %v2769_v58, %v614_v18 }
  0x7e   : > { %v987_v35 = vadd.f32 %v969_v32, %v951_v56  ;;  %v1004_v57 = vrot.slane %v988_v55, 4  ;;  %v1008_v20 = vsel %vm805_vm3, %v1006_v21, %v1007_v51  ;;  %v976_v47 = vrot.slane %v957_v53, 2 }
  0x7f   : > { %v2813_v63 = vsub.f32 %v2766_v60, %v616_v23  ;;  %v1020_v44 = vadd.f32 %v1008_v20, %v989_v24  ;;  %v994_v54 = vadd.f32 %v977_v11, %v958_v7  ;;  %v919_v43 = vand.u32 2147483647, %v2810_v36 }
  0x80   : > { %836 = vrot.lane.b32.xlu1 %v2714_v28, %s2340_s24  ;;  %834 = vrot.lane.b32.xlu0 %v2725_v45, %s2340_s24  ;;  %v1003_v48 = vrot.slane %v987_v35, 4  ;;  %v978_v62 = vsel %vm768_vm2, %v976_v47, %v977_v11  ;;  %vm1302_vm6 = vcmask 121856   ;;  %vm668_vm7 = vcmask 130048  }
  0x81   : > { %3411 = vst [vmem:[#allocation26_spill] sm:$0xff] %v2813_v63  ;;  %v920_v56 = vand.u32 2147483647, %v2813_v63  ;;  %v2822_v21 = vadd.f32 %v1020_v44, %v954_v17  ;;  %v993_v18 = vadd.f32 %v978_v62, %v957_v53  ;;  %v1013_v46 = vrot.slane %v994_v54, 4 }
  0x82   : > { %v1005_v32 = vsel %vm805_vm3, %v1003_v48, %v1004_v57  ;;  %v937_v24 = vrot.slane %v919_v43, 1  ;;  %vm910_vm8 = vcmask 55297   ;;  %vm1542_vm9 = vcmask 47104  }
  0x83   : > { %3412 = vst [vmem:[#allocation27_spill] sm:$0xff] %v2822_v21  ;;  %v1019_v61 = vadd.f32 %v1005_v32, %v987_v35  ;;  %v938_v51 = vrot.slane %v920_v56, 1  ;;  %v1012_v42 = vrot.slane %v993_v18, 4  ;;  %vm698_vm10 = vcmask 0  }
  0x84   : > { %840 = vrot.lane.b32.xlu1 %v2772_v52, %s2340_s24  ;;  %838 = vrot.lane.b32.xlu0 %v2806_v29, %s2340_s24  ;;  %vm1316_vm11 = vcmask 8200  }
  0x85   : > { %v2825_v59 = vadd.f32 %v1019_v61, %v952_v8  ;;  %v939_v55 = vsel %vm684_vm1, %v937_v24, %v938_v51  ;;  %v956_v39 = vadd.f32 %v938_v51, %v920_v56  ;;  %v1014_v23 = vsel %vm805_vm3, %v1012_v42, %v1013_v46 }
  0x86   : > { %v955_v17 = vadd.f32 %v939_v55, %v919_v43  ;;  %v1022_v53 = vadd.f32 %v1014_v23, %v993_v18 }
  0x87   : > { %3413 = vst [vmem:[#allocation28_spill] sm:$0xff] %v2825_v59  ;;  %v974_v57 = vrot.slane %v956_v39, 2 }
  0x88   : > { %1033 = vrot.lane.b32.xlu1 %v2822_v21, %s2340_s24  ;;  %1031 = vrot.lane.b32.xlu0 %v2825_v59, %s2340_s24  ;;  %v973_v35 = vrot.slane %v955_v17, 2  ;;  %v2833_v11 = vadd.f32 %v1022_v53, %v958_v7 }
  0x89   : > { %v992_v20 = vadd.f32 %v974_v57, %v956_v39 }
  0x8a   : > { %3414 = vst [vmem:[#allocation29_spill] sm:$0xff] %v2833_v11  ;;  %v975_v8 = vsel %vm768_vm2, %v973_v35, %v974_v57 }
  0x8b   : > { %v991_v47 = vadd.f32 %v975_v8, %v955_v17  ;;  %v1010_v44 = vrot.slane %v992_v20, 4 }
  0x8c   : > { %1037 = vrot.lane.b32.xlu1 %v2833_v11, %s2340_s24 }
  0x8d   : > { %v1009_v48 = vrot.slane %v991_v47, 4 }
  0x8f   : > { %v1011_v54 = vsel %vm805_vm3, %v1009_v48, %v1010_v44 }
  0x90   : > { %v1021_v62 = vadd.f32 %v1011_v54, %v991_v47 }
  0x92   : > { %v2839_v43 = vadd.f32 %v1021_v62, %v956_v39 }
  0x94   : > { %3415 = vst [vmem:[#allocation30_spill] sm:$0xff] %v2839_v43  ;;  %1035 = vrot.lane.b32.xlu0 %v2839_v43, %s2340_s24 }
  0xc2   : > { %v1132_v56 = vpop.permute.xlu1 %1131  ;;  %v1128_v7 = vpop.permute.xlu0 %1127 }
  0xc3   : > { %v1151_v42 = vsub.f32 %v2526_v1, %v1128_v7  ;;  %v1153_v57 = vsub.f32 %v2523_v0, %v1132_v56 }
  0xc5   : > { %v1318_v35 = vand.u32 2147483647, %v1151_v42 }
  0xc6   : > { %v1134_v32 = vpop.permute.xlu1 %1133  ;;  %v1130_v18 = vpop.permute.xlu0 %1129 }
  0xc7   : > { %v1152_v55 = vsub.f32 %v2536_v3, %v1130_v18  ;;  %v1154_v20 = vsub.f32 %v2533_v2, %v1134_v32 }
  0xc9   : > { %v1319_v47 = vand.u32 2147483647, %v1152_v55  ;;  %v1321_v7 = vand.u32 2147483647, %v1154_v20 }
  0xca   : > { %v1138_v46 = vpop.permute.xlu1 %1137  ;;  %v1136_v61 = vpop.permute.xlu0 %1135 }
  0xcb   : > { %v1156_v8 = vsub.f32 %v2561_v14, %v1138_v46  ;;  %v1155_v44 = vsub.f32 %v2564_v15, %v1136_v61  ;;  %v1320_v14 = vand.u32 2147483647, %v1153_v57 }
  0xcd   : > { %v1323_v32 = vand.u32 2147483647, %v1156_v8  ;;  %v1322_v15 = vand.u32 2147483647, %v1155_v44 }
  0xce   : > { %v1142_v24 = vpop.permute.xlu1 %1141  ;;  %v1140_v51 = vpop.permute.xlu0 %1139 }
  0xcf   : > { %v2852_v3 = vsub.f32 %v2597_v30, %v1142_v24  ;;  %v2855_v54 = vsub.f32 %v2600_v31, %v1140_v51 }
  0xd1   : > { %v1325_v30 = vand.u32 2147483647, %v2852_v3  ;;  %v1324_v31 = vand.u32 2147483647, %v2855_v54 }
  0xd2   : > { %v1178_v23 = vpop.permute.xlu1 %1177  ;;  %v1176_v17 = vpop.permute.xlu0 %1175 }
  0xd3   : > { %v1200_v39 = vsub.f32 %v2552_v9, %v1178_v23  ;;  %v1199_v53 = vsub.f32 %v2555_v10, %v1176_v17 }
  0xd5   : > { %v1327_v48 = vand.u32 2147483647, %v1200_v39  ;;  %v1326_v1 = vand.u32 2147483647, %v1199_v53  ;;  %v1256_v24 = vadd.f32 %v1200_v39, %v1152_v55 }
  0xd6   : > { %v1182_v9 = vpop.permute.xlu1 %1181  ;;  %v1180_v10 = vpop.permute.xlu0 %1179 }
  0xd7   : > { %v1335_v62 = vadd.f32 %v1327_v48, %v1319_v47  ;;  %v1334_v0 = vadd.f32 %v1326_v1, %v1318_v35  ;;  %v1202_v56 = vsub.f32 %v2539_v4, %v1182_v9  ;;  %v1201_v2 = vsub.f32 %v2542_v5, %v1180_v10 }
  0xd8   : > { %v1255_v48 = vadd.f32 %v1199_v53, %v1151_v42 }
  0xd9   : > { %v1351_v18 = vrot.slane %v1335_v62, 1  ;;  %v1350_v46 = vrot.slane %v1334_v0, 1  ;;  %v1329_v61 = vand.u32 2147483647, %v1202_v56  ;;  %v1328_v51 = vand.u32 2147483647, %v1201_v2 }
  0xda   : > { %v1186_v23 = vpop.permute.xlu1 %1185  ;;  %v1184_v17 = vpop.permute.xlu0 %1183  ;;  %v2867_v11 = vadd.f32 %v1202_v56, %v1154_v20  ;;  %v2869_v21 = vadd.f32 %v1201_v2, %v1153_v57 }
  0xdb   : > { %v2861_v35 = vadd.f32 %v1351_v18, %v1335_v62  ;;  %v1352_v4 = vsel %vm684_vm1, %v1350_v46, %v1351_v18  ;;  %v1337_v5 = vadd.f32 %v1329_v61, %v1321_v7  ;;  %v1204_v47 = vsub.f32 %v2668_v38, %v1186_v23 }
  0xdc   : > { %v1370_v1 = vadd.f32 %v1352_v4, %v1334_v0  ;;  %v1336_v9 = vadd.f32 %v1328_v51, %v1320_v14  ;;  %v1203_v10 = vsub.f32 %v2655_v13, %v1184_v17 }
  0xdd   : > { %v1387_v63 = vrot.slane %v2861_v35, 2  ;;  %v1354_v55 = vrot.slane %v1337_v5, 1  ;;  %v1331_v39 = vand.u32 2147483647, %v1204_v47  ;;  %v2876_v20 = vadd.f32 %v1204_v47, %v1156_v8 }
  0xde   : > { %v1386_v43 = vrot.slane %v1370_v1, 2  ;;  %v1353_v62 = vrot.slane %v1336_v9, 1  ;;  %v1330_v59 = vand.u32 2147483647, %v1203_v10  ;;  %v1190_v18 = vpop.permute.xlu1 %1189  ;;  %v1188_v7 = vpop.permute.xlu0 %1187  ;;  %v2878_v0 = vadd.f32 %v1203_v10, %v1155_v44 }
  0xdf   : > { %v2871_v46 = vadd.f32 %v1354_v55, %v1337_v5  ;;  %v1339_v38 = vadd.f32 %v1331_v39, %v1323_v32  ;;  %v1206_v42 = vsub.f32 %v2615_v40, %v1190_v18  ;;  %v1205_v13 = vsub.f32 %v2618_v41, %v1188_v7 }
  0xe0   : > { %v1355_v53 = vsel %vm684_vm1, %v1353_v62, %v1354_v55  ;;  %v1338_v57 = vadd.f32 %v1330_v59, %v1322_v15  ;;  %v1388_v14 = vsel %vm768_vm2, %v1386_v43, %v1387_v63  ;;  %v2884_v61 = vadd.f32 %v1387_v63, %v2861_v35 }
  0xe1   : > { %v2880_v56 = vadd.f32 %v1355_v53, %v1336_v9  ;;  %v1357_v2 = vrot.slane %v1339_v38, 1  ;;  %v1390_v40 = vrot.slane %v2871_v46, 2  ;;  %v1333_v41 = vand.u32 2147483647, %v1206_v42 }
  0xe2   : > { %v1356_v32 = vrot.slane %v1338_v57, 1  ;;  %v1332_v51 = vand.u32 2147483647, %v1205_v13  ;;  %v1226_v23 = vpop.permute.xlu1 %1225  ;;  %v1224_v17 = vpop.permute.xlu0 %1223  ;;  %v2888_v8 = vadd.f32 %v1206_v42, %v2852_v3  ;;  %v2891_v59 = vadd.f32 %v1205_v13, %v2855_v54 }
  0xe3   : > { %v1248_v44 = vsub.f32 %v2696_v16, %v1226_v23  ;;  %v1247_v43 = vsub.f32 %v2708_v26, %v1224_v17  ;;  %v2895_v15 = vadd.f32 %v1357_v2, %v1339_v38  ;;  %v1341_v4 = vadd.f32 %v1333_v41, %v1325_v30 }
  0xe4   : > { %v1358_v63 = vsel %vm684_vm1, %v1356_v32, %v1357_v2  ;;  %v1340_v5 = vadd.f32 %v1332_v51, %v1324_v31  ;;  %v1389_v47 = vrot.slane %v2880_v56, 2  ;;  %v2902_v42 = vadd.f32 %v1388_v14, %v1370_v1 }
  0xe5   : > { %v2899_v9 = vadd.f32 %v1358_v63, %v1338_v57  ;;  %v1264_v10 = vsub.f32 %v1256_v24, %v1248_v44  ;;  %v1548_v3 = vand.u32 2147483647, %v1248_v44  ;;  %v1360_v55 = vrot.slane %v1341_v4, 1 }
  0xe6   : > { %v1359_v39 = vrot.slane %v1340_v5, 1  ;;  %v1263_v54 = vsub.f32 %v1255_v48, %v1247_v43  ;;  %v1547_v62 = vand.u32 2147483647, %v1247_v43  ;;  %v1230_v18 = vpop.permute.xlu1 %1229  ;;  %v1228_v16 = vpop.permute.xlu0 %1227  ;;  %v1393_v30 = vrot.slane %v2895_v15, 2 }
  0xe7   : > { %v1272_v7 = vand.u32 2147483647, %v1264_v10  ;;  %v1564_v26 = vrot.slane %v1548_v3, 1  ;;  %v1250_v38 = vsub.f32 %v2719_v37, %v1230_v18  ;;  %v1392_v24 = vrot.slane %v2899_v9, 2 }
  0xe8   : > { %v1361_v31 = vsel %vm684_vm1, %v1359_v39, %v1360_v55  ;;  %v1271_v13 = vand.u32 2147483647, %v1263_v54  ;;  %v1563_v53 = vrot.slane %v1547_v62, 1  ;;  %v2907_v57 = vadd.f32 %v1360_v55, %v1341_v4 }
  0xe9   : > { %v2909_v48 = vadd.f32 %v1564_v26, %v1548_v3  ;;  %v1266_v2 = vsub.f32 %v2867_v11, %v1250_v38  ;;  %v2912_v32 = vadd.f32 %v1361_v31, %v1340_v5  ;;  %v1287_v37 = vsel %vm1279_vm4, %v1272_v7, 0.0 }
  0xea   : > { %v1565_v1 = vsel %vm684_vm1, %v1563_v53, %v1564_v26  ;;  %v1550_v14 = vand.u32 2147483647, %v1250_v38  ;;  %v1234_v41 = vpop.permute.xlu1 %1233  ;;  %v1232_v51 = vpop.permute.xlu0 %1231  ;;  %v1280_v17 = vsel %vm1279_vm4, %v1271_v13, 0.0  ;;  %v1249_v4 = vsub.f32 %v2711_v27, %v1228_v16 }
  0xeb   : > { %v1600_v23 = vrot.slane %v2909_v48, 2  ;;  %v1583_v44 = vadd.f32 %v1565_v1, %v1547_v62  ;;  %v1274_v43 = vand.u32 2147483647, %v1266_v2  ;;  %v1252_v11 = vsub.f32 %v2766_v60, %v1234_v41 }
  0xec   : > { %v1567_v63 = vrot.slane %v1550_v14, 1  ;;  %v1251_v5 = vsub.f32 %v2769_v58, %v1232_v51  ;;  %v1422_v39 = vrot.slane %v2902_v42, 4  ;;  %v1265_v62 = vsub.f32 %v2869_v21, %v1249_v4 }
  0xed   : > { %v2922_v10 = vadd.f32 %v1600_v23, %v2909_v48  ;;  %v1599_v3 = vrot.slane %v1583_v44, 2  ;;  %v1288_v55 = vsel %vm1279_vm4, %v1274_v43, 0.0  ;;  %v1549_v7 = vand.u32 2147483647, %v1249_v4 }
  0xee   : > { %v1289_v54 = vadd.f32 %v1288_v55, %v1287_v37  ;;  %v2926_v18 = vadd.f32 %v1567_v63, %v1550_v14  ;;  %v1268_v58 = vsub.f32 %v2876_v20, %v1252_v11  ;;  %v1552_v16 = vand.u32 2147483647, %v1252_v11  ;;  %v1238_v14 = vpop.permute.xlu1 %1237  ;;  %v1236_v20 = vpop.permute.xlu0 %1235 }
  0xef   : > { %v1636_v27 = vrot.slane %v2922_v10, 4  ;;  %v1601_v60 = vsel %vm768_vm2, %v1599_v3, %v1600_v23  ;;  %v1273_v31 = vand.u32 2147483647, %v1265_v62  ;;  %v1566_v13 = vrot.slane %v1549_v7, 1 }
  0xf0   : > { %v1619_v26 = vadd.f32 %v1601_v60, %v1583_v44  ;;  %v1603_v38 = vrot.slane %v2926_v18, 2  ;;  %v1276_v53 = vand.u32 2147483647, %v1268_v58  ;;  %v1570_v2 = vrot.slane %v1552_v16, 1 }
  0xf1   : > { %v1267_v37 = vsub.f32 %v2878_v0, %v1251_v5  ;;  %v1551_v1 = vand.u32 2147483647, %v1251_v5  ;;  %v1281_v51 = vsel %vm1279_vm4, %v1273_v31, 0.0  ;;  %v1568_v23 = vsel %vm684_vm1, %v1566_v13, %v1567_v63 }
  0xf2   : > { %v1635_v21 = vrot.slane %v1619_v26, 4  ;;  %v1622_v41 = vadd.f32 %v1603_v38, %v2926_v18  ;;  %v1282_v43 = vadd.f32 %v1281_v51, %v1280_v17  ;;  %v1585_v44 = vadd.f32 %v1568_v23, %v1549_v7 }
  0xf3   : > { %v1290_v4 = vsel %vm1279_vm4, %v1276_v53, 0.0  ;;  %v2938_v11 = vadd.f32 %v1570_v2, %v1552_v16  ;;  %v1275_v3 = vand.u32 2147483647, %v1267_v37  ;;  %v1569_v55 = vrot.slane %v1551_v1, 1 }
  0xf4   : > { %v1639_v10 = vrot.slane %v1622_v41, 4  ;;  %v1254_v0 = vsub.f32 %v2743_v6, %v1238_v14  ;;  %v1602_v5 = vrot.slane %v1585_v44, 2  ;;  %v1253_v60 = vsub.f32 %v2729_v50, %v1236_v20 }
  0xf5   : > { %v1606_v62 = vrot.slane %v2938_v11, 2  ;;  %v1291_v58 = vadd.f32 %v1290_v4, %v1289_v54  ;;  %v1283_v63 = vsel %vm1279_vm4, %v1275_v3, 0.0  ;;  %v1571_v17 = vsel %vm684_vm1, %v1569_v55, %v1570_v2 }
  0xf6   : > { %v1270_v7 = vsub.f32 %v2888_v8, %v1254_v0  ;;  %v1554_v31 = vand.u32 2147483647, %v1254_v0  ;;  %v1604_v16 = vsel %vm768_vm2, %v1602_v5, %v1603_v38  ;;  %v1587_v53 = vadd.f32 %v1571_v17, %v1551_v1 }
  0xf7   : > { %v1624_v13 = vadd.f32 %v1606_v62, %v2938_v11  ;;  %v1269_v6 = vsub.f32 %v2891_v59, %v1253_v60  ;;  %v1621_v37 = vadd.f32 %v1604_v16, %v1585_v44  ;;  %v1553_v51 = vand.u32 2147483647, %v1253_v60 }
  0xf8   : > { %v1278_v14 = vand.u32 2147483647, %v1270_v7  ;;  %v1573_v41 = vrot.slane %v1554_v31, 1  ;;  %v1605_v54 = vrot.slane %v1587_v53, 2  ;;  %v1284_v20 = vadd.f32 %v1283_v63, %v1282_v43 }
  0xf9   : > { %v1642_v50 = vrot.slane %v1624_v13, 4  ;;  %v1277_v23 = vand.u32 2147483647, %v1269_v6  ;;  %v1638_v4 = vrot.slane %v1621_v37, 4  ;;  %v1572_v3 = vrot.slane %v1553_v51, 1 }
  0xfa   : > { %v1590_v2 = vadd.f32 %v1573_v41, %v1554_v31  ;;  %v1292_v8 = vsel %vm1279_vm4, %v1278_v14, 0.0  ;;  %v1607_v38 = vsel %vm768_vm2, %v1605_v54, %v1606_v62  ;;  %v1637_v59 = vsel %vm805_vm3, %v1635_v21, %v1636_v27 }
  0xfb   : > { %v1293_v55 = vadd.f32 %v1292_v8, %v1291_v58  ;;  %v1285_v1 = vsel %vm1279_vm4, %v1277_v23, 0.0  ;;  %v1623_v44 = vadd.f32 %v1607_v38, %v1587_v53  ;;  %v1574_v5 = vsel %vm684_vm1, %v1572_v3, %v1573_v41 }
  0xfc   : > { %v1609_v0 = vrot.slane %v1590_v2, 2  ;;  %v1286_v60 = vadd.f32 %v1285_v1, %v1284_v20  ;;  %v1589_v17 = vadd.f32 %v1574_v5, %v1553_v51  ;;  %v1640_v43 = vsel %vm805_vm3, %v1638_v4, %v1639_v10 }
  0xfd   : > { %1298 = vrot.lane.b32.xlu1 %v1293_v55, %s2340_s24  ;;  %v1651_v63 = vadd.f32 %v1637_v59, %v1619_v26  ;;  %v1423_v7 = vrot.slane %v2884_v61, 4  ;;  %v1641_v31 = vrot.slane %v1623_v44, 4  ;;  %v1652_v58 = vadd.f32 %v1640_v43, %v1621_v37  ;;  %v835_v43 = vpop.permute.xlu0 %834 }
  0xfe   : > { %v1626_v62 = vadd.f32 %v1609_v0, %v1590_v2  ;;  %1296 = vrot.lane.b32.xlu0 %v1286_v60, %s2340_s24  ;;  %v1391_v27 = vsel %vm768_vm2, %v1389_v47, %v1390_v40  ;;  %v1396_v21 = vrot.slane %v2907_v57, 2  ;;  %v1395_v16 = vrot.slane %v2912_v32, 2 }
  0xff   : > { %v1608_v13 = vrot.slane %v1589_v17, 2  ;;  %v1408_v26 = vadd.f32 %v1391_v27, %v2880_v56  ;;  %v1656_v61 = vadd.f32 %v1652_v58, %v2926_v18  ;;  %v1655_v10 = vadd.f32 %v1651_v63, %v2909_v48 }
 0x100   : > { %v1643_v53 = vsel %vm805_vm3, %v1641_v31, %v1642_v50  ;;  %v1424_v6 = vsel %vm805_vm3, %v1422_v39, %v1423_v7  ;;  %v1409_v14 = vadd.f32 %v1390_v40, %v2871_v46  ;;  %v1645_v41 = vrot.slane %v1626_v62, 4 }
 0x101   : > { %v1610_v37 = vsel %vm768_vm2, %v1608_v13, %v1609_v0  ;;  %v1653_v47 = vadd.f32 %v1643_v53, %v1623_v44  ;;  %1665 = vrot.lane.b32.xlu1 %v1656_v61, %s2340_s24  ;;  %v1425_v56 = vrot.slane %v1408_v26, 4  ;;  %v1394_v48 = vsel %vm768_vm2, %v1392_v24, %v1393_v30  ;;  %v839_v7 = vpop.permute.xlu0 %838 }
 0x102   : > { %v1625_v51 = vadd.f32 %v1610_v37, %v1589_v17  ;;  %1663 = vrot.lane.b32.xlu0 %v1655_v10, %s2340_s24  ;;  %v1438_v18 = vadd.f32 %v1424_v6, %v2902_v42  ;;  %v1410_v50 = vadd.f32 %v1394_v48, %v2899_v9  ;;  %v1411_v40 = vadd.f32 %v1393_v30, %v2895_v15 }
 0x103   : > { %v1657_v39 = vadd.f32 %v1653_v47, %v2938_v11  ;;  %v1426_v23 = vrot.slane %v1409_v14, 4  ;;  %v1397_v20 = vsel %vm768_vm2, %v1395_v16, %v1396_v21  ;;  %v1413_v4 = vadd.f32 %v1396_v21, %v2907_v57 }
 0x104   : > { %v1644_v54 = vrot.slane %v1625_v51, 4  ;;  %v1428_v3 = vrot.slane %v1410_v50, 4  ;;  %v1429_v8 = vrot.slane %v1411_v40, 4  ;;  %v1412_v24 = vadd.f32 %v1397_v20, %v2912_v32  ;;  %v3416_v40 = vld [vmem:[#allocation21_spill] sm:$0xff] }
 0x105   : > { %v1427_v9 = vsel %vm805_vm3, %v1425_v56, %v1426_v23  ;;  %v1442_v55 = vadd.f32 %v1438_v18, %v2861_v35  ;;  %v1432_v59 = vrot.slane %v1413_v4, 4  ;;  %v1032_v62 = vpop.permute.xlu0 %1031  ;;  %v3040_v56 = vadd.f32 %v835_v43, %v2725_v45 }
 0x106   : > { %1667 = vrot.lane.b32.xlu0 %v1657_v39, %s2340_s24  ;;  %v1646_v42 = vsel %vm805_vm3, %v1644_v54, %v1645_v41  ;;  %v1430_v38 = vsel %vm805_vm3, %v1428_v3, %v1429_v8  ;;  %v1431_v30 = vrot.slane %v1412_v24, 4  ;;  %v1439_v0 = vadd.f32 %v1427_v9, %v1408_v26 }
 0x107   : > { %v1654_v11 = vadd.f32 %v1646_v42, %v1625_v51  ;;  %v1440_v1 = vadd.f32 %v1430_v38, %v1410_v50  ;;  %v636_v48 = vadd.f32 %v2605_v34, %v2584_v25  ;;  %v640_v18 = vadd.f32 %v2690_v12, %v2673_v49  ;;  %v3417_v25 = vld [vmem:[#allocation15_spill] sm:$0xff]  ;;  %v3418_v34 = vld [vmem:[#allocation17_spill] sm:$0xff]  ;;  %v3419_v12 = vld [vmem:[#allocation24_spill] sm:$0xff] }
 0x108   : > { %v1433_v32 = vsel %vm805_vm3, %v1431_v30, %v1432_v59  ;;  %v1443_v60 = vadd.f32 %v1439_v0, %v2871_v46  ;;  %v642_v23 = vadd.f32 %v3418_v34, %v3417_v25  ;;  %v3063_v49 = vadd.f32 %v839_v7, %v2806_v29  ;;  %v3420_v42 = vld [vmem:[#allocation28_spill] sm:$0xff]  ;;  %v3421_v30 = vld [vmem:[#allocation27_spill] sm:$0xff]  ;;  %v3423_v0 = vld [vmem:[#allocation29_spill] sm:$0xff] }
 0x109   : > { %v1658_v44 = vadd.f32 %v1654_v11, %v1590_v2  ;;  %v1444_v5 = vadd.f32 %v1440_v1, %v2895_v15  ;;  %v1441_v17 = vadd.f32 %v1433_v32, %v1412_v24  ;;  %v837_v2 = vpop.permute.xlu1 %836  ;;  %v1036_v58 = vpop.permute.xlu0 %1035  ;;  %v644_v50 = vsub.f32 %v636_v48, %v2752_v33  ;;  %v3422_v1 = vld [vmem:[#allocation30_spill] sm:$0xff]  ;;  %v3426_v34 = vld [vmem:[#allocation11_spill] sm:$0xff] }
 0x10a   : > { %1450 = vrot.lane.b32.xlu0 %v1442_v55, %s2340_s24  ;;  %v3055_v54 = vadd.f32 %v837_v2, %v2714_v28  ;;  %v650_v28 = vsub.f32 %v642_v23, %v3419_v12  ;;  %v3077_v9 = vadd.f32 %v1032_v62, %v3420_v42  ;;  %v3088_v59 = vadd.f32 %v1036_v58, %v3422_v1  ;;  %v3427_v23 = vld [vmem:[#allocation12_spill] sm:$0xff]  ;;  %v3430_v12 = vld [vmem:[#allocation23_spill] sm:$0xff] }
 0x10b   : > { %1669 = vrot.lane.b32.xlu1 %v1658_v44, %s2340_s24  ;;  %v3005_v35 = vadd.f32 %v1441_v17, %v2907_v57 }
 0x10c   : > { %v658_v24 = vand.u32 2147483647, %v650_v28  ;;  %v3431_v28 = vld [vmem:[#allocation22_spill] sm:$0xff] }
 0x10d   : > { %v841_v63 = vpop.permute.xlu1 %840 }
 0x10e   : > { %1454 = vrot.lane.b32.xlu0 %v1444_v5, %s2340_s24  ;;  %v3071_v8 = vadd.f32 %v841_v63, %v2772_v52  ;;  %v666_v38 = vsel %vm660_vm5, %v658_v24, 0.0 }
 0x10f   : > { %1452 = vrot.lane.b32.xlu1 %v1443_v60, %s2340_s24 }
 0x111   : > { %v1034_v31 = vpop.permute.xlu1 %1033 }
 0x113   : > { %1456 = vrot.lane.b32.xlu1 %v3005_v35, %s2340_s24 }
 0x115   : > { %v1038_v15 = vpop.permute.xlu1 %1037 }
 0x116   : > { %v3094_v32 = vadd.f32 %v1038_v15, %v3423_v0 }
 0x16f   : > { %v3009_v46 = vpop.permute.xlu1 %1298 }
 0x170   : > { %v3011_v27 = vpop.permute.xlu0 %1296 }
 0x173   : > { %v1666_v21 = vpop.permute.xlu1 %1665 }
 0x174   : > { %v1664_v16 = vpop.permute.xlu0 %1663  ;;  %v3013_v13 = vadd.f32 %v1666_v21, %v1656_v61 }
 0x175   : > { %v3015_v57 = vadd.f32 %v1664_v16, %v1655_v10 }
 0x176   : > { %1685 = vrot.lane.b32.xlu1 %v3013_v13, %s2341_s10 }
 0x177   : > { %1683 = vrot.lane.b32.xlu0 %v3015_v57, %s2341_s10 }
 0x178   : > { %v1668_v26 = vpop.permute.xlu0 %1667 }
 0x179   : > { %v3021_v53 = vadd.f32 %v1668_v26, %v1657_v39  ;;  %v638_v39 = vadd.f32 %v2577_v22, %v2570_v19  ;;  %v648_v19 = vsub.f32 %v640_v18, %v2810_v36  ;;  %v652_v22 = vand.u32 2147483647, %v644_v50 }
 0x17b   : > { %1687 = vrot.lane.b32.xlu0 %v3021_v53, %s2341_s10  ;;  %v646_v45 = vsub.f32 %v638_v39, %v3416_v40  ;;  %v656_v33 = vand.u32 2147483647, %v648_v19  ;;  %v661_v4 = vsel %vm660_vm5, %v652_v22, 0.0  ;;  %v3424_v40 = vld [vmem:[#allocation13_spill] sm:$0xff]  ;;  %v639_v19 = vadd.f32 %v3427_v23, %v3426_v34  ;;  %v3429_v22 = vld [vmem:[#allocation20_spill] sm:$0xff] }
 0x17c   : > { %v1451_v6 = vpop.permute.xlu0 %1450 }
 0x17d   : > { %v1670_v37 = vpop.permute.xlu1 %1669  ;;  %v3025_v47 = vadd.f32 %v1451_v6, %v1442_v55  ;;  %v654_v20 = vand.u32 2147483647, %v646_v45  ;;  %v664_v29 = vsel %vm660_vm5, %v656_v33, 0.0  ;;  %v3083_v55 = vadd.f32 %v1034_v31, %v3421_v30  ;;  %v3425_v45 = vld [vmem:[#allocation14_spill] sm:$0xff] }
 0x17e   : > { %v3027_v61 = vadd.f32 %v1670_v37, %v1658_v44  ;;  %v637_v25 = vadd.f32 %v3425_v45, %v3424_v40  ;;  %v647_v33 = vsub.f32 %v639_v19, %v3431_v28 }
 0x17f   : > { %1470 = vrot.lane.b32.xlu0 %v3025_v47, %s2341_s10  ;;  %v662_v3 = vsel %vm660_vm5, %v654_v20, 0.0 }
 0x180   : > { %1689 = vrot.lane.b32.xlu1 %v3027_v61, %s2341_s10  ;;  %v1455_v10 = vpop.permute.xlu0 %1454  ;;  %v663_v36 = vadd.f32 %v662_v3, %v661_v4  ;;  %v3432_v3 = vld [vmem:[#allocation16_spill] sm:$0xff] }
 0x181   : > { %v1453_v14 = vpop.permute.xlu1 %1452  ;;  %v3033_v41 = vadd.f32 %v1455_v10, %v1444_v5 }
 0x182   : > { %v3035_v51 = vadd.f32 %v1453_v14, %v1443_v60  ;;  %v665_v11 = vadd.f32 %v664_v29, %v663_v36  ;;  %v3433_v36 = vld [vmem:[#allocation18_spill] sm:$0xff] }
 0x183   : > { %1474 = vrot.lane.b32.xlu0 %v3033_v41, %s2341_s10  ;;  %v643_v24 = vadd.f32 %v3433_v36, %v3432_v3  ;;  %v3434_v29 = vld [vmem:[#allocation26_spill] sm:$0xff] }
 0x184   : > { %1472 = vrot.lane.b32.xlu1 %v3035_v51, %s2341_s10  ;;  %v667_v52 = vadd.f32 %v666_v38, %v665_v11  ;;  %v655_v38 = vand.u32 2147483647, %v647_v33 }
 0x185   : > { %v1457_v5 = vpop.permute.xlu1 %1456 }
 0x186   : > { %v676_v44 = vsel %vm660_vm5, %v667_v52, 0.0  ;;  %v1465_v60 = vadd.f32 %v1457_v5, %v3005_v35  ;;  %v3435_v52 = vld [vmem:[#allocation25_spill] sm:$0xff]  ;;  %v670_v5 = vsel %vm668_vm7, %v655_v38, 0.0 }
 0x187   : > { %v651_v1 = vsub.f32 %v643_v24, %v3435_v52 }
 0x188   : > { %854 = vrot.lane.b32.xlu1 %v3040_v56, %s2341_s10 }
 0x18c   : > { %856 = vrot.lane.b32.xlu1 %v3055_v54, %s2341_s10 }
 0x190   : > { %858 = vrot.lane.b32.xlu1 %v3063_v49, %s2341_s10 }
 0x194   : > { %860 = vrot.lane.b32.xlu1 %v3071_v8, %s2341_s10 }
 0x198   : > { %1051 = vrot.lane.b32.xlu1 %v3077_v9, %s2341_s10 }
 0x19c   : > { %1053 = vrot.lane.b32.xlu1 %v3083_v55, %s2341_s10 }
 0x1a0   : > { %1055 = vrot.lane.b32.xlu1 %v3088_v59, %s2341_s10 }
 0x1a2   : > { %677 = vadd.xlane.f32.xlu0 %v676_v44 }
 0x1a4   : > { %1057 = vrot.lane.b32.xlu1 %v3094_v32, %s2341_s10 }
 0x1a8   : > { %1719 = vrot.lane.b32.xlu1 %v3015_v57, %s2342_s19 }
 0x1ac   : > { %1723 = vrot.lane.b32.xlu1 %v3021_v53, %s2342_s19 }
 0x1b0   : > { %1476 = vrot.lane.b32.xlu1 %v1465_v60, %s2341_s10 }
 0x1b4   : > { %1506 = vrot.lane.b32.xlu1 %v3025_v47, %s2342_s19 }
 0x1b8   : > { %1510 = vrot.lane.b32.xlu1 %v3033_v41, %s2342_s19  ;;  %1721 = vrot.lane.b32.xlu0 %v3013_v13, %s2342_s19 }
 0x1bc   : > { %1725 = vrot.lane.b32.xlu0 %v3027_v61, %s2342_s19 }
 0x1c0   : > { %1508 = vrot.lane.b32.xlu0 %v3035_v51, %s2342_s19 }
 0x1c4   : > { %1512 = vrot.lane.b32.xlu0 %v1465_v60, %s2342_s19 }
 0x1e8   : > { %v1686_v2 = vpop.permute.xlu1 %1685 }
 0x1e9   : > { %v1684_v17 = vpop.permute.xlu0 %1683  ;;  %v3121_v63 = vadd.f32 %v1686_v2, %v3013_v13  ;;  %v659_v2 = vand.u32 2147483647, %v651_v1 }
 0x1ea   : > { %v3116_v35 = vadd.f32 %v1684_v17, %v3015_v57 }
 0x1ec   : > { %1703 = vrot.lane.b32.xlu1 %v3116_v35, %s2343_s13 }
 0x1ed   : > { %v1688_v43 = vpop.permute.xlu0 %1687 }
 0x1ee   : > { %v3126_v7 = vadd.f32 %v1688_v43, %v3021_v53 }
 0x1f0   : > { %1705 = vrot.lane.b32.xlu1 %v3121_v63, %s2343_s13 }
 0x1f1   : > { %v1471_v62 = vpop.permute.xlu0 %1470 }
 0x1f2   : > { %v1690_v31 = vpop.permute.xlu1 %1689  ;;  %v3136_v21 = vadd.f32 %v1471_v62, %v3025_v47  ;;  %v674_v62 = vsel %vm668_vm7, %v659_v2, 0.0 }
 0x1f3   : > { %v3129_v15 = vadd.f32 %v1690_v31, %v3027_v61 }
 0x1f4   : > { %1707 = vrot.lane.b32.xlu1 %v3126_v7, %s2343_s13 }
 0x1f5   : > { %1709 = vrot.lane.b32.xlu0 %v3129_v15, %s2343_s13  ;;  %v1475_v13 = vpop.permute.xlu0 %1474 }
 0x1f6   : > { %v1473_v58 = vpop.permute.xlu1 %1472  ;;  %v3146_v26 = vadd.f32 %v1475_v13, %v3033_v41  ;;  %v1306_v41 = vsel %vm1302_vm6, %v3009_v46, 0.0  ;;  %v645_v46 = vsub.f32 %v637_v25, %v3430_v12 }
 0x1f7   : > { %v3139_v16 = vadd.f32 %v1473_v58, %v3035_v51  ;;  %v1303_v51 = vsel %vm1302_vm6, %v3011_v27, 0.0  ;;  %v3428_v27 = vld [vmem:[#allocation19_spill] sm:$0xff] }
 0x1f8   : > { %v641_v20 = vadd.f32 %v3429_v22, %v3428_v27  ;;  %v653_v11 = vand.u32 2147483647, %v645_v46 }
 0x1f9   : > { %1492 = vrot.lane.b32.xlu1 %v3139_v16, %s2343_s13  ;;  %1490 = vrot.lane.b32.xlu0 %v3136_v21, %s2343_s13 }
 0x1fa   : > { %v855_v57 = vpop.permute.xlu1 %854  ;;  %v649_v42 = vsub.f32 %v641_v20, %v3434_v29  ;;  %v669_v0 = vsel %vm668_vm7, %v653_v11, 0.0 }
 0x1fb   : > { %v3171_v4 = vadd.f32 %v855_v57, %v3040_v56  ;;  %v671_v17 = vadd.f32 %v670_v5, %v669_v0 }
 0x1fc   : > { %v657_v44 = vand.u32 2147483647, %v649_v42 }
 0x1fd   : > { %1494 = vrot.lane.b32.xlu1 %v3146_v26, %s2343_s13 }
 0x1fe   : > { %v857_v53 = vpop.permute.xlu1 %856  ;;  %v672_v43 = vsel %vm668_vm7, %v657_v44, 0.0 }
 0x1ff   : > { %v673_v31 = vadd.f32 %v672_v43, %v671_v17 }
 0x201   : > { %v675_v58 = vadd.f32 %v674_v62, %v673_v31 }
 0x202   : > { %v859_v6 = vpop.permute.xlu1 %858 }
 0x203   : > { %v679_v13 = vsel %vm668_vm7, %v675_v58, 0.0 }
 0x206   : > { %v861_v37 = vpop.permute.xlu1 %860 }
 0x207   : > { %v3216_v45 = vadd.f32 %v861_v37, %v3071_v8 }
 0x20a   : > { %v1052_v47 = vpop.permute.xlu1 %1051 }
 0x20b   : > { %v3179_v30 = vadd.f32 %v1052_v47, %v3077_v9 }
 0x20e   : > { %v3150_v61 = vpop.permute.xlu1 %1053 }
 0x212   : > { %v1056_v10 = vpop.permute.xlu1 %1055 }
 0x216   : > { %v3152_v14 = vpop.permute.xlu1 %1057 }
 0x217   : > { %v3229_v37 = vadd.f32 %v3152_v14, %v3094_v32 }
 0x218   : > { %1304 = vadd.xlane.f32.xlu0 %v1303_v51  ;;  %v3205_v51 = vadd.f32 %v857_v53, %v3055_v54 }
 0x21a   : > { %v1720_v48 = vpop.permute.xlu1 %1719 }
 0x21c   : > { %1307 = vadd.xlane.f32.xlu0 %v1306_v41 }
 0x21e   : > { %v3156_v39 = vpop.permute.xlu1 %1723 }
 0x222   : > { %v1477_v18 = vpop.permute.xlu1 %1476 }
 0x223   : > { %v3158_v50 = vadd.f32 %v1477_v18, %v1465_v60  ;;  %v3187_v60 = vadd.f32 %v1056_v10, %v3088_v59 }
 0x225   : > { %1496 = vrot.lane.b32.xlu1 %v3158_v50, %s2343_s13 }
 0x22b   : > { %v3202_v57 = vpop.xlane.xlu0 %677 }
 0x22f   : > { %v1722_v47 = vpop.permute.xlu0 %1721 }
 0x232   : > { %874 = vrot.lane.b32.xlu0 %v3171_v4, %s2343_s13 }
 0x233   : > { %v1726_v10 = vpop.permute.xlu0 %1725 }
 0x236   : > { %1071 = vrot.lane.b32.xlu0 %v3179_v30, %s2343_s13 }
 0x237   : > { %v1509_v18 = vpop.permute.xlu0 %1508 }
 0x23a   : > { %1075 = vrot.lane.b32.xlu0 %v3187_v60, %s2343_s13 }
 0x23b   : > { %v1513_v34 = vpop.permute.xlu0 %1512 }
 0x23e   : > { %890 = vrot.lane.b32.xlu0 %v3040_v56, %s2342_s19  ;;  %v1507_v56 = vpop.permute.xlu1 %1506 }
 0x242   : > { %894 = vrot.lane.b32.xlu0 %v3063_v49, %s2342_s19  ;;  %v1511_v41 = vpop.permute.xlu1 %1510 }
 0x246   : > { %1087 = vrot.lane.b32.xlu0 %v3077_v9, %s2342_s19  ;;  %v3210_v9 = vadd.f32 %v859_v6, %v3063_v49  ;;  %v3222_v49 = vadd.f32 %v3150_v61, %v3083_v55 }
 0x249   : > { %680 = vadd.xlane.f32.xlu1 %v679_v13 }
 0x24a   : > { %1091 = vrot.lane.b32.xlu0 %v3088_v59, %s2342_s19 }
 0x25a   : > { %876 = vrot.lane.b32.xlu1 %v3205_v51, %s2343_s13 }
 0x25e   : > { %878 = vrot.lane.b32.xlu1 %v3210_v9, %s2343_s13  ;;  %v1704_v59 = vpop.permute.xlu1 %1703 }
 0x25f   : > { %v1715_v40 = vadd.f32 %v1704_v59, %v3116_v35 }
 0x261   : > { %v1731_v25 = vadd.f32 %v1720_v48, %v1715_v40 }
 0x262   : > { %880 = vrot.lane.b32.xlu1 %v3216_v45, %s2343_s13  ;;  %v1706_v53 = vpop.permute.xlu1 %1705 }
 0x263   : > { %v1735_v23 = vmul.f32 0.01, %v1731_v25  ;;  %v1716_v14 = vadd.f32 %v1706_v53, %v3121_v63 }
 0x265   : > { %1743 = vrot.lane.b32.xlu0 %v1735_v23, %s2340_s24 }
 0x266   : > { %1073 = vrot.lane.b32.xlu1 %v3222_v49, %s2343_s13  ;;  %v1708_v35 = vpop.permute.xlu1 %1707 }
 0x267   : > { %v1710_v6 = vpop.permute.xlu0 %1709  ;;  %v1717_v20 = vadd.f32 %v1708_v35, %v3126_v7 }
 0x26a   : > { %1077 = vrot.lane.b32.xlu1 %v3229_v37, %s2343_s13 }
 0x26b   : > { %v1493_v48 = vpop.permute.xlu1 %1492  ;;  %v1491_v19 = vpop.permute.xlu0 %1490 }
 0x26c   : > { %v1502_v27 = vadd.f32 %v1491_v19, %v3136_v21  ;;  %v1733_v21 = vadd.f32 %v3156_v39, %v1717_v20 }
 0x26e   : > { %v1518_v61 = vadd.f32 %v1507_v56, %v1502_v27  ;;  %892 = vrot.lane.b32.xlu1 %v3055_v54, %s2342_s19  ;;  %v1732_v54 = vadd.f32 %v1722_v47, %v1716_v14  ;;  %v1737_v7 = vmul.f32 0.01, %v1733_v21 }
 0x26f   : > { %v1495_v22 = vpop.permute.xlu1 %1494 }
 0x270   : > { %v1522_v12 = vmul.f32 0.01, %v1518_v61  ;;  %v1504_v46 = vadd.f32 %v1495_v22, %v3146_v26  ;;  %v1503_v26 = vadd.f32 %v1493_v48, %v3139_v16 }
 0x272   : > { %v1520_v28 = vadd.f32 %v1511_v41, %v1504_v46  ;;  %1530 = vrot.lane.b32.xlu0 %v1522_v12, %s2340_s24  ;;  %896 = vrot.lane.b32.xlu1 %v3071_v8, %s2342_s19  ;;  %v1736_v8 = vmul.f32 0.01, %v1732_v54  ;;  %v1519_v3 = vadd.f32 %v1509_v18, %v1503_v26 }
 0x274   : > { %v1524_v33 = vmul.f32 0.01, %v1520_v28  ;;  %v1523_v63 = vmul.f32 0.01, %v1519_v3 }
 0x276   : > { %1534 = vrot.lane.b32.xlu0 %v1524_v33, %s2340_s24  ;;  %1089 = vrot.lane.b32.xlu1 %v3083_v55, %s2342_s19  ;;  %v1718_v55 = vadd.f32 %v1710_v6, %v3129_v15 }
 0x278   : > { %v1734_v24 = vadd.f32 %v1726_v10, %v1718_v55  ;;  %v685_v10 = vrot.slane %v3202_v57, 1 }
 0x27a   : > { %1747 = vrot.lane.b32.xlu0 %v1737_v7, %s2340_s24  ;;  %1093 = vrot.lane.b32.xlu1 %v3094_v32, %s2342_s19  ;;  %v1738_v32 = vmul.f32 0.01, %v1734_v24 }
 0x27e   : > { %1745 = vrot.lane.b32.xlu1 %v1736_v8, %s2340_s24 }
 0x282   : > { %1532 = vrot.lane.b32.xlu1 %v1523_v63, %s2340_s24 }
 0x297   : > { %v1497_v39 = vpop.permute.xlu1 %1496 }
 0x298   : > { %v1505_v36 = vadd.f32 %v1497_v39, %v3158_v50 }
 0x29a   : > { %v1521_v16 = vadd.f32 %v1513_v34, %v1505_v36 }
 0x29c   : > { %v1525_v29 = vmul.f32 0.01, %v1521_v16 }
 0x29e   : > { %1536 = vrot.lane.b32.xlu1 %v1525_v29, %s2340_s24 }
 0x2a1   : > { %v1305_v42 = vpop.xlane.xlu0 %1304 }
 0x2a2   : > { %1749 = vrot.lane.b32.xlu1 %v1738_v32, %s2340_s24 }
 0x2a5   : > { %v1308_v11 = vpop.xlane.xlu0 %1307 }
 0x2a9   : > { %v875_v38 = vpop.permute.xlu0 %874 }
 0x2aa   : > { %v886_v15 = vadd.f32 %v875_v38, %v3171_v4 }
 0x2ad   : > { %v1072_v52 = vpop.permute.xlu0 %1071 }
 0x2ae   : > { %v1083_v17 = vadd.f32 %v1072_v52, %v3179_v30  ;;  %v1309_v30 = vadd.f32 %v1308_v11, %v1305_v42 }
 0x2b0   : > { %v1310_v47 = vrot.slane %v1309_v30, 4 }
 0x2b1   : > { %v1076_v1 = vpop.permute.xlu0 %1075 }
 0x2b2   : > { %v1085_v43 = vadd.f32 %v1076_v1, %v3187_v60  ;;  %v1311_v41 = vadd.f32 %v1310_v47, %v1309_v30 }
 0x2b4   : > { %v1312_v53 = vrot.slane %v1311_v41, 2 }
 0x2b5   : > { %v891_v50 = vpop.permute.xlu0 %890 }
 0x2b6   : > { %v902_v44 = vadd.f32 %v891_v50, %v886_v15  ;;  %v1313_v6 = vadd.f32 %v1312_v53, %v1311_v41 }
 0x2b8   : > { %v906_v0 = vmul.f32 0.01, %v902_v44  ;;  %v1314_v20 = vrot.slane %v1313_v6, 1 }
 0x2b9   : > { %v895_v5 = vpop.permute.xlu0 %894 }
 0x2ba   : > { %911 = vst.msk [vmem:[%s3268_s8 - $0x1] sm:$0x7e] %vm910_vm8, %v906_v0 }
 0x2bd   : > { %v1088_v4 = vpop.permute.xlu0 %1087 }
 0x2be   : > { %v1099_v2 = vadd.f32 %v1088_v4, %v1083_v17 }
 0x2c0   : > { %v1103_v31 = vmul.f32 0.01, %v1099_v2 }
 0x2c1   : > { %v1092_v62 = vpop.permute.xlu0 %1091 }
 0x2c2   : > { %1107 = vst.msk [vmem:[%s3277_s1 - $0x1] sm:$0x7e] %vm910_vm8, %v1103_v31  ;;  %v1101_v58 = vadd.f32 %v1092_v62, %v1085_v43 }
 0x2c4   : > { %v1105_v13 = vmul.f32 0.01, %v1101_v58 }
 0x2c6   : > { %1109 = vst.msk [vmem:[%s3277_s1 + $0xf] sm:$0x7e] %vm910_vm8, %v1105_v13 }
 0x2d2   : > { %v681_v56 = vpop.xlane.xlu1 %680 }
 0x2d3   : > { %v686_v18 = vrot.slane %v681_v56, 1 }
 0x2d5   : > { %v687_v59 = vsel %vm684_vm1, %v685_v10, %v686_v18  ;;  %v690_v40 = vsel %vm684_vm1, %v686_v18, 0.0 }
 0x2d6   : > { %v691_v60 = vadd.f32 %v690_v40, %v687_v59  ;;  %v877_v25 = vpop.permute.xlu1 %876 }
 0x2d7   : > { %v1744_v34 = vpop.permute.xlu0 %1743  ;;  %v887_v7 = vadd.f32 %v877_v25, %v3205_v51 }
 0x2d8   : > { %v692_v57 = vrot.slane %v691_v60, 4  ;;  %1755 = vst.msk [vmem:[%s3291_s15] sm:$0x7f] %vm1542_vm9, %v1744_v34 }
 0x2da   : > { %v693_v23 = vadd.f32 %v692_v57, %v691_v60  ;;  %v879_v35 = vpop.permute.xlu1 %878 }
 0x2db   : > { %v888_v48 = vadd.f32 %v879_v35, %v3210_v9  ;;  %v1315_v9 = vadd.f32 %v1314_v20, %v1313_v6 }
 0x2dc   : > { %v694_v19 = vrot.slane %v693_v23, 2 }
 0x2dd   : > { %v904_v27 = vadd.f32 %v895_v5, %v888_v48 }
 0x2de   : > { %v695_v61 = vadd.f32 %v694_v19, %v693_v23  ;;  %v881_v22 = vpop.permute.xlu1 %880 }
 0x2df   : > { %v908_v12 = vmul.f32 0.01, %v904_v27  ;;  %v889_v63 = vadd.f32 %v881_v22, %v3216_v45 }
 0x2e0   : > { %v696_v46 = vrot.slane %v695_v61, 1 }
 0x2e1   : > { %913 = vst.msk [vmem:[%s3268_s8 + $0xf] sm:$0x7e] %vm910_vm8, %v908_v12 }
 0x2e2   : > { %v697_v28 = vadd.f32 %v696_v46, %v695_v61  ;;  %v1074_v14 = vpop.permute.xlu1 %1073 }
 0x2e3   : > { %v1084_v51 = vadd.f32 %v1074_v14, %v3222_v49 }
 0x2e4   : > { %699 = vst.msk [vmem:[%s502_s23] sm:$0x1] %vm698_vm10, %v697_v28  ;;  %v1531_v21 = vpop.permute.xlu0 %1530 }
 0x2e5   : > { %1317 = vst.msk [vmem:[%s502_s23] sm:$0x1] %vm1316_vm11, %v1315_v9 }
 0x2e6   : > { %1543 = vst.msk [vmem:[%s3306_s11] sm:$0x7f] %vm1542_vm9, %v1531_v21  ;;  %v1078_v33 = vpop.permute.xlu1 %1077 }
 0x2e7   : > { %v1086_v45 = vadd.f32 %v1078_v33, %v3229_v37 }
 0x2e8   : > { %v1535_v54 = vpop.permute.xlu0 %1534 }
 0x2e9   : > { %1545 = vst.msk [vmem:[%s3306_s11 + $0x10] sm:$0x7f] %vm1542_vm9, %v1535_v54 }
 0x2ea   : > { %v893_v26 = vpop.permute.xlu1 %892 }
 0x2eb   : > { %v903_v8 = vadd.f32 %v893_v26, %v887_v7 }
 0x2ec   : > { %v1748_v3 = vpop.permute.xlu0 %1747 }
 0x2ed   : > { %v907_v39 = vmul.f32 0.01, %v903_v8  ;;  %1757 = vst.msk [vmem:[%s3291_s15 + $0x10] sm:$0x7f] %vm1542_vm9, %v1748_v3 }
 0x2ee   : > { %v897_v55 = vpop.permute.xlu1 %896 }
 0x2ef   : > { %912 = vst.msk [vmem:[%s3268_s8 + $0x7] sm:$0x7e] %vm910_vm8, %v907_v39  ;;  %v905_v36 = vadd.f32 %v897_v55, %v889_v63 }
 0x2f1   : > { %v909_v16 = vmul.f32 0.01, %v905_v36 }
 0x2f2   : > { %v1090_v24 = vpop.permute.xlu1 %1089 }
 0x2f3   : > { %914 = vst.msk [vmem:[%s3268_s8 + $0x17] sm:$0x7e] %vm910_vm8, %v909_v16  ;;  %v1100_v29 = vadd.f32 %v1090_v24, %v1084_v51 }
 0x2f5   : > { %v1104_v32 = vmul.f32 0.01, %v1100_v29 }
 0x2f6   : > { %v1094_v42 = vpop.permute.xlu1 %1093 }
 0x2f7   : > { %1108 = vst.msk [vmem:[%s3277_s1 + $0x7] sm:$0x7e] %vm910_vm8, %v1104_v32  ;;  %v1102_v11 = vadd.f32 %v1094_v42, %v1086_v45 }
 0x2f9   : > { %v1106_v38 = vmul.f32 0.01, %v1102_v11 }
 0x2fa   : > { %v1746_v52 = vpop.permute.xlu1 %1745 }
 0x2fb   : > { %1110 = vst.msk [vmem:[%s3277_s1 + $0x17] sm:$0x7e] %vm910_vm8, %v1106_v38 }
 0x2fc   : > { %1756 = vst.msk [vmem:[%s3291_s15 + $0x8] sm:$0x7f] %vm1542_vm9, %v1746_v52 }
 0x2fe   : > { %v1533_v49 = vpop.permute.xlu1 %1532 }
 0x2ff   : > { %1544 = vst.msk [vmem:[%s3306_s11 + $0x8] sm:$0x7f] %vm1542_vm9, %v1533_v49 }
 0x310   : > { %v1537_v1 = vpop.permute.xlu1 %1536 }
 0x311   : > { %1546 = vst.msk [vmem:[%s3306_s11 + $0x18] sm:$0x7f] %vm1542_vm9, %v1537_v1 }
 0x314   : > { %v1750_v15 = vpop.permute.xlu1 %1749 }
 0x315   : > { %1758 = vst.msk [vmem:[%s3291_s15 + $0x18] sm:$0x7f] %vm1542_vm9, %v1750_v15 }
 0x316 PF: > { %s24_s29 = sadd.s32 1, %s2332_s29   ;;  %s3436_s27 = sld [smem:[#allocation9_spill]] }
 0x317   : > { %p21_p9 = scmp.ge.s32.totalorder %s24_s29, 4   ;;  %s3437_s28 = sld [smem:[#allocation10_spill]] }
 0x318   : > { %s3438_s24 = smov %s2316_s25  ;;  %s3439_s25 = smov %s2320_s26 }
 0x319   : > { %s3440_s26 = smov %s2431_s12  ;;  %23 = sbr.rel (!%p21_p9) target bundleno = 9 (0x9), region = 144 }
 0x31e   :  { %1882 = vsyncpa [#allocation3], 1 }
 0x31f   :  { %1884 = vsyncpa [#allocation3 + $0x1], 1 }
 0x320   :  { %1885 = vsyncpa [#allocation5], 1 }
 0x321   :  { %1887 = vsyncpa [#allocation5 + $0x1], 1 }

</bundles_post_ra>
